<compile_context>
chip_gen: v6e
topology: v6e:2x2x1
jax: 0.10.0
libtpu: 0.0.40
codegen_flags: <defaults>
</compile_context>

<pallas_src>
import math

import jax
import jax.numpy as jnp
from jax.experimental import pallas as pl
from jax.experimental.pallas import tpu as pltpu

# ------------------------- model hyper-parameters ---------------------------
VOCAB = 50
SEQ = 8
BATCH = 2
EMB = 32
HIDDEN = 32
NUM_LAYERS = 2
NUM_LABELS = 3

# ----------------------------- TPU layout padding ---------------------------
B_PAD = 8            # sublane-aligned batch rows
LANE = 128           # lane-padded feature width (real features in lanes [0,32))
GP = 128             # per-gate lane block (r|z|n each gets its own 128 lanes)
OUT_PAD = 128        # lane-dense padded logits width


# ------------------------------- Pallas kernel -------------------------------
def gru_fused_kernel(tok_ref, emb_ref, w_ih_ref, w_hh_ref, b_ih_ref, b_hn_ref,
                     w_out_ref, b_out_ref, o_ref, x_sc):
    """Fused embedding gather + multi-layer GRU + final Linear.

    tok_ref  : SMEM (SEQ*BATCH,) int32        token ids (scalar prefetch)
    emb_ref  : VMEM (VOCAB, LANE)             embedding table, lane-padded
    w_ih_ref : VMEM (L, LANE, 3*GP)           input->gates  (r|z|n blocks)
    w_hh_ref : VMEM (L, LANE, 3*GP)           hidden->gates (r|z|n blocks)
    b_ih_ref : VMEM (L, 1, 3*GP)              b_ir+b_hr | b_iz+b_hz | b_in
    b_hn_ref : VMEM (L, 1, GP)                b_hn only (stays inside r*(...))
    w_out_ref: VMEM (LANE, OUT_PAD)           classifier, zero-padded
    b_out_ref: VMEM (1, OUT_PAD)
    o_ref    : VMEM (B_PAD, OUT_PAD)          lane-dense logits slab
    x_sc     : VMEM (SEQ*B_PAD, LANE)         gathered layer-0 input sequence
    """
    # ---- fused embedding gather (padding rows / lanes stay zero) ----
    x_sc[...] = jnp.zeros_like(x_sc)
    for t in range(SEQ):
        for b in range(BATCH):
            tok = tok_ref[t * BATCH + b]
            x_sc[pl.ds(t * B_PAD + b, 1), :] = emb_ref[pl.ds(tok, 1), :]

    seq_val = x_sc[...]                          # (SEQ*B_PAD, LANE) register value
    h = jnp.zeros((B_PAD, LANE), jnp.float32)

    for layer in range(NUM_LAYERS):              # static unroll (2)
        w_ih = w_ih_ref[layer]                   # (LANE, 3*GP)
        w_hh = w_hh_ref[layer]                   # (LANE, 3*GP)
        b_ih = b_ih_ref[layer]                   # (1, 3*GP) folded r/z biases
        b_hn = b_hn_ref[layer]                   # (1, GP)

        # One batched MXU matmul for all timesteps' input projections
        # (off the serial dependence chain).
        xi = jnp.dot(seq_val, w_ih, preferred_element_type=jnp.float32) + b_ih

        h = jnp.zeros((B_PAD, LANE), jnp.float32)    # h0 = 0 per layer
        last_layer = layer == NUM_LAYERS - 1
        outs = []
        for t in range(SEQ):                     # static unroll (8), serial
            xt = xi[t * B_PAD:(t + 1) * B_PAD, :]            # aligned slice
            hp = jnp.dot(h, w_hh, preferred_element_type=jnp.float32)
            # merged r|z sigmoid via EUP tanh: sigma(x) = 0.5*tanh(x/2)+0.5
            rz = 0.5 * jnp.tanh(0.5 * (xt[:, :2 * GP] + hp[:, :2 * GP])) + 0.5
            r = rz[:, :GP]
            z = rz[:, GP:]
            n = jnp.tanh(xt[:, 2 * GP:] + r * (hp[:, 2 * GP:] + b_hn))
            h = (1.0 - z) * n + z * h
            if not last_layer:                   # last layer's sequence is dead
                outs.append(h)
        if not last_layer:
            seq_val = jnp.concatenate(outs, axis=0)   # aligned full-vreg concat

    # last layer, last timestep -> classifier head (lane-dense output)
    o_ref[...] = (jnp.dot(h, w_out_ref[...], preferred_element_type=jnp.float32)
                  + b_out_ref[...])


# ------------------------------ pallas wrapper --------------------------------
def _full_spec(shape):
    n = len(shape)
    return pl.BlockSpec(shape, lambda i, tok, _n=n: (0,) * _n)


def gru_forward_pallas(kparams, tokens_sb):
    """tokens_sb: (SEQ, BATCH) int32 -> logits (1, BATCH, NUM_LABELS)."""
    tokens_flat = tokens_sb.reshape(SEQ * BATCH).astype(jnp.int32)

    args = (kparams["emb"], kparams["w_ih"], kparams["w_hh"],
            kparams["b_ih"], kparams["b_hn"],
            kparams["w_out"], kparams["b_out"])

    grid_spec = pltpu.PrefetchScalarGridSpec(
        num_scalar_prefetch=1,
        grid=(1,),
        in_specs=[_full_spec(a.shape) for a in args],
        out_specs=pl.BlockSpec((B_PAD, OUT_PAD), lambda i, tok: (0, 0)),
        scratch_shapes=[pltpu.VMEM((SEQ * B_PAD, LANE), jnp.float32)],
    )

    logits_pad = pl.pallas_call(
        gru_fused_kernel,
        out_shape=jax.ShapeDtypeStruct((B_PAD, OUT_PAD), jnp.float32),
        grid_spec=grid_spec,
        compiler_params=pltpu.CompilerParams(
            dimension_semantics=("arbitrary",)),
    )(tokens_flat, *args)

    logits = logits_pad[:BATCH, :NUM_LABELS]                      # (B, L)
    return logits[None, :, :]                                     # (1, B, L)


# --------------------------- pure-JAX reference --------------------------------
def _sigmoid_exact(x):
    return 1.0 / (1.0 + jnp.exp(-x))


def gru_forward_reference(params, tokens_sb):
    H = HIDDEN
    seq = jnp.take(params["embedding"], tokens_sb, axis=0)        # (S, B, E)
    for layer in range(NUM_LAYERS):
        w_ih, w_hh = params["w_ih"][layer], params["w_hh"][layer]
        b_ih, b_hh = params["b_ih"][layer], params["b_hh"][layer]
        h = jnp.zeros((BATCH, H), jnp.float32)
        outs = []
        for t in range(SEQ):
            xt = seq[t] @ w_ih + b_ih
            hp = h @ w_hh + b_hh
            r = _sigmoid_exact(xt[:, 0:H] + hp[:, 0:H])
            z = _sigmoid_exact(xt[:, H:2 * H] + hp[:, H:2 * H])
            n = jnp.tanh(xt[:, 2 * H:3 * H] + r * hp[:, 2 * H:3 * H])
            h = (1.0 - z) * n + z * h
            outs.append(h)
        seq = jnp.stack(outs, axis=0)
    logits = seq[-1] @ params["w_out"] + params["b_out"]
    return logits[None, :, :]


# ------------------------------ parameter init --------------------------------
def init_params(key):
    ks = jax.random.split(key, 3 + 4 * NUM_LAYERS)
    bound = 1.0 / math.sqrt(HIDDEN)

    def unif(k, shape):
        return jax.random.uniform(k, shape, jnp.float32, -bound, bound)

    emb = (0.1 * jax.random.normal(ks[0], (VOCAB, EMB))).astype(jnp.float32)
    emb = emb.at[0].set(0.0)                                      # padding_idx=0

    w_ih, w_hh, b_ih, b_hh = [], [], [], []
    for l in range(NUM_LAYERS):
        k0, k1, k2, k3 = ks[3 + 4 * l: 3 + 4 * l + 4]
        in_dim = EMB if l == 0 else HIDDEN
        w_ih.append(unif(k0, (in_dim, 3 * HIDDEN)))
        w_hh.append(unif(k1, (HIDDEN, 3 * HIDDEN)))
        b_ih.append(unif(k2, (1, 3 * HIDDEN)))
        b_hh.append(unif(k3, (1, 3 * HIDDEN)))

    w_out = unif(ks[1], (HIDDEN, NUM_LABELS))
    b_out = unif(ks[2], (1, NUM_LABELS))

    return {"embedding": emb, "w_ih": w_ih, "w_hh": w_hh,
            "b_ih": b_ih, "b_hh": b_hh, "w_out": w_out, "b_out": b_out}


def pack_kernel_params(params):
    """Re-lay weights for the kernel: 128-lane gate blocks, lane/row padding,
    and b_hr/b_hz folded into b_ir/b_iz."""
    H = HIDDEN
    emb_pad = jnp.zeros((VOCAB, LANE), jnp.float32).at[:, :EMB].set(
        params["embedding"])

    w_ih_pad = jnp.zeros((NUM_LAYERS, LANE, 3 * GP), jnp.float32)
    w_hh_pad = jnp.zeros((NUM_LAYERS, LANE, 3 * GP), jnp.float32)
    b_ih_pad = jnp.zeros((NUM_LAYERS, 1, 3 * GP), jnp.float32)
    b_hn_pad = jnp.zeros((NUM_LAYERS, 1, GP), jnp.float32)

    for l in range(NUM_LAYERS):
        w_ih_l, w_hh_l = params["w_ih"][l], params["w_hh"][l]
        b_ih_l, b_hh_l = params["b_ih"][l], params["b_hh"][l]
        in_dim = w_ih_l.shape[0]
        for g in range(3):
            w_ih_pad = w_ih_pad.at[l, :in_dim, g * GP:g * GP + H].set(
                w_ih_l[:, g * H:(g + 1) * H])
            w_hh_pad = w_hh_pad.at[l, :H, g * GP:g * GP + H].set(
                w_hh_l[:, g * H:(g + 1) * H])
        # fold hidden-path biases of r and z into the input-path bias
        b_ih_pad = b_ih_pad.at[l, :, 0 * GP:0 * GP + H].set(
            b_ih_l[:, 0:H] + b_hh_l[:, 0:H])
        b_ih_pad = b_ih_pad.at[l, :, 1 * GP:1 * GP + H].set(
            b_ih_l[:, H:2 * H] + b_hh_l[:, H:2 * H])
        b_ih_pad = b_ih_pad.at[l, :, 2 * GP:2 * GP + H].set(
            b_ih_l[:, 2 * H:3 * H])
        b_hn_pad = b_hn_pad.at[l, :, :H].set(b_hh_l[:, 2 * H:3 * H])

    w_out_pad = jnp.zeros((LANE, OUT_PAD), jnp.float32).at[
        :H, :NUM_LABELS].set(params["w_out"])
    b_out_pad = jnp.zeros((1, OUT_PAD), jnp.float32).at[
        :, :NUM_LABELS].set(params["b_out"])

    return {"emb": emb_pad, "w_ih": w_ih_pad, "w_hh": w_hh_pad,
            "b_ih": b_ih_pad, "b_hn": b_hn_pad,
            "w_out": w_out_pad, "b_out": b_out_pad}


# ----------------------------------- main --------------------------------------
if __name__ == "__main__":
    key = jax.random.PRNGKey(0)
    pkey, tkey = jax.random.split(key)
    params = init_params(pkey)
    kparams = pack_kernel_params(params)

    # token ids in [1, VOCAB); zero the tail of sequence 1 to exercise padding_idx=0
    tokens = jax.random.randint(tkey, (SEQ, BATCH), 1, VOCAB, dtype=jnp.int32)
    tokens = tokens.at[-2:, 1].set(0)

    forward = jax.jit(gru_forward_pallas)
    out = forward(kparams, tokens)
    ref = gru_forward_reference(params, tokens)
    jax.block_until_ready((out, ref))

    assert out.shape == (1, BATCH, NUM_LABELS)
    err = float(jnp.max(jnp.abs(out - ref)))
    assert err < 1e-3, f"mismatch vs pure-JAX reference: {err}"
    print("KERNEL_OK")
</pallas_src>

<mosaic_0001>
module attributes {stable_mosaic.version = 11 : i64} {
  func.func @gru_fused_kernel(%arg0: i32, %arg1: memref<16xi32, #tpu.memory_space<smem>>, %arg2: memref<50x128xf32, #tpu.memory_space<vmem>>, %arg3: memref<2x128x384xf32, #tpu.memory_space<vmem>>, %arg4: memref<2x128x384xf32, #tpu.memory_space<vmem>>, %arg5: memref<2x1x384xf32, #tpu.memory_space<vmem>>, %arg6: memref<2x1x128xf32, #tpu.memory_space<vmem>>, %arg7: memref<128x128xf32, #tpu.memory_space<vmem>>, %arg8: memref<1x128xf32, #tpu.memory_space<vmem>>, %arg9: memref<8x128xf32, #tpu.memory_space<vmem>>, %arg10: memref<64x128xf32, #tpu.memory_space<vmem>>) attributes {dimension_semantics = [#tpu.dimension_semantics<arbitrary>], iteration_bounds = array<i64: 1>, scalar_prefetch = 1 : i64, scratch_operands = 1 : i64, tpu.core_type = #tpu.core_type<tc>, window_params = [{pipeline_mode = #tpu.pipeline_mode<synchronous>, transform_indices = @transform_0, window_bounds = array<i64: 50, 128>}, {pipeline_mode = #tpu.pipeline_mode<synchronous>, transform_indices = @transform_1, window_bounds = array<i64: 2, 128, 384>}, {pipeline_mode = #tpu.pipeline_mode<synchronous>, transform_indices = @transform_2, window_bounds = array<i64: 2, 128, 384>}, {pipeline_mode = #tpu.pipeline_mode<synchronous>, transform_indices = @transform_3, window_bounds = array<i64: 2, 1, 384>}, {pipeline_mode = #tpu.pipeline_mode<synchronous>, transform_indices = @transform_4, window_bounds = array<i64: 2, 1, 128>}, {pipeline_mode = #tpu.pipeline_mode<synchronous>, transform_indices = @transform_5, window_bounds = array<i64: 128, 128>}, {pipeline_mode = #tpu.pipeline_mode<synchronous>, transform_indices = @transform_6, window_bounds = array<i64: 1, 128>}, {pipeline_mode = #tpu.pipeline_mode<synchronous>, transform_indices = @transform_7, window_bounds = array<i64: 8, 128>}]} {
    %cst = arith.constant 0.000000e+00 : f32
    %0 = vector.broadcast %cst : f32 to vector<64x128xf32>
    %c0 = arith.constant 0 : index
    %c0_0 = arith.constant 0 : index
    %1 = vector.load %arg10[%c0, %c0_0] : memref<64x128xf32, #tpu.memory_space<vmem>>, vector<64x128xf32>
    tpu.vector_store %arg10[%c0, %c0_0], %0 {strides = array<i32>} : memref<64x128xf32, #tpu.memory_space<vmem>>, vector<64x128xf32>,
    %c0_1 = arith.constant 0 : index
    %2 = memref.load %arg1[%c0_1] : memref<16xi32, #tpu.memory_space<smem>>
    %3 = arith.index_cast %2 : i32 to index
    %c0_2 = arith.constant 0 : index
    %4 = vector.load %arg2[%3, %c0_2] : memref<50x128xf32, #tpu.memory_space<vmem>>, vector<1x128xf32>
    %c0_3 = arith.constant 0 : index
    %c0_4 = arith.constant 0 : index
    %5 = vector.load %arg10[%c0_3, %c0_4] : memref<64x128xf32, #tpu.memory_space<vmem>>, vector<1x128xf32>
    tpu.vector_store %arg10[%c0_3, %c0_4], %4 {strides = array<i32>} : memref<64x128xf32, #tpu.memory_space<vmem>>, vector<1x128xf32>,
    %c1 = arith.constant 1 : index
    %6 = memref.load %arg1[%c1] : memref<16xi32, #tpu.memory_space<smem>>
    %7 = arith.index_cast %6 : i32 to index
    %c0_5 = arith.constant 0 : index
    %8 = vector.load %arg2[%7, %c0_5] : memref<50x128xf32, #tpu.memory_space<vmem>>, vector<1x128xf32>
    %c1_6 = arith.constant 1 : index
    %c0_7 = arith.constant 0 : index
    %9 = vector.load %arg10[%c1_6, %c0_7] : memref<64x128xf32, #tpu.memory_space<vmem>>, vector<1x128xf32>
    tpu.vector_store %arg10[%c1_6, %c0_7], %8 {strides = array<i32>} : memref<64x128xf32, #tpu.memory_space<vmem>>, vector<1x128xf32>,
    %c2 = arith.constant 2 : index
    %10 = memref.load %arg1[%c2] : memref<16xi32, #tpu.memory_space<smem>>
    %11 = arith.index_cast %10 : i32 to index
    %c0_8 = arith.constant 0 : index
    %12 = vector.load %arg2[%11, %c0_8] : memref<50x128xf32, #tpu.memory_space<vmem>>, vector<1x128xf32>
    %c8 = arith.constant 8 : index
    %c0_9 = arith.constant 0 : index
    %13 = vector.load %arg10[%c8, %c0_9] : memref<64x128xf32, #tpu.memory_space<vmem>>, vector<1x128xf32>
    tpu.vector_store %arg10[%c8, %c0_9], %12 {strides = array<i32>} : memref<64x128xf32, #tpu.memory_space<vmem>>, vector<1x128xf32>,
    %c3 = arith.constant 3 : index
    %14 = memref.load %arg1[%c3] : memref<16xi32, #tpu.memory_space<smem>>
    %15 = arith.index_cast %14 : i32 to index
    %c0_10 = arith.constant 0 : index
    %16 = vector.load %arg2[%15, %c0_10] : memref<50x128xf32, #tpu.memory_space<vmem>>, vector<1x128xf32>
    %c9 = arith.constant 9 : index
    %c0_11 = arith.constant 0 : index
    %17 = vector.load %arg10[%c9, %c0_11] : memref<64x128xf32, #tpu.memory_space<vmem>>, vector<1x128xf32>
    tpu.vector_store %arg10[%c9, %c0_11], %16 {strides = array<i32>} : memref<64x128xf32, #tpu.memory_space<vmem>>, vector<1x128xf32>,
    %c4 = arith.constant 4 : index
    %18 = memref.load %arg1[%c4] : memref<16xi32, #tpu.memory_space<smem>>
    %19 = arith.index_cast %18 : i32 to index
    %c0_12 = arith.constant 0 : index
    %20 = vector.load %arg2[%19, %c0_12] : memref<50x128xf32, #tpu.memory_space<vmem>>, vector<1x128xf32>
    %c16 = arith.constant 16 : index
    %c0_13 = arith.constant 0 : index
    %21 = vector.load %arg10[%c16, %c0_13] : memref<64x128xf32, #tpu.memory_space<vmem>>, vector<1x128xf32>
    tpu.vector_store %arg10[%c16, %c0_13], %20 {strides = array<i32>} : memref<64x128xf32, #tpu.memory_space<vmem>>, vector<1x128xf32>,
    %c5 = arith.constant 5 : index
    %22 = memref.load %arg1[%c5] : memref<16xi32, #tpu.memory_space<smem>>
    %23 = arith.index_cast %22 : i32 to index
    %c0_14 = arith.constant 0 : index
    %24 = vector.load %arg2[%23, %c0_14] : memref<50x128xf32, #tpu.memory_space<vmem>>, vector<1x128xf32>
    %c17 = arith.constant 17 : index
    %c0_15 = arith.constant 0 : index
    %25 = vector.load %arg10[%c17, %c0_15] : memref<64x128xf32, #tpu.memory_space<vmem>>, vector<1x128xf32>
    tpu.vector_store %arg10[%c17, %c0_15], %24 {strides = array<i32>} : memref<64x128xf32, #tpu.memory_space<vmem>>, vector<1x128xf32>,
    %c6 = arith.constant 6 : index
    %26 = memref.load %arg1[%c6] : memref<16xi32, #tpu.memory_space<smem>>
    %27 = arith.index_cast %26 : i32 to index
    %c0_16 = arith.constant 0 : index
    %28 = vector.load %arg2[%27, %c0_16] : memref<50x128xf32, #tpu.memory_space<vmem>>, vector<1x128xf32>
    %c24 = arith.constant 24 : index
    %c0_17 = arith.constant 0 : index
    %29 = vector.load %arg10[%c24, %c0_17] : memref<64x128xf32, #tpu.memory_space<vmem>>, vector<1x128xf32>
    tpu.vector_store %arg10[%c24, %c0_17], %28 {strides = array<i32>} : memref<64x128xf32, #tpu.memory_space<vmem>>, vector<1x128xf32>,
    %c7 = arith.constant 7 : index
    %30 = memref.load %arg1[%c7] : memref<16xi32, #tpu.memory_space<smem>>
    %31 = arith.index_cast %30 : i32 to index
    %c0_18 = arith.constant 0 : index
    %32 = vector.load %arg2[%31, %c0_18] : memref<50x128xf32, #tpu.memory_space<vmem>>, vector<1x128xf32>
    %c25 = arith.constant 25 : index
    %c0_19 = arith.constant 0 : index
    %33 = vector.load %arg10[%c25, %c0_19] : memref<64x128xf32, #tpu.memory_space<vmem>>, vector<1x128xf32>
    tpu.vector_store %arg10[%c25, %c0_19], %32 {strides = array<i32>} : memref<64x128xf32, #tpu.memory_space<vmem>>, vector<1x128xf32>,
    %c8_20 = arith.constant 8 : index
    %34 = memref.load %arg1[%c8_20] : memref<16xi32, #tpu.memory_space<smem>>
    %35 = arith.index_cast %34 : i32 to index
    %c0_21 = arith.constant 0 : index
    %36 = vector.load %arg2[%35, %c0_21] : memref<50x128xf32, #tpu.memory_space<vmem>>, vector<1x128xf32>
    %c32 = arith.constant 32 : index
    %c0_22 = arith.constant 0 : index
    %37 = vector.load %arg10[%c32, %c0_22] : memref<64x128xf32, #tpu.memory_space<vmem>>, vector<1x128xf32>
    tpu.vector_store %arg10[%c32, %c0_22], %36 {strides = array<i32>} : memref<64x128xf32, #tpu.memory_space<vmem>>, vector<1x128xf32>,
    %c9_23 = arith.constant 9 : index
    %38 = memref.load %arg1[%c9_23] : memref<16xi32, #tpu.memory_space<smem>>
    %39 = arith.index_cast %38 : i32 to index
    %c0_24 = arith.constant 0 : index
    %40 = vector.load %arg2[%39, %c0_24] : memref<50x128xf32, #tpu.memory_space<vmem>>, vector<1x128xf32>
    %c33 = arith.constant 33 : index
    %c0_25 = arith.constant 0 : index
    %41 = vector.load %arg10[%c33, %c0_25] : memref<64x128xf32, #tpu.memory_space<vmem>>, vector<1x128xf32>
    tpu.vector_store %arg10[%c33, %c0_25], %40 {strides = array<i32>} : memref<64x128xf32, #tpu.memory_space<vmem>>, vector<1x128xf32>,
    %c10 = arith.constant 10 : index
    %42 = memref.load %arg1[%c10] : memref<16xi32, #tpu.memory_space<smem>>
    %43 = arith.index_cast %42 : i32 to index
    %c0_26 = arith.constant 0 : index
    %44 = vector.load %arg2[%43, %c0_26] : memref<50x128xf32, #tpu.memory_space<vmem>>, vector<1x128xf32>
    %c40 = arith.constant 40 : index
    %c0_27 = arith.constant 0 : index
    %45 = vector.load %arg10[%c40, %c0_27] : memref<64x128xf32, #tpu.memory_space<vmem>>, vector<1x128xf32>
    tpu.vector_store %arg10[%c40, %c0_27], %44 {strides = array<i32>} : memref<64x128xf32, #tpu.memory_space<vmem>>, vector<1x128xf32>,
    %c11 = arith.constant 11 : index
    %46 = memref.load %arg1[%c11] : memref<16xi32, #tpu.memory_space<smem>>
    %47 = arith.index_cast %46 : i32 to index
    %c0_28 = arith.constant 0 : index
    %48 = vector.load %arg2[%47, %c0_28] : memref<50x128xf32, #tpu.memory_space<vmem>>, vector<1x128xf32>
    %c41 = arith.constant 41 : index
    %c0_29 = arith.constant 0 : index
    %49 = vector.load %arg10[%c41, %c0_29] : memref<64x128xf32, #tpu.memory_space<vmem>>, vector<1x128xf32>
    tpu.vector_store %arg10[%c41, %c0_29], %48 {strides = array<i32>} : memref<64x128xf32, #tpu.memory_space<vmem>>, vector<1x128xf32>,
    %c12 = arith.constant 12 : index
    %50 = memref.load %arg1[%c12] : memref<16xi32, #tpu.memory_space<smem>>
    %51 = arith.index_cast %50 : i32 to index
    %c0_30 = arith.constant 0 : index
    %52 = vector.load %arg2[%51, %c0_30] : memref<50x128xf32, #tpu.memory_space<vmem>>, vector<1x128xf32>
    %c48 = arith.constant 48 : index
    %c0_31 = arith.constant 0 : index
    %53 = vector.load %arg10[%c48, %c0_31] : memref<64x128xf32, #tpu.memory_space<vmem>>, vector<1x128xf32>
    tpu.vector_store %arg10[%c48, %c0_31], %52 {strides = array<i32>} : memref<64x128xf32, #tpu.memory_space<vmem>>, vector<1x128xf32>,
    %c13 = arith.constant 13 : index
    %54 = memref.load %arg1[%c13] : memref<16xi32, #tpu.memory_space<smem>>
    %55 = arith.index_cast %54 : i32 to index
    %c0_32 = arith.constant 0 : index
    %56 = vector.load %arg2[%55, %c0_32] : memref<50x128xf32, #tpu.memory_space<vmem>>, vector<1x128xf32>
    %c49 = arith.constant 49 : index
    %c0_33 = arith.constant 0 : index
    %57 = vector.load %arg10[%c49, %c0_33] : memref<64x128xf32, #tpu.memory_space<vmem>>, vector<1x128xf32>
    tpu.vector_store %arg10[%c49, %c0_33], %56 {strides = array<i32>} : memref<64x128xf32, #tpu.memory_space<vmem>>, vector<1x128xf32>,
    %c14 = arith.constant 14 : index
    %58 = memref.load %arg1[%c14] : memref<16xi32, #tpu.memory_space<smem>>
    %59 = arith.index_cast %58 : i32 to index
    %c0_34 = arith.constant 0 : index
    %60 = vector.load %arg2[%59, %c0_34] : memref<50x128xf32, #tpu.memory_space<vmem>>, vector<1x128xf32>
    %c56 = arith.constant 56 : index
    %c0_35 = arith.constant 0 : index
    %61 = vector.load %arg10[%c56, %c0_35] : memref<64x128xf32, #tpu.memory_space<vmem>>, vector<1x128xf32>
    tpu.vector_store %arg10[%c56, %c0_35], %60 {strides = array<i32>} : memref<64x128xf32, #tpu.memory_space<vmem>>, vector<1x128xf32>,
    %c15 = arith.constant 15 : index
    %62 = memref.load %arg1[%c15] : memref<16xi32, #tpu.memory_space<smem>>
    %63 = arith.index_cast %62 : i32 to index
    %c0_36 = arith.constant 0 : index
    %64 = vector.load %arg2[%63, %c0_36] : memref<50x128xf32, #tpu.memory_space<vmem>>, vector<1x128xf32>
    %c57 = arith.constant 57 : index
    %c0_37 = arith.constant 0 : index
    %65 = vector.load %arg10[%c57, %c0_37] : memref<64x128xf32, #tpu.memory_space<vmem>>, vector<1x128xf32>
    tpu.vector_store %arg10[%c57, %c0_37], %64 {strides = array<i32>} : memref<64x128xf32, #tpu.memory_space<vmem>>, vector<1x128xf32>,
    %c0_38 = arith.constant 0 : index
    %c0_39 = arith.constant 0 : index
    %66 = vector.load %arg10[%c0_38, %c0_39] : memref<64x128xf32, #tpu.memory_space<vmem>>, vector<64x128xf32>
    %c0_40 = arith.constant 0 : index
    %c0_41 = arith.constant 0 : index
    %c0_42 = arith.constant 0 : index
    %67 = vector.load %arg3[%c0_40, %c0_41, %c0_42] : memref<2x128x384xf32, #tpu.memory_space<vmem>>, vector<1x128x384xf32>
    %68 = vector.shape_cast %67 : vector<1x128x384xf32> to vector<128x384xf32>
    %c0_43 = arith.constant 0 : index
    %c0_44 = arith.constant 0 : index
    %c0_45 = arith.constant 0 : index
    %69 = vector.load %arg4[%c0_43, %c0_44, %c0_45] : memref<2x128x384xf32, #tpu.memory_space<vmem>>, vector<1x128x384xf32>
    %70 = vector.shape_cast %69 : vector<1x128x384xf32> to vector<128x384xf32>
    %c0_46 = arith.constant 0 : index
    %c0_47 = arith.constant 0 : index
    %c0_48 = arith.constant 0 : index
    %71 = vector.load %arg5[%c0_46, %c0_47, %c0_48] : memref<2x1x384xf32, #tpu.memory_space<vmem>>, vector<1x1x384xf32>
    %72 = vector.shape_cast %71 : vector<1x1x384xf32> to vector<1x384xf32>
    %c0_49 = arith.constant 0 : index
    %c0_50 = arith.constant 0 : index
    %c0_51 = arith.constant 0 : index
    %73 = vector.load %arg6[%c0_49, %c0_50, %c0_51] : memref<2x1x128xf32, #tpu.memory_space<vmem>>, vector<1x1x128xf32>
    %74 = vector.shape_cast %73 : vector<1x1x128xf32> to vector<1x128xf32>
    %cst_52 = arith.constant dense<0.000000e+00> : vector<64x384xf32>
    %75 = tpu.matmul %66, %68, %cst_52 {dimension_numbers = #tpu.dot_dimension_numbers<[1], [0], [0], [1], [0, 0, 1, 1], [], []>} : vector<64x128xf32>, vector<128x384xf32>, vector<64x384xf32> -> vector<64x384xf32>
    %76 = vector.broadcast %72 : vector<1x384xf32> to vector<64x384xf32>
    %77 = arith.addf %75, %76 : vector<64x384xf32>
    %cst_53 = arith.constant 0.000000e+00 : f32
    %78 = vector.broadcast %cst_53 : f32 to vector<8x128xf32>
    %79 = vector.extract_strided_slice %77 {offsets = [0, 0], sizes = [8, 384], strides = [1, 1]} : vector<64x384xf32> to vector<8x384xf32>
    %cst_54 = arith.constant dense<0.000000e+00> : vector<8x384xf32>
    %80 = tpu.matmul %78, %70, %cst_54 {dimension_numbers = #tpu.dot_dimension_numbers<[1], [0], [0], [1], [0, 0, 1, 1], [], []>} : vector<8x128xf32>, vector<128x384xf32>, vector<8x384xf32> -> vector<8x384xf32>
    %81 = vector.extract_strided_slice %79 {offsets = [0, 0], sizes = [8, 256], strides = [1, 1]} : vector<8x384xf32> to vector<8x256xf32>
    %82 = vector.extract_strided_slice %80 {offsets = [0, 0], sizes = [8, 256], strides = [1, 1]} : vector<8x384xf32> to vector<8x256xf32>
    %83 = arith.addf %81, %82 : vector<8x256xf32>
    %cst_55 = arith.constant 5.000000e-01 : f32
    %84 = vector.broadcast %cst_55 : f32 to vector<8x256xf32>
    %85 = arith.mulf %84, %83 : vector<8x256xf32>
    %86 = math.tanh %85 : vector<8x256xf32>
    %cst_56 = arith.constant 5.000000e-01 : f32
    %87 = vector.broadcast %cst_56 : f32 to vector<8x256xf32>
    %88 = arith.mulf %87, %86 : vector<8x256xf32>
    %cst_57 = arith.constant 5.000000e-01 : f32
    %89 = vector.broadcast %cst_57 : f32 to vector<8x256xf32>
    %90 = arith.addf %88, %89 : vector<8x256xf32>
    %91 = vector.extract_strided_slice %90 {offsets = [0, 0], sizes = [8, 128], strides = [1, 1]} : vector<8x256xf32> to vector<8x128xf32>
    %92 = vector.extract_strided_slice %90 {offsets = [0, 128], sizes = [8, 128], strides = [1, 1]} : vector<8x256xf32> to vector<8x128xf32>
    %93 = vector.extract_strided_slice %79 {offsets = [0, 256], sizes = [8, 128], strides = [1, 1]} : vector<8x384xf32> to vector<8x128xf32>
    %94 = vector.extract_strided_slice %80 {offsets = [0, 256], sizes = [8, 128], strides = [1, 1]} : vector<8x384xf32> to vector<8x128xf32>
    %95 = vector.broadcast %74 : vector<1x128xf32> to vector<8x128xf32>
    %96 = arith.addf %94, %95 : vector<8x128xf32>
    %97 = arith.mulf %91, %96 : vector<8x128xf32>
    %98 = arith.addf %93, %97 : vector<8x128xf32>
    %99 = math.tanh %98 : vector<8x128xf32>
    %cst_58 = arith.constant 1.000000e+00 : f32
    %100 = vector.broadcast %cst_58 : f32 to vector<8x128xf32>
    %101 = arith.subf %100, %92 : vector<8x128xf32>
    %102 = arith.mulf %101, %99 : vector<8x128xf32>
    %103 = arith.mulf %92, %78 : vector<8x128xf32>
    %104 = arith.addf %102, %103 : vector<8x128xf32>
    %105 = vector.extract_strided_slice %77 {offsets = [8, 0], sizes = [8, 384], strides = [1, 1]} : vector<64x384xf32> to vector<8x384xf32>
    %cst_59 = arith.constant dense<0.000000e+00> : vector<8x384xf32>
    %106 = tpu.matmul %104, %70, %cst_59 {dimension_numbers = #tpu.dot_dimension_numbers<[1], [0], [0], [1], [0, 0, 1, 1], [], []>} : vector<8x128xf32>, vector<128x384xf32>, vector<8x384xf32> -> vector<8x384xf32>
    %107 = vector.extract_strided_slice %105 {offsets = [0, 0], sizes = [8, 256], strides = [1, 1]} : vector<8x384xf32> to vector<8x256xf32>
    %108 = vector.extract_strided_slice %106 {offsets = [0, 0], sizes = [8, 256], strides = [1, 1]} : vector<8x384xf32> to vector<8x256xf32>
    %109 = arith.addf %107, %108 : vector<8x256xf32>
    %cst_60 = arith.constant 5.000000e-01 : f32
    %110 = vector.broadcast %cst_60 : f32 to vector<8x256xf32>
    %111 = arith.mulf %110, %109 : vector<8x256xf32>
    %112 = math.tanh %111 : vector<8x256xf32>
    %cst_61 = arith.constant 5.000000e-01 : f32
    %113 = vector.broadcast %cst_61 : f32 to vector<8x256xf32>
    %114 = arith.mulf %113, %112 : vector<8x256xf32>
    %cst_62 = arith.constant 5.000000e-01 : f32
    %115 = vector.broadcast %cst_62 : f32 to vector<8x256xf32>
    %116 = arith.addf %114, %115 : vector<8x256xf32>
    %117 = vector.extract_strided_slice %116 {offsets = [0, 0], sizes = [8, 128], strides = [1, 1]} : vector<8x256xf32> to vector<8x128xf32>
    %118 = vector.extract_strided_slice %116 {offsets = [0, 128], sizes = [8, 128], strides = [1, 1]} : vector<8x256xf32> to vector<8x128xf32>
    %119 = vector.extract_strided_slice %105 {offsets = [0, 256], sizes = [8, 128], strides = [1, 1]} : vector<8x384xf32> to vector<8x128xf32>
    %120 = vector.extract_strided_slice %106 {offsets = [0, 256], sizes = [8, 128], strides = [1, 1]} : vector<8x384xf32> to vector<8x128xf32>
    %121 = vector.broadcast %74 : vector<1x128xf32> to vector<8x128xf32>
    %122 = arith.addf %120, %121 : vector<8x128xf32>
    %123 = arith.mulf %117, %122 : vector<8x128xf32>
    %124 = arith.addf %119, %123 : vector<8x128xf32>
    %125 = math.tanh %124 : vector<8x128xf32>
    %cst_63 = arith.constant 1.000000e+00 : f32
    %126 = vector.broadcast %cst_63 : f32 to vector<8x128xf32>
    %127 = arith.subf %126, %118 : vector<8x128xf32>
    %128 = arith.mulf %127, %125 : vector<8x128xf32>
    %129 = arith.mulf %118, %104 : vector<8x128xf32>
    %130 = arith.addf %128, %129 : vector<8x128xf32>
    %131 = vector.extract_strided_slice %77 {offsets = [16, 0], sizes = [8, 384], strides = [1, 1]} : vector<64x384xf32> to vector<8x384xf32>
    %cst_64 = arith.constant dense<0.000000e+00> : vector<8x384xf32>
    %132 = tpu.matmul %130, %70, %cst_64 {dimension_numbers = #tpu.dot_dimension_numbers<[1], [0], [0], [1], [0, 0, 1, 1], [], []>} : vector<8x128xf32>, vector<128x384xf32>, vector<8x384xf32> -> vector<8x384xf32>
    %133 = vector.extract_strided_slice %131 {offsets = [0, 0], sizes = [8, 256], strides = [1, 1]} : vector<8x384xf32> to vector<8x256xf32>
    %134 = vector.extract_strided_slice %132 {offsets = [0, 0], sizes = [8, 256], strides = [1, 1]} : vector<8x384xf32> to vector<8x256xf32>
    %135 = arith.addf %133, %134 : vector<8x256xf32>
    %cst_65 = arith.constant 5.000000e-01 : f32
    %136 = vector.broadcast %cst_65 : f32 to vector<8x256xf32>
    %137 = arith.mulf %136, %135 : vector<8x256xf32>
    %138 = math.tanh %137 : vector<8x256xf32>
    %cst_66 = arith.constant 5.000000e-01 : f32
    %139 = vector.broadcast %cst_66 : f32 to vector<8x256xf32>
    %140 = arith.mulf %139, %138 : vector<8x256xf32>
    %cst_67 = arith.constant 5.000000e-01 : f32
    %141 = vector.broadcast %cst_67 : f32 to vector<8x256xf32>
    %142 = arith.addf %140, %141 : vector<8x256xf32>
    %143 = vector.extract_strided_slice %142 {offsets = [0, 0], sizes = [8, 128], strides = [1, 1]} : vector<8x256xf32> to vector<8x128xf32>
    %144 = vector.extract_strided_slice %142 {offsets = [0, 128], sizes = [8, 128], strides = [1, 1]} : vector<8x256xf32> to vector<8x128xf32>
    %145 = vector.extract_strided_slice %131 {offsets = [0, 256], sizes = [8, 128], strides = [1, 1]} : vector<8x384xf32> to vector<8x128xf32>
    %146 = vector.extract_strided_slice %132 {offsets = [0, 256], sizes = [8, 128], strides = [1, 1]} : vector<8x384xf32> to vector<8x128xf32>
    %147 = vector.broadcast %74 : vector<1x128xf32> to vector<8x128xf32>
    %148 = arith.addf %146, %147 : vector<8x128xf32>
    %149 = arith.mulf %143, %148 : vector<8x128xf32>
    %150 = arith.addf %145, %149 : vector<8x128xf32>
    %151 = math.tanh %150 : vector<8x128xf32>
    %cst_68 = arith.constant 1.000000e+00 : f32
    %152 = vector.broadcast %cst_68 : f32 to vector<8x128xf32>
    %153 = arith.subf %152, %144 : vector<8x128xf32>
    %154 = arith.mulf %153, %151 : vector<8x128xf32>
    %155 = arith.mulf %144, %130 : vector<8x128xf32>
    %156 = arith.addf %154, %155 : vector<8x128xf32>
    %157 = vector.extract_strided_slice %77 {offsets = [24, 0], sizes = [8, 384], strides = [1, 1]} : vector<64x384xf32> to vector<8x384xf32>
    %cst_69 = arith.constant dense<0.000000e+00> : vector<8x384xf32>
    %158 = tpu.matmul %156, %70, %cst_69 {dimension_numbers = #tpu.dot_dimension_numbers<[1], [0], [0], [1], [0, 0, 1, 1], [], []>} : vector<8x128xf32>, vector<128x384xf32>, vector<8x384xf32> -> vector<8x384xf32>
    %159 = vector.extract_strided_slice %157 {offsets = [0, 0], sizes = [8, 256], strides = [1, 1]} : vector<8x384xf32> to vector<8x256xf32>
    %160 = vector.extract_strided_slice %158 {offsets = [0, 0], sizes = [8, 256], strides = [1, 1]} : vector<8x384xf32> to vector<8x256xf32>
    %161 = arith.addf %159, %160 : vector<8x256xf32>
    %cst_70 = arith.constant 5.000000e-01 : f32
    %162 = vector.broadcast %cst_70 : f32 to vector<8x256xf32>
    %163 = arith.mulf %162, %161 : vector<8x256xf32>
    %164 = math.tanh %163 : vector<8x256xf32>
    %cst_71 = arith.constant 5.000000e-01 : f32
    %165 = vector.broadcast %cst_71 : f32 to vector<8x256xf32>
    %166 = arith.mulf %165, %164 : vector<8x256xf32>
    %cst_72 = arith.constant 5.000000e-01 : f32
    %167 = vector.broadcast %cst_72 : f32 to vector<8x256xf32>
    %168 = arith.addf %166, %167 : vector<8x256xf32>
    %169 = vector.extract_strided_slice %168 {offsets = [0, 0], sizes = [8, 128], strides = [1, 1]} : vector<8x256xf32> to vector<8x128xf32>
    %170 = vector.extract_strided_slice %168 {offsets = [0, 128], sizes = [8, 128], strides = [1, 1]} : vector<8x256xf32> to vector<8x128xf32>
    %171 = vector.extract_strided_slice %157 {offsets = [0, 256], sizes = [8, 128], strides = [1, 1]} : vector<8x384xf32> to vector<8x128xf32>
    %172 = vector.extract_strided_slice %158 {offsets = [0, 256], sizes = [8, 128], strides = [1, 1]} : vector<8x384xf32> to vector<8x128xf32>
    %173 = vector.broadcast %74 : vector<1x128xf32> to vector<8x128xf32>
    %174 = arith.addf %172, %173 : vector<8x128xf32>
    %175 = arith.mulf %169, %174 : vector<8x128xf32>
    %176 = arith.addf %171, %175 : vector<8x128xf32>
    %177 = math.tanh %176 : vector<8x128xf32>
    %cst_73 = arith.constant 1.000000e+00 : f32
    %178 = vector.broadcast %cst_73 : f32 to vector<8x128xf32>
    %179 = arith.subf %178, %170 : vector<8x128xf32>
    %180 = arith.mulf %179, %177 : vector<8x128xf32>
    %181 = arith.mulf %170, %156 : vector<8x128xf32>
    %182 = arith.addf %180, %181 : vector<8x128xf32>
    %183 = vector.extract_strided_slice %77 {offsets = [32, 0], sizes = [8, 384], strides = [1, 1]} : vector<64x384xf32> to vector<8x384xf32>
    %cst_74 = arith.constant dense<0.000000e+00> : vector<8x384xf32>
    %184 = tpu.matmul %182, %70, %cst_74 {dimension_numbers = #tpu.dot_dimension_numbers<[1], [0], [0], [1], [0, 0, 1, 1], [], []>} : vector<8x128xf32>, vector<128x384xf32>, vector<8x384xf32> -> vector<8x384xf32>
    %185 = vector.extract_strided_slice %183 {offsets = [0, 0], sizes = [8, 256], strides = [1, 1]} : vector<8x384xf32> to vector<8x256xf32>
    %186 = vector.extract_strided_slice %184 {offsets = [0, 0], sizes = [8, 256], strides = [1, 1]} : vector<8x384xf32> to vector<8x256xf32>
    %187 = arith.addf %185, %186 : vector<8x256xf32>
    %cst_75 = arith.constant 5.000000e-01 : f32
    %188 = vector.broadcast %cst_75 : f32 to vector<8x256xf32>
    %189 = arith.mulf %188, %187 : vector<8x256xf32>
    %190 = math.tanh %189 : vector<8x256xf32>
    %cst_76 = arith.constant 5.000000e-01 : f32
    %191 = vector.broadcast %cst_76 : f32 to vector<8x256xf32>
    %192 = arith.mulf %191, %190 : vector<8x256xf32>
    %cst_77 = arith.constant 5.000000e-01 : f32
    %193 = vector.broadcast %cst_77 : f32 to vector<8x256xf32>
    %194 = arith.addf %192, %193 : vector<8x256xf32>
    %195 = vector.extract_strided_slice %194 {offsets = [0, 0], sizes = [8, 128], strides = [1, 1]} : vector<8x256xf32> to vector<8x128xf32>
    %196 = vector.extract_strided_slice %194 {offsets = [0, 128], sizes = [8, 128], strides = [1, 1]} : vector<8x256xf32> to vector<8x128xf32>
    %197 = vector.extract_strided_slice %183 {offsets = [0, 256], sizes = [8, 128], strides = [1, 1]} : vector<8x384xf32> to vector<8x128xf32>
    %198 = vector.extract_strided_slice %184 {offsets = [0, 256], sizes = [8, 128], strides = [1, 1]} : vector<8x384xf32> to vector<8x128xf32>
    %199 = vector.broadcast %74 : vector<1x128xf32> to vector<8x128xf32>
    %200 = arith.addf %198, %199 : vector<8x128xf32>
    %201 = arith.mulf %195, %200 : vector<8x128xf32>
    %202 = arith.addf %197, %201 : vector<8x128xf32>
    %203 = math.tanh %202 : vector<8x128xf32>
    %cst_78 = arith.constant 1.000000e+00 : f32
    %204 = vector.broadcast %cst_78 : f32 to vector<8x128xf32>
    %205 = arith.subf %204, %196 : vector<8x128xf32>
    %206 = arith.mulf %205, %203 : vector<8x128xf32>
    %207 = arith.mulf %196, %182 : vector<8x128xf32>
    %208 = arith.addf %206, %207 : vector<8x128xf32>
    %209 = vector.extract_strided_slice %77 {offsets = [40, 0], sizes = [8, 384], strides = [1, 1]} : vector<64x384xf32> to vector<8x384xf32>
    %cst_79 = arith.constant dense<0.000000e+00> : vector<8x384xf32>
    %210 = tpu.matmul %208, %70, %cst_79 {dimension_numbers = #tpu.dot_dimension_numbers<[1], [0], [0], [1], [0, 0, 1, 1], [], []>} : vector<8x128xf32>, vector<128x384xf32>, vector<8x384xf32> -> vector<8x384xf32>
    %211 = vector.extract_strided_slice %209 {offsets = [0, 0], sizes = [8, 256], strides = [1, 1]} : vector<8x384xf32> to vector<8x256xf32>
    %212 = vector.extract_strided_slice %210 {offsets = [0, 0], sizes = [8, 256], strides = [1, 1]} : vector<8x384xf32> to vector<8x256xf32>
    %213 = arith.addf %211, %212 : vector<8x256xf32>
    %cst_80 = arith.constant 5.000000e-01 : f32
    %214 = vector.broadcast %cst_80 : f32 to vector<8x256xf32>
    %215 = arith.mulf %214, %213 : vector<8x256xf32>
    %216 = math.tanh %215 : vector<8x256xf32>
    %cst_81 = arith.constant 5.000000e-01 : f32
    %217 = vector.broadcast %cst_81 : f32 to vector<8x256xf32>
    %218 = arith.mulf %217, %216 : vector<8x256xf32>
    %cst_82 = arith.constant 5.000000e-01 : f32
    %219 = vector.broadcast %cst_82 : f32 to vector<8x256xf32>
    %220 = arith.addf %218, %219 : vector<8x256xf32>
    %221 = vector.extract_strided_slice %220 {offsets = [0, 0], sizes = [8, 128], strides = [1, 1]} : vector<8x256xf32> to vector<8x128xf32>
    %222 = vector.extract_strided_slice %220 {offsets = [0, 128], sizes = [8, 128], strides = [1, 1]} : vector<8x256xf32> to vector<8x128xf32>
    %223 = vector.extract_strided_slice %209 {offsets = [0, 256], sizes = [8, 128], strides = [1, 1]} : vector<8x384xf32> to vector<8x128xf32>
    %224 = vector.extract_strided_slice %210 {offsets = [0, 256], sizes = [8, 128], strides = [1, 1]} : vector<8x384xf32> to vector<8x128xf32>
    %225 = vector.broadcast %74 : vector<1x128xf32> to vector<8x128xf32>
    %226 = arith.addf %224, %225 : vector<8x128xf32>
    %227 = arith.mulf %221, %226 : vector<8x128xf32>
    %228 = arith.addf %223, %227 : vector<8x128xf32>
    %229 = math.tanh %228 : vector<8x128xf32>
    %cst_83 = arith.constant 1.000000e+00 : f32
    %230 = vector.broadcast %cst_83 : f32 to vector<8x128xf32>
    %231 = arith.subf %230, %222 : vector<8x128xf32>
    %232 = arith.mulf %231, %229 : vector<8x128xf32>
    %233 = arith.mulf %222, %208 : vector<8x128xf32>
    %234 = arith.addf %232, %233 : vector<8x128xf32>
    %235 = vector.extract_strided_slice %77 {offsets = [48, 0], sizes = [8, 384], strides = [1, 1]} : vector<64x384xf32> to vector<8x384xf32>
    %cst_84 = arith.constant dense<0.000000e+00> : vector<8x384xf32>
    %236 = tpu.matmul %234, %70, %cst_84 {dimension_numbers = #tpu.dot_dimension_numbers<[1], [0], [0], [1], [0, 0, 1, 1], [], []>} : vector<8x128xf32>, vector<128x384xf32>, vector<8x384xf32> -> vector<8x384xf32>
    %237 = vector.extract_strided_slice %235 {offsets = [0, 0], sizes = [8, 256], strides = [1, 1]} : vector<8x384xf32> to vector<8x256xf32>
    %238 = vector.extract_strided_slice %236 {offsets = [0, 0], sizes = [8, 256], strides = [1, 1]} : vector<8x384xf32> to vector<8x256xf32>
    %239 = arith.addf %237, %238 : vector<8x256xf32>
    %cst_85 = arith.constant 5.000000e-01 : f32
    %240 = vector.broadcast %cst_85 : f32 to vector<8x256xf32>
    %241 = arith.mulf %240, %239 : vector<8x256xf32>
    %242 = math.tanh %241 : vector<8x256xf32>
    %cst_86 = arith.constant 5.000000e-01 : f32
    %243 = vector.broadcast %cst_86 : f32 to vector<8x256xf32>
    %244 = arith.mulf %243, %242 : vector<8x256xf32>
    %cst_87 = arith.constant 5.000000e-01 : f32
    %245 = vector.broadcast %cst_87 : f32 to vector<8x256xf32>
    %246 = arith.addf %244, %245 : vector<8x256xf32>
    %247 = vector.extract_strided_slice %246 {offsets = [0, 0], sizes = [8, 128], strides = [1, 1]} : vector<8x256xf32> to vector<8x128xf32>
    %248 = vector.extract_strided_slice %246 {offsets = [0, 128], sizes = [8, 128], strides = [1, 1]} : vector<8x256xf32> to vector<8x128xf32>
    %249 = vector.extract_strided_slice %235 {offsets = [0, 256], sizes = [8, 128], strides = [1, 1]} : vector<8x384xf32> to vector<8x128xf32>
    %250 = vector.extract_strided_slice %236 {offsets = [0, 256], sizes = [8, 128], strides = [1, 1]} : vector<8x384xf32> to vector<8x128xf32>
    %251 = vector.broadcast %74 : vector<1x128xf32> to vector<8x128xf32>
    %252 = arith.addf %250, %251 : vector<8x128xf32>
    %253 = arith.mulf %247, %252 : vector<8x128xf32>
    %254 = arith.addf %249, %253 : vector<8x128xf32>
    %255 = math.tanh %254 : vector<8x128xf32>
    %cst_88 = arith.constant 1.000000e+00 : f32
    %256 = vector.broadcast %cst_88 : f32 to vector<8x128xf32>
    %257 = arith.subf %256, %248 : vector<8x128xf32>
    %258 = arith.mulf %257, %255 : vector<8x128xf32>
    %259 = arith.mulf %248, %234 : vector<8x128xf32>
    %260 = arith.addf %258, %259 : vector<8x128xf32>
    %261 = vector.extract_strided_slice %77 {offsets = [56, 0], sizes = [8, 384], strides = [1, 1]} : vector<64x384xf32> to vector<8x384xf32>
    %cst_89 = arith.constant dense<0.000000e+00> : vector<8x384xf32>
    %262 = tpu.matmul %260, %70, %cst_89 {dimension_numbers = #tpu.dot_dimension_numbers<[1], [0], [0], [1], [0, 0, 1, 1], [], []>} : vector<8x128xf32>, vector<128x384xf32>, vector<8x384xf32> -> vector<8x384xf32>
    %263 = vector.extract_strided_slice %261 {offsets = [0, 0], sizes = [8, 256], strides = [1, 1]} : vector<8x384xf32> to vector<8x256xf32>
    %264 = vector.extract_strided_slice %262 {offsets = [0, 0], sizes = [8, 256], strides = [1, 1]} : vector<8x384xf32> to vector<8x256xf32>
    %265 = arith.addf %263, %264 : vector<8x256xf32>
    %cst_90 = arith.constant 5.000000e-01 : f32
    %266 = vector.broadcast %cst_90 : f32 to vector<8x256xf32>
    %267 = arith.mulf %266, %265 : vector<8x256xf32>
    %268 = math.tanh %267 : vector<8x256xf32>
    %cst_91 = arith.constant 5.000000e-01 : f32
    %269 = vector.broadcast %cst_91 : f32 to vector<8x256xf32>
    %270 = arith.mulf %269, %268 : vector<8x256xf32>
    %cst_92 = arith.constant 5.000000e-01 : f32
    %271 = vector.broadcast %cst_92 : f32 to vector<8x256xf32>
    %272 = arith.addf %270, %271 : vector<8x256xf32>
    %273 = vector.extract_strided_slice %272 {offsets = [0, 0], sizes = [8, 128], strides = [1, 1]} : vector<8x256xf32> to vector<8x128xf32>
    %274 = vector.extract_strided_slice %272 {offsets = [0, 128], sizes = [8, 128], strides = [1, 1]} : vector<8x256xf32> to vector<8x128xf32>
    %275 = vector.extract_strided_slice %261 {offsets = [0, 256], sizes = [8, 128], strides = [1, 1]} : vector<8x384xf32> to vector<8x128xf32>
    %276 = vector.extract_strided_slice %262 {offsets = [0, 256], sizes = [8, 128], strides = [1, 1]} : vector<8x384xf32> to vector<8x128xf32>
    %277 = vector.broadcast %74 : vector<1x128xf32> to vector<8x128xf32>
    %278 = arith.addf %276, %277 : vector<8x128xf32>
    %279 = arith.mulf %273, %278 : vector<8x128xf32>
    %280 = arith.addf %275, %279 : vector<8x128xf32>
    %281 = math.tanh %280 : vector<8x128xf32>
    %cst_93 = arith.constant 1.000000e+00 : f32
    %282 = vector.broadcast %cst_93 : f32 to vector<8x128xf32>
    %283 = arith.subf %282, %274 : vector<8x128xf32>
    %284 = arith.mulf %283, %281 : vector<8x128xf32>
    %285 = arith.mulf %274, %260 : vector<8x128xf32>
    %286 = arith.addf %284, %285 : vector<8x128xf32>
    %287 = tpu.concatenate %104, %130, %156, %182, %208, %234, %260, %286 in 0 : vector<8x128xf32>, vector<8x128xf32>, vector<8x128xf32>, vector<8x128xf32>, vector<8x128xf32>, vector<8x128xf32>, vector<8x128xf32>, vector<8x128xf32> -> vector<64x128xf32>
    %c1_94 = arith.constant 1 : index
    %c0_95 = arith.constant 0 : index
    %c0_96 = arith.constant 0 : index
    %288 = vector.load %arg3[%c1_94, %c0_95, %c0_96] : memref<2x128x384xf32, #tpu.memory_space<vmem>>, vector<1x128x384xf32>
    %289 = vector.shape_cast %288 : vector<1x128x384xf32> to vector<128x384xf32>
    %c1_97 = arith.constant 1 : index
    %c0_98 = arith.constant 0 : index
    %c0_99 = arith.constant 0 : index
    %290 = vector.load %arg4[%c1_97, %c0_98, %c0_99] : memref<2x128x384xf32, #tpu.memory_space<vmem>>, vector<1x128x384xf32>
    %291 = vector.shape_cast %290 : vector<1x128x384xf32> to vector<128x384xf32>
    %c1_100 = arith.constant 1 : index
    %c0_101 = arith.constant 0 : index
    %c0_102 = arith.constant 0 : index
    %292 = vector.load %arg5[%c1_100, %c0_101, %c0_102] : memref<2x1x384xf32, #tpu.memory_space<vmem>>, vector<1x1x384xf32>
    %293 = vector.shape_cast %292 : vector<1x1x384xf32> to vector<1x384xf32>
    %c1_103 = arith.constant 1 : index
    %c0_104 = arith.constant 0 : index
    %c0_105 = arith.constant 0 : index
    %294 = vector.load %arg6[%c1_103, %c0_104, %c0_105] : memref<2x1x128xf32, #tpu.memory_space<vmem>>, vector<1x1x128xf32>
    %295 = vector.shape_cast %294 : vector<1x1x128xf32> to vector<1x128xf32>
    %cst_106 = arith.constant dense<0.000000e+00> : vector<64x384xf32>
    %296 = tpu.matmul %287, %289, %cst_106 {dimension_numbers = #tpu.dot_dimension_numbers<[1], [0], [0], [1], [0, 0, 1, 1], [], []>} : vector<64x128xf32>, vector<128x384xf32>, vector<64x384xf32> -> vector<64x384xf32>
    %297 = vector.broadcast %293 : vector<1x384xf32> to vector<64x384xf32>
    %298 = arith.addf %296, %297 : vector<64x384xf32>
    %cst_107 = arith.constant 0.000000e+00 : f32
    %299 = vector.broadcast %cst_107 : f32 to vector<8x128xf32>
    %300 = vector.extract_strided_slice %298 {offsets = [0, 0], sizes = [8, 384], strides = [1, 1]} : vector<64x384xf32> to vector<8x384xf32>
    %cst_108 = arith.constant dense<0.000000e+00> : vector<8x384xf32>
    %301 = tpu.matmul %299, %291, %cst_108 {dimension_numbers = #tpu.dot_dimension_numbers<[1], [0], [0], [1], [0, 0, 1, 1], [], []>} : vector<8x128xf32>, vector<128x384xf32>, vector<8x384xf32> -> vector<8x384xf32>
    %302 = vector.extract_strided_slice %300 {offsets = [0, 0], sizes = [8, 256], strides = [1, 1]} : vector<8x384xf32> to vector<8x256xf32>
    %303 = vector.extract_strided_slice %301 {offsets = [0, 0], sizes = [8, 256], strides = [1, 1]} : vector<8x384xf32> to vector<8x256xf32>
    %304 = arith.addf %302, %303 : vector<8x256xf32>
    %cst_109 = arith.constant 5.000000e-01 : f32
    %305 = vector.broadcast %cst_109 : f32 to vector<8x256xf32>
    %306 = arith.mulf %305, %304 : vector<8x256xf32>
    %307 = math.tanh %306 : vector<8x256xf32>
    %cst_110 = arith.constant 5.000000e-01 : f32
    %308 = vector.broadcast %cst_110 : f32 to vector<8x256xf32>
    %309 = arith.mulf %308, %307 : vector<8x256xf32>
    %cst_111 = arith.constant 5.000000e-01 : f32
    %310 = vector.broadcast %cst_111 : f32 to vector<8x256xf32>
    %311 = arith.addf %309, %310 : vector<8x256xf32>
    %312 = vector.extract_strided_slice %311 {offsets = [0, 0], sizes = [8, 128], strides = [1, 1]} : vector<8x256xf32> to vector<8x128xf32>
    %313 = vector.extract_strided_slice %311 {offsets = [0, 128], sizes = [8, 128], strides = [1, 1]} : vector<8x256xf32> to vector<8x128xf32>
    %314 = vector.extract_strided_slice %300 {offsets = [0, 256], sizes = [8, 128], strides = [1, 1]} : vector<8x384xf32> to vector<8x128xf32>
    %315 = vector.extract_strided_slice %301 {offsets = [0, 256], sizes = [8, 128], strides = [1, 1]} : vector<8x384xf32> to vector<8x128xf32>
    %316 = vector.broadcast %295 : vector<1x128xf32> to vector<8x128xf32>
    %317 = arith.addf %315, %316 : vector<8x128xf32>
    %318 = arith.mulf %312, %317 : vector<8x128xf32>
    %319 = arith.addf %314, %318 : vector<8x128xf32>
    %320 = math.tanh %319 : vector<8x128xf32>
    %cst_112 = arith.constant 1.000000e+00 : f32
    %321 = vector.broadcast %cst_112 : f32 to vector<8x128xf32>
    %322 = arith.subf %321, %313 : vector<8x128xf32>
    %323 = arith.mulf %322, %320 : vector<8x128xf32>
    %324 = arith.mulf %313, %299 : vector<8x128xf32>
    %325 = arith.addf %323, %324 : vector<8x128xf32>
    %326 = vector.extract_strided_slice %298 {offsets = [8, 0], sizes = [8, 384], strides = [1, 1]} : vector<64x384xf32> to vector<8x384xf32>
    %cst_113 = arith.constant dense<0.000000e+00> : vector<8x384xf32>
    %327 = tpu.matmul %325, %291, %cst_113 {dimension_numbers = #tpu.dot_dimension_numbers<[1], [0], [0], [1], [0, 0, 1, 1], [], []>} : vector<8x128xf32>, vector<128x384xf32>, vector<8x384xf32> -> vector<8x384xf32>
    %328 = vector.extract_strided_slice %326 {offsets = [0, 0], sizes = [8, 256], strides = [1, 1]} : vector<8x384xf32> to vector<8x256xf32>
    %329 = vector.extract_strided_slice %327 {offsets = [0, 0], sizes = [8, 256], strides = [1, 1]} : vector<8x384xf32> to vector<8x256xf32>
    %330 = arith.addf %328, %329 : vector<8x256xf32>
    %cst_114 = arith.constant 5.000000e-01 : f32
    %331 = vector.broadcast %cst_114 : f32 to vector<8x256xf32>
    %332 = arith.mulf %331, %330 : vector<8x256xf32>
    %333 = math.tanh %332 : vector<8x256xf32>
    %cst_115 = arith.constant 5.000000e-01 : f32
    %334 = vector.broadcast %cst_115 : f32 to vector<8x256xf32>
    %335 = arith.mulf %334, %333 : vector<8x256xf32>
    %cst_116 = arith.constant 5.000000e-01 : f32
    %336 = vector.broadcast %cst_116 : f32 to vector<8x256xf32>
    %337 = arith.addf %335, %336 : vector<8x256xf32>
    %338 = vector.extract_strided_slice %337 {offsets = [0, 0], sizes = [8, 128], strides = [1, 1]} : vector<8x256xf32> to vector<8x128xf32>
    %339 = vector.extract_strided_slice %337 {offsets = [0, 128], sizes = [8, 128], strides = [1, 1]} : vector<8x256xf32> to vector<8x128xf32>
    %340 = vector.extract_strided_slice %326 {offsets = [0, 256], sizes = [8, 128], strides = [1, 1]} : vector<8x384xf32> to vector<8x128xf32>
    %341 = vector.extract_strided_slice %327 {offsets = [0, 256], sizes = [8, 128], strides = [1, 1]} : vector<8x384xf32> to vector<8x128xf32>
    %342 = vector.broadcast %295 : vector<1x128xf32> to vector<8x128xf32>
    %343 = arith.addf %341, %342 : vector<8x128xf32>
    %344 = arith.mulf %338, %343 : vector<8x128xf32>
    %345 = arith.addf %340, %344 : vector<8x128xf32>
    %346 = math.tanh %345 : vector<8x128xf32>
    %cst_117 = arith.constant 1.000000e+00 : f32
    %347 = vector.broadcast %cst_117 : f32 to vector<8x128xf32>
    %348 = arith.subf %347, %339 : vector<8x128xf32>
    %349 = arith.mulf %348, %346 : vector<8x128xf32>
    %350 = arith.mulf %339, %325 : vector<8x128xf32>
    %351 = arith.addf %349, %350 : vector<8x128xf32>
    %352 = vector.extract_strided_slice %298 {offsets = [16, 0], sizes = [8, 384], strides = [1, 1]} : vector<64x384xf32> to vector<8x384xf32>
    %cst_118 = arith.constant dense<0.000000e+00> : vector<8x384xf32>
    %353 = tpu.matmul %351, %291, %cst_118 {dimension_numbers = #tpu.dot_dimension_numbers<[1], [0], [0], [1], [0, 0, 1, 1], [], []>} : vector<8x128xf32>, vector<128x384xf32>, vector<8x384xf32> -> vector<8x384xf32>
    %354 = vector.extract_strided_slice %352 {offsets = [0, 0], sizes = [8, 256], strides = [1, 1]} : vector<8x384xf32> to vector<8x256xf32>
    %355 = vector.extract_strided_slice %353 {offsets = [0, 0], sizes = [8, 256], strides = [1, 1]} : vector<8x384xf32> to vector<8x256xf32>
    %356 = arith.addf %354, %355 : vector<8x256xf32>
    %cst_119 = arith.constant 5.000000e-01 : f32
    %357 = vector.broadcast %cst_119 : f32 to vector<8x256xf32>
    %358 = arith.mulf %357, %356 : vector<8x256xf32>
    %359 = math.tanh %358 : vector<8x256xf32>
    %cst_120 = arith.constant 5.000000e-01 : f32
    %360 = vector.broadcast %cst_120 : f32 to vector<8x256xf32>
    %361 = arith.mulf %360, %359 : vector<8x256xf32>
    %cst_121 = arith.constant 5.000000e-01 : f32
    %362 = vector.broadcast %cst_121 : f32 to vector<8x256xf32>
    %363 = arith.addf %361, %362 : vector<8x256xf32>
    %364 = vector.extract_strided_slice %363 {offsets = [0, 0], sizes = [8, 128], strides = [1, 1]} : vector<8x256xf32> to vector<8x128xf32>
    %365 = vector.extract_strided_slice %363 {offsets = [0, 128], sizes = [8, 128], strides = [1, 1]} : vector<8x256xf32> to vector<8x128xf32>
    %366 = vector.extract_strided_slice %352 {offsets = [0, 256], sizes = [8, 128], strides = [1, 1]} : vector<8x384xf32> to vector<8x128xf32>
    %367 = vector.extract_strided_slice %353 {offsets = [0, 256], sizes = [8, 128], strides = [1, 1]} : vector<8x384xf32> to vector<8x128xf32>
    %368 = vector.broadcast %295 : vector<1x128xf32> to vector<8x128xf32>
    %369 = arith.addf %367, %368 : vector<8x128xf32>
    %370 = arith.mulf %364, %369 : vector<8x128xf32>
    %371 = arith.addf %366, %370 : vector<8x128xf32>
    %372 = math.tanh %371 : vector<8x128xf32>
    %cst_122 = arith.constant 1.000000e+00 : f32
    %373 = vector.broadcast %cst_122 : f32 to vector<8x128xf32>
    %374 = arith.subf %373, %365 : vector<8x128xf32>
    %375 = arith.mulf %374, %372 : vector<8x128xf32>
    %376 = arith.mulf %365, %351 : vector<8x128xf32>
    %377 = arith.addf %375, %376 : vector<8x128xf32>
    %378 = vector.extract_strided_slice %298 {offsets = [24, 0], sizes = [8, 384], strides = [1, 1]} : vector<64x384xf32> to vector<8x384xf32>
    %cst_123 = arith.constant dense<0.000000e+00> : vector<8x384xf32>
    %379 = tpu.matmul %377, %291, %cst_123 {dimension_numbers = #tpu.dot_dimension_numbers<[1], [0], [0], [1], [0, 0, 1, 1], [], []>} : vector<8x128xf32>, vector<128x384xf32>, vector<8x384xf32> -> vector<8x384xf32>
    %380 = vector.extract_strided_slice %378 {offsets = [0, 0], sizes = [8, 256], strides = [1, 1]} : vector<8x384xf32> to vector<8x256xf32>
    %381 = vector.extract_strided_slice %379 {offsets = [0, 0], sizes = [8, 256], strides = [1, 1]} : vector<8x384xf32> to vector<8x256xf32>
    %382 = arith.addf %380, %381 : vector<8x256xf32>
    %cst_124 = arith.constant 5.000000e-01 : f32
    %383 = vector.broadcast %cst_124 : f32 to vector<8x256xf32>
    %384 = arith.mulf %383, %382 : vector<8x256xf32>
    %385 = math.tanh %384 : vector<8x256xf32>
    %cst_125 = arith.constant 5.000000e-01 : f32
    %386 = vector.broadcast %cst_125 : f32 to vector<8x256xf32>
    %387 = arith.mulf %386, %385 : vector<8x256xf32>
    %cst_126 = arith.constant 5.000000e-01 : f32
    %388 = vector.broadcast %cst_126 : f32 to vector<8x256xf32>
    %389 = arith.addf %387, %388 : vector<8x256xf32>
    %390 = vector.extract_strided_slice %389 {offsets = [0, 0], sizes = [8, 128], strides = [1, 1]} : vector<8x256xf32> to vector<8x128xf32>
    %391 = vector.extract_strided_slice %389 {offsets = [0, 128], sizes = [8, 128], strides = [1, 1]} : vector<8x256xf32> to vector<8x128xf32>
    %392 = vector.extract_strided_slice %378 {offsets = [0, 256], sizes = [8, 128], strides = [1, 1]} : vector<8x384xf32> to vector<8x128xf32>
    %393 = vector.extract_strided_slice %379 {offsets = [0, 256], sizes = [8, 128], strides = [1, 1]} : vector<8x384xf32> to vector<8x128xf32>
    %394 = vector.broadcast %295 : vector<1x128xf32> to vector<8x128xf32>
    %395 = arith.addf %393, %394 : vector<8x128xf32>
    %396 = arith.mulf %390, %395 : vector<8x128xf32>
    %397 = arith.addf %392, %396 : vector<8x128xf32>
    %398 = math.tanh %397 : vector<8x128xf32>
    %cst_127 = arith.constant 1.000000e+00 : f32
    %399 = vector.broadcast %cst_127 : f32 to vector<8x128xf32>
    %400 = arith.subf %399, %391 : vector<8x128xf32>
    %401 = arith.mulf %400, %398 : vector<8x128xf32>
    %402 = arith.mulf %391, %377 : vector<8x128xf32>
    %403 = arith.addf %401, %402 : vector<8x128xf32>
    %404 = vector.extract_strided_slice %298 {offsets = [32, 0], sizes = [8, 384], strides = [1, 1]} : vector<64x384xf32> to vector<8x384xf32>
    %cst_128 = arith.constant dense<0.000000e+00> : vector<8x384xf32>
    %405 = tpu.matmul %403, %291, %cst_128 {dimension_numbers = #tpu.dot_dimension_numbers<[1], [0], [0], [1], [0, 0, 1, 1], [], []>} : vector<8x128xf32>, vector<128x384xf32>, vector<8x384xf32> -> vector<8x384xf32>
    %406 = vector.extract_strided_slice %404 {offsets = [0, 0], sizes = [8, 256], strides = [1, 1]} : vector<8x384xf32> to vector<8x256xf32>
    %407 = vector.extract_strided_slice %405 {offsets = [0, 0], sizes = [8, 256], strides = [1, 1]} : vector<8x384xf32> to vector<8x256xf32>
    %408 = arith.addf %406, %407 : vector<8x256xf32>
    %cst_129 = arith.constant 5.000000e-01 : f32
    %409 = vector.broadcast %cst_129 : f32 to vector<8x256xf32>
    %410 = arith.mulf %409, %408 : vector<8x256xf32>
    %411 = math.tanh %410 : vector<8x256xf32>
    %cst_130 = arith.constant 5.000000e-01 : f32
    %412 = vector.broadcast %cst_130 : f32 to vector<8x256xf32>
    %413 = arith.mulf %412, %411 : vector<8x256xf32>
    %cst_131 = arith.constant 5.000000e-01 : f32
    %414 = vector.broadcast %cst_131 : f32 to vector<8x256xf32>
    %415 = arith.addf %413, %414 : vector<8x256xf32>
    %416 = vector.extract_strided_slice %415 {offsets = [0, 0], sizes = [8, 128], strides = [1, 1]} : vector<8x256xf32> to vector<8x128xf32>
    %417 = vector.extract_strided_slice %415 {offsets = [0, 128], sizes = [8, 128], strides = [1, 1]} : vector<8x256xf32> to vector<8x128xf32>
    %418 = vector.extract_strided_slice %404 {offsets = [0, 256], sizes = [8, 128], strides = [1, 1]} : vector<8x384xf32> to vector<8x128xf32>
    %419 = vector.extract_strided_slice %405 {offsets = [0, 256], sizes = [8, 128], strides = [1, 1]} : vector<8x384xf32> to vector<8x128xf32>
    %420 = vector.broadcast %295 : vector<1x128xf32> to vector<8x128xf32>
    %421 = arith.addf %419, %420 : vector<8x128xf32>
    %422 = arith.mulf %416, %421 : vector<8x128xf32>
    %423 = arith.addf %418, %422 : vector<8x128xf32>
    %424 = math.tanh %423 : vector<8x128xf32>
    %cst_132 = arith.constant 1.000000e+00 : f32
    %425 = vector.broadcast %cst_132 : f32 to vector<8x128xf32>
    %426 = arith.subf %425, %417 : vector<8x128xf32>
    %427 = arith.mulf %426, %424 : vector<8x128xf32>
    %428 = arith.mulf %417, %403 : vector<8x128xf32>
    %429 = arith.addf %427, %428 : vector<8x128xf32>
    %430 = vector.extract_strided_slice %298 {offsets = [40, 0], sizes = [8, 384], strides = [1, 1]} : vector<64x384xf32> to vector<8x384xf32>
    %cst_133 = arith.constant dense<0.000000e+00> : vector<8x384xf32>
    %431 = tpu.matmul %429, %291, %cst_133 {dimension_numbers = #tpu.dot_dimension_numbers<[1], [0], [0], [1], [0, 0, 1, 1], [], []>} : vector<8x128xf32>, vector<128x384xf32>, vector<8x384xf32> -> vector<8x384xf32>
    %432 = vector.extract_strided_slice %430 {offsets = [0, 0], sizes = [8, 256], strides = [1, 1]} : vector<8x384xf32> to vector<8x256xf32>
    %433 = vector.extract_strided_slice %431 {offsets = [0, 0], sizes = [8, 256], strides = [1, 1]} : vector<8x384xf32> to vector<8x256xf32>
    %434 = arith.addf %432, %433 : vector<8x256xf32>
    %cst_134 = arith.constant 5.000000e-01 : f32
    %435 = vector.broadcast %cst_134 : f32 to vector<8x256xf32>
    %436 = arith.mulf %435, %434 : vector<8x256xf32>
    %437 = math.tanh %436 : vector<8x256xf32>
    %cst_135 = arith.constant 5.000000e-01 : f32
    %438 = vector.broadcast %cst_135 : f32 to vector<8x256xf32>
    %439 = arith.mulf %438, %437 : vector<8x256xf32>
    %cst_136 = arith.constant 5.000000e-01 : f32
    %440 = vector.broadcast %cst_136 : f32 to vector<8x256xf32>
    %441 = arith.addf %439, %440 : vector<8x256xf32>
    %442 = vector.extract_strided_slice %441 {offsets = [0, 0], sizes = [8, 128], strides = [1, 1]} : vector<8x256xf32> to vector<8x128xf32>
    %443 = vector.extract_strided_slice %441 {offsets = [0, 128], sizes = [8, 128], strides = [1, 1]} : vector<8x256xf32> to vector<8x128xf32>
    %444 = vector.extract_strided_slice %430 {offsets = [0, 256], sizes = [8, 128], strides = [1, 1]} : vector<8x384xf32> to vector<8x128xf32>
    %445 = vector.extract_strided_slice %431 {offsets = [0, 256], sizes = [8, 128], strides = [1, 1]} : vector<8x384xf32> to vector<8x128xf32>
    %446 = vector.broadcast %295 : vector<1x128xf32> to vector<8x128xf32>
    %447 = arith.addf %445, %446 : vector<8x128xf32>
    %448 = arith.mulf %442, %447 : vector<8x128xf32>
    %449 = arith.addf %444, %448 : vector<8x128xf32>
    %450 = math.tanh %449 : vector<8x128xf32>
    %cst_137 = arith.constant 1.000000e+00 : f32
    %451 = vector.broadcast %cst_137 : f32 to vector<8x128xf32>
    %452 = arith.subf %451, %443 : vector<8x128xf32>
    %453 = arith.mulf %452, %450 : vector<8x128xf32>
    %454 = arith.mulf %443, %429 : vector<8x128xf32>
    %455 = arith.addf %453, %454 : vector<8x128xf32>
    %456 = vector.extract_strided_slice %298 {offsets = [48, 0], sizes = [8, 384], strides = [1, 1]} : vector<64x384xf32> to vector<8x384xf32>
    %cst_138 = arith.constant dense<0.000000e+00> : vector<8x384xf32>
    %457 = tpu.matmul %455, %291, %cst_138 {dimension_numbers = #tpu.dot_dimension_numbers<[1], [0], [0], [1], [0, 0, 1, 1], [], []>} : vector<8x128xf32>, vector<128x384xf32>, vector<8x384xf32> -> vector<8x384xf32>
    %458 = vector.extract_strided_slice %456 {offsets = [0, 0], sizes = [8, 256], strides = [1, 1]} : vector<8x384xf32> to vector<8x256xf32>
    %459 = vector.extract_strided_slice %457 {offsets = [0, 0], sizes = [8, 256], strides = [1, 1]} : vector<8x384xf32> to vector<8x256xf32>
    %460 = arith.addf %458, %459 : vector<8x256xf32>
    %cst_139 = arith.constant 5.000000e-01 : f32
    %461 = vector.broadcast %cst_139 : f32 to vector<8x256xf32>
    %462 = arith.mulf %461, %460 : vector<8x256xf32>
    %463 = math.tanh %462 : vector<8x256xf32>
    %cst_140 = arith.constant 5.000000e-01 : f32
    %464 = vector.broadcast %cst_140 : f32 to vector<8x256xf32>
    %465 = arith.mulf %464, %463 : vector<8x256xf32>
    %cst_141 = arith.constant 5.000000e-01 : f32
    %466 = vector.broadcast %cst_141 : f32 to vector<8x256xf32>
    %467 = arith.addf %465, %466 : vector<8x256xf32>
    %468 = vector.extract_strided_slice %467 {offsets = [0, 0], sizes = [8, 128], strides = [1, 1]} : vector<8x256xf32> to vector<8x128xf32>
    %469 = vector.extract_strided_slice %467 {offsets = [0, 128], sizes = [8, 128], strides = [1, 1]} : vector<8x256xf32> to vector<8x128xf32>
    %470 = vector.extract_strided_slice %456 {offsets = [0, 256], sizes = [8, 128], strides = [1, 1]} : vector<8x384xf32> to vector<8x128xf32>
    %471 = vector.extract_strided_slice %457 {offsets = [0, 256], sizes = [8, 128], strides = [1, 1]} : vector<8x384xf32> to vector<8x128xf32>
    %472 = vector.broadcast %295 : vector<1x128xf32> to vector<8x128xf32>
    %473 = arith.addf %471, %472 : vector<8x128xf32>
    %474 = arith.mulf %468, %473 : vector<8x128xf32>
    %475 = arith.addf %470, %474 : vector<8x128xf32>
    %476 = math.tanh %475 : vector<8x128xf32>
    %cst_142 = arith.constant 1.000000e+00 : f32
    %477 = vector.broadcast %cst_142 : f32 to vector<8x128xf32>
    %478 = arith.subf %477, %469 : vector<8x128xf32>
    %479 = arith.mulf %478, %476 : vector<8x128xf32>
    %480 = arith.mulf %469, %455 : vector<8x128xf32>
    %481 = arith.addf %479, %480 : vector<8x128xf32>
    %482 = vector.extract_strided_slice %298 {offsets = [56, 0], sizes = [8, 384], strides = [1, 1]} : vector<64x384xf32> to vector<8x384xf32>
    %cst_143 = arith.constant dense<0.000000e+00> : vector<8x384xf32>
    %483 = tpu.matmul %481, %291, %cst_143 {dimension_numbers = #tpu.dot_dimension_numbers<[1], [0], [0], [1], [0, 0, 1, 1], [], []>} : vector<8x128xf32>, vector<128x384xf32>, vector<8x384xf32> -> vector<8x384xf32>
    %484 = vector.extract_strided_slice %482 {offsets = [0, 0], sizes = [8, 256], strides = [1, 1]} : vector<8x384xf32> to vector<8x256xf32>
    %485 = vector.extract_strided_slice %483 {offsets = [0, 0], sizes = [8, 256], strides = [1, 1]} : vector<8x384xf32> to vector<8x256xf32>
    %486 = arith.addf %484, %485 : vector<8x256xf32>
    %cst_144 = arith.constant 5.000000e-01 : f32
    %487 = vector.broadcast %cst_144 : f32 to vector<8x256xf32>
    %488 = arith.mulf %487, %486 : vector<8x256xf32>
    %489 = math.tanh %488 : vector<8x256xf32>
    %cst_145 = arith.constant 5.000000e-01 : f32
    %490 = vector.broadcast %cst_145 : f32 to vector<8x256xf32>
    %491 = arith.mulf %490, %489 : vector<8x256xf32>
    %cst_146 = arith.constant 5.000000e-01 : f32
    %492 = vector.broadcast %cst_146 : f32 to vector<8x256xf32>
    %493 = arith.addf %491, %492 : vector<8x256xf32>
    %494 = vector.extract_strided_slice %493 {offsets = [0, 0], sizes = [8, 128], strides = [1, 1]} : vector<8x256xf32> to vector<8x128xf32>
    %495 = vector.extract_strided_slice %493 {offsets = [0, 128], sizes = [8, 128], strides = [1, 1]} : vector<8x256xf32> to vector<8x128xf32>
    %496 = vector.extract_strided_slice %482 {offsets = [0, 256], sizes = [8, 128], strides = [1, 1]} : vector<8x384xf32> to vector<8x128xf32>
    %497 = vector.extract_strided_slice %483 {offsets = [0, 256], sizes = [8, 128], strides = [1, 1]} : vector<8x384xf32> to vector<8x128xf32>
    %498 = vector.broadcast %295 : vector<1x128xf32> to vector<8x128xf32>
    %499 = arith.addf %497, %498 : vector<8x128xf32>
    %500 = arith.mulf %494, %499 : vector<8x128xf32>
    %501 = arith.addf %496, %500 : vector<8x128xf32>
    %502 = math.tanh %501 : vector<8x128xf32>
    %cst_147 = arith.constant 1.000000e+00 : f32
    %503 = vector.broadcast %cst_147 : f32 to vector<8x128xf32>
    %504 = arith.subf %503, %495 : vector<8x128xf32>
    %505 = arith.mulf %504, %502 : vector<8x128xf32>
    %506 = arith.mulf %495, %481 : vector<8x128xf32>
    %507 = arith.addf %505, %506 : vector<8x128xf32>
    %c0_148 = arith.constant 0 : index
    %c0_149 = arith.constant 0 : index
    %508 = vector.load %arg7[%c0_148, %c0_149] : memref<128x128xf32, #tpu.memory_space<vmem>>, vector<128x128xf32>
    %cst_150 = arith.constant dense<0.000000e+00> : vector<8x128xf32>
    %509 = tpu.matmul %507, %508, %cst_150 {dimension_numbers = #tpu.dot_dimension_numbers<[1], [0], [0], [1], [0, 0, 1, 1], [], []>} : vector<8x128xf32>, vector<128x128xf32>, vector<8x128xf32> -> vector<8x128xf32>
    %c0_151 = arith.constant 0 : index
    %c0_152 = arith.constant 0 : index
    %510 = vector.load %arg8[%c0_151, %c0_152] : memref<1x128xf32, #tpu.memory_space<vmem>>, vector<1x128xf32>
    %511 = vector.broadcast %510 : vector<1x128xf32> to vector<8x128xf32>
    %512 = arith.addf %509, %511 : vector<8x128xf32>
    %c0_153 = arith.constant 0 : index
    %c0_154 = arith.constant 0 : index
    %513 = vector.load %arg9[%c0_153, %c0_154] : memref<8x128xf32, #tpu.memory_space<vmem>>, vector<8x128xf32>
    tpu.vector_store %arg9[%c0_153, %c0_154], %512 {strides = array<i32>} : memref<8x128xf32, #tpu.memory_space<vmem>>, vector<8x128xf32>,
    return
  }
  func.func @transform_0(%arg0: i32, %arg1: memref<16xi32, #tpu.memory_space<smem>>) -> (i32, i32) {
    %c0_i32 = arith.constant 0 : i32
    %c0_i32_0 = arith.constant 0 : i32
    %c0_i32_1 = arith.constant 0 : i32
    return %c0_i32, %c0_i32_0 : i32, i32
  }
  func.func @transform_1(%arg0: i32, %arg1: memref<16xi32, #tpu.memory_space<smem>>) -> (i32, i32, i32) {
    %c0_i32 = arith.constant 0 : i32
    %c0_i32_0 = arith.constant 0 : i32
    %c0_i32_1 = arith.constant 0 : i32
    %c0_i32_2 = arith.constant 0 : i32
    return %c0_i32, %c0_i32_0, %c0_i32_1 : i32, i32, i32
  }
  func.func @transform_2(%arg0: i32, %arg1: memref<16xi32, #tpu.memory_space<smem>>) -> (i32, i32, i32) {
    %c0_i32 = arith.constant 0 : i32
    %c0_i32_0 = arith.constant 0 : i32
    %c0_i32_1 = arith.constant 0 : i32
    %c0_i32_2 = arith.constant 0 : i32
    return %c0_i32, %c0_i32_0, %c0_i32_1 : i32, i32, i32
  }
  func.func @transform_3(%arg0: i32, %arg1: memref<16xi32, #tpu.memory_space<smem>>) -> (i32, i32, i32) {
    %c0_i32 = arith.constant 0 : i32
    %c0_i32_0 = arith.constant 0 : i32
    %c0_i32_1 = arith.constant 0 : i32
    %c0_i32_2 = arith.constant 0 : i32
    return %c0_i32, %c0_i32_0, %c0_i32_1 : i32, i32, i32
  }
  func.func @transform_4(%arg0: i32, %arg1: memref<16xi32, #tpu.memory_space<smem>>) -> (i32, i32, i32) {
    %c0_i32 = arith.constant 0 : i32
    %c0_i32_0 = arith.constant 0 : i32
    %c0_i32_1 = arith.constant 0 : i32
    %c0_i32_2 = arith.constant 0 : i32
    return %c0_i32, %c0_i32_0, %c0_i32_1 : i32, i32, i32
  }
  func.func @transform_5(%arg0: i32, %arg1: memref<16xi32, #tpu.memory_space<smem>>) -> (i32, i32) {
    %c0_i32 = arith.constant 0 : i32
    %c0_i32_0 = arith.constant 0 : i32
    %c0_i32_1 = arith.constant 0 : i32
    return %c0_i32, %c0_i32_0 : i32, i32
  }
  func.func @transform_6(%arg0: i32, %arg1: memref<16xi32, #tpu.memory_space<smem>>) -> (i32, i32) {
    %c0_i32 = arith.constant 0 : i32
    %c0_i32_0 = arith.constant 0 : i32
    %c0_i32_1 = arith.constant 0 : i32
    return %c0_i32, %c0_i32_0 : i32, i32
  }
  func.func @transform_7(%arg0: i32, %arg1: memref<16xi32, #tpu.memory_space<smem>>) -> (i32, i32) {
    %c0_i32 = arith.constant 0 : i32
    %c0_i32_0 = arith.constant 0 : i32
    %c0_i32_1 = arith.constant 0 : i32
    return %c0_i32, %c0_i32_0 : i32, i32
  }
}

</mosaic_0001>

<bundles_post_ra>
// kernel: gru_forward_pallas.1
= control target key start
LH: loop header
LB: loop body
LE: loop exit
PB: predicated region body
PF: predicated region fallthrough
CT: control target
= control target key end

     0   :  { %s6806_s0 = inlined_call_operand.vmem [shape: s32[16], index: 0, kind: input, shape index: {}]   ;;  %s6807_s1 = inlined_call_operand.hbm [shape: f32[50,128], index: 1, kind: input, shape index: {}]   ;;  %s6808_s2 = inlined_call_operand.hbm [shape: f32[2,128,384], index: 2, kind: input, shape index: {}]   ;;  %s6809_s3 = inlined_call_operand.hbm [shape: f32[2,128,384], index: 3, kind: input, shape index: {}]   ;;  %s6810_s4 = inlined_call_operand.vmem [shape: f32[2,1,384], index: 4, kind: input, shape index: {}]   ;;  %s6811_s5 = inlined_call_operand.vmem [shape: f32[2,1,128], index: 5, kind: input, shape index: {}]   ;;  %s6812_s6 = inlined_call_operand.hbm [shape: f32[128,128], index: 6, kind: input, shape index: {}]   ;;  %s6813_s7 = inlined_call_operand.vmem [shape: f32[1,128], index: 7, kind: input, shape index: {}]   ;;  %s6814_s8 = inlined_call_operand.vmem [shape: f32[8,128], index: 8, kind: output, shape index: {}]  }
   0x1   :  { %s13_s29 = sshll.u32 %s6806_s0, 4  ;;  %s14_s29 = int_to_ptr.vmem [resolvable:$true] %s13_s29 }
   0x2   :  { %s4754_s30 = scalar_lea.vmem %s14_s29, 16  ;;  %p4759_p1 = scmp.lt.s32.totalorder %s14_s29, %s14_s29 }
   0x3   :  { %p4755_p0 = scmp.ne.s32.totalorder %s14_s29, %s4754_s30  ;;  %p4760_p2 = scmp.lt.s32.totalorder %s4754_s30, %s4754_s30 }
   0x5   :  { %p4761_p3 = por %p4760_p2, %p4759_p1 }
   0x7   :  { %p4762_p4 = pnand %p4761_p3, %p4755_p0 }
   0x9   :  { %4765 = shalt.err (!%p4762_p4)  }
   0xa   :  { %s4854_s9 = smov [#allocation4]  }
   0xb   :  { %16 = dma.vmem_to_smem %s14_s29, 16, %s4854_s9, [#allocation3] }
   0xc   :  { %4846 = dma.done.wait [#allocation3], 16 }
   0xd   :  { %4847 = vsyncadd [#allocation3], 4294967280 }
   0xe   :  { %18 = sfence }
   0xf   :  { %19 = vsyncpa [#allocation6], 0 }
  0x10   :  { %20 = vsyncpa [#allocation8], 0 }
  0x11   :  { %21 = vsyncpa [#allocation11], 0  ;;  %s4855_s10 = smov [#allocation7]  }
  0x12   :  { %s39_s11 = sshll.u32 %s4855_s10, 4  ;;  %s40_s11 = int_to_ptr.vmem [resolvable:$true] %s39_s11 }
  0x13   :  { %s4774_s0 = scalar_lea.vmem %s40_s11, 12288  ;;  %p4779_p6 = scmp.lt.s32.totalorder %s40_s11, %s40_s11 }
  0x14   :  { %p4775_p5 = scmp.ne.s32.totalorder %s40_s11, %s4774_s0  ;;  %p4780_p7 = scmp.lt.s32.totalorder %s4774_s0, %s4774_s0 }
  0x16   :  { %p4781_p8 = por %p4780_p7, %p4779_p6 }
  0x18   :  { %p4782_p9 = pnand %p4781_p8, %p4775_p5 }
  0x1a   :  { %4785 = shalt.err (!%p4782_p9)
}
  0x1b   :  { %s4856_s12 = smov 384   ;;  %s4857_s13 = smov 24  }
  0x1c   :  { %45 = dma.hbm_to_vmem [thread:$0]  %s6808_s2, 12288, %s40_s11, [#allocation8], %s4856_s12, %s4856_s12, %s4857_s13  }
  0x1d   :  { %s4858_s16 = smov [#allocation5]  }
  0x1e   :  { %s27_s17 = sshll.u32 %s4858_s16, 4  ;;  %s28_s17 = int_to_ptr.vmem [resolvable:$true] %s27_s17 }
  0x1f   :  { %s4794_s18 = scalar_lea.vmem %s28_s17, 896  ;;  %p4799_p11 = scmp.lt.s32.totalorder %s28_s17, %s28_s17 }
  0x20   :  { %p4795_p10 = scmp.ne.s32.totalorder %s28_s17, %s4794_s18  ;;  %p4800_p12 = scmp.lt.s32.totalorder %s4794_s18, %s4794_s18 }
  0x22   :  { %p4801_p13 = por %p4800_p12, %p4799_p11 }
  0x24   :  { %p4802_p0 = pnand %p4801_p13, %p4795_p10 }
  0x26   :  { %4805 = shalt.err (!%p4802_p0)
}
  0x27   :  { %s4859_s19 = smov 128   ;;  %s4860_s20 = smov 8  }
  0x28   :  { %33 = dma.hbm_to_vmem [thread:$0]  %s6807_s1, 896, %s28_s17, [#allocation6], %s4859_s19, %s4859_s19, %s4860_s20  }
  0x29   :  { %s4861_s23 = smov [#allocation9]   ;;  %s4862_s25 = smov [#allocation10]  }
  0x2a   :  { %s51_s24 = sshll.u32 %s4861_s23, 4  ;;  %s67_s2 = sshll.u32 %s4862_s25, 4  ;;  %s52_s24 = int_to_ptr.vmem [resolvable:$true] %s51_s24  ;;  %s68_s2 = int_to_ptr.vmem [resolvable:$true] %s67_s2 }
  0x2b   :  { %s4814_s26 = scalar_lea.vmem %s52_s24, 12288  ;;  %p4819_p2 = scmp.lt.s32.totalorder %s52_s24, %s52_s24 }
  0x2c   :  { %p4815_p1 = scmp.ne.s32.totalorder %s52_s24, %s4814_s26  ;;  %p4820_p3 = scmp.lt.s32.totalorder %s4814_s26, %s4814_s26 }
  0x2e   :  { %p4821_p4 = por %p4820_p3, %p4819_p2 }
  0x30   :  { %p4822_p5 = pnand %p4821_p4, %p4815_p1 }
  0x32   :  { %4825 = shalt.err (!%p4822_p5)
}
  0x33   :  { %57 = dma.hbm_to_vmem [thread:$0]  %s6809_s3, 12288, %s52_s24, [#allocation8], %s4856_s12, %s4856_s12, %s4857_s13  }
  0x34   :  { %s4834_s1 = scalar_lea.vmem %s68_s2, 2048  ;;  %p4839_p7 = scmp.lt.s32.totalorder %s68_s2, %s68_s2 }
  0x35   :  { %p4835_p6 = scmp.ne.s32.totalorder %s68_s2, %s4834_s1  ;;  %p4840_p8 = scmp.lt.s32.totalorder %s4834_s1, %s4834_s1 }
  0x37   :  { %p4841_p9 = por %p4840_p8, %p4839_p7 }
  0x39   :  { %p4842_p10 = pnand %p4841_p9, %p4835_p6 }
  0x3b   :  { %4845 = shalt.err (!%p4842_p10)
}
  0x3c   :  { %73 = dma.hbm_to_vmem [thread:$0]  %s6812_s6, 2048, %s68_s2, [#allocation11], %s4859_s19, %s4859_s19, %s4860_s20  }
  0x3d   :  { %4848 = dma.done.wait [#allocation6], 896  }
  0x3e   :  { %4849 = vsyncadd [#allocation6], 4294966400 }
  0x3f   :  { %4850 = dma.done.wait [#allocation8], 24576  }
  0x40   :  { %4851 = vsyncadd [#allocation8], 4294942720 }
  0x41   :  { %4852 = dma.done.wait [#allocation11], 2048  }
  0x42   :  { %4853 = vsyncadd [#allocation11], 4294965248  ;;  %v6815_v0 = vmov 0.0   ;;  %v214_v1 = vld [vmem:[#allocation7 + $0x170] sm:$0xff]  ;;  %v213_v2 = vld [vmem:[#allocation7 + $0x168] sm:$0xff]  ;;  %s4940_s3 = sld [smem:[#allocation4]] }
  0x43   :  { %346 = vmatprep.mubr.f32.mxu0 %v6815_v0  ;;  %88 = vst [vmem:[#allocation2] sm:$0xff] %v6815_v0  ;;  %89 = vst [vmem:[#allocation2 + $0x8] sm:$0xff] %v6815_v0  ;;  %v211_v3 = vld [vmem:[#allocation7 + $0x158] sm:$0xff]  ;;  %282 = vmatprep.subr.mxu0 %v214_v1  ;;  %v210_v4 = vld [vmem:[#allocation7 + $0x150] sm:$0xff]  ;;  %s4942_s6 = sld [smem:[#allocation4 + $0x1]]  ;;  %vm4864_vm0 = vmmov 0  }
  0x44   :  { %90 = vst [vmem:[#allocation2 + $0x10] sm:$0xff] %v6815_v0  ;;  %91 = vst [vmem:[#allocation2 + $0x18] sm:$0xff] %v6815_v0  ;;  %283 = vmatpush1.msra.mxu0 %v213_v2  ;;  %v208_v5 = vld [vmem:[#allocation7 + $0x140] sm:$0xff]  ;;  %v207_v6 = vld [vmem:[#allocation7 + $0x138] sm:$0xff]  ;;  %s4944_s9 = sld [smem:[#allocation4 + $0x2]] }
  0x45   :  { %92 = vst [vmem:[#allocation2 + $0x20] sm:$0xff] %v6815_v0  ;;  %93 = vst [vmem:[#allocation2 + $0x28] sm:$0xff] %v6815_v0  ;;  %284 = vmatprep.subr.mxu0 %v211_v3  ;;  %v205_v7 = vld [vmem:[#allocation7 + $0x128] sm:$0xff]  ;;  %v204_v8 = vld [vmem:[#allocation7 + $0x120] sm:$0xff]  ;;  %s4946_s10 = sld [smem:[#allocation4 + $0x3]] }
  0x46   :  { %94 = vst [vmem:[#allocation2 + $0x30] sm:$0xff] %v6815_v0  ;;  %95 = vst [vmem:[#allocation2 + $0x38] sm:$0xff] %v6815_v0  ;;  %285 = vmatpush1.msra.mxu0 %v210_v4  ;;  %v202_v9 = vld [vmem:[#allocation7 + $0x110] sm:$0xff]  ;;  %v215_v10 = vld [vmem:[#allocation7 + $0x178] sm:$0xff]  ;;  %s4948_s11 = sld [smem:[#allocation4 + $0x4]] }
  0x47   :  { %286 = vmatprep.subr.mxu0 %v208_v5  ;;  %v201_v11 = vld [vmem:[#allocation7 + $0x108] sm:$0xff]  ;;  %3866 = vmatprep.subr.mxu1 %v215_v10  ;;  %v212_v12 = vld [vmem:[#allocation7 + $0x160] sm:$0xff]  ;;  %s4950_s0 = sld [smem:[#allocation4 + $0x5]]  ;;  %v199_v13 = vld [vmem:[#allocation7 + $0xf8] sm:$0xff] }
  0x48   :  { %287 = vmatpush1.msra.mxu0 %v207_v6  ;;  %3867 = vmatpush3.msra.mxu1 %v215_v10  ;;  %v209_v14 = vld [vmem:[#allocation7 + $0x148] sm:$0xff]  ;;  %v198_v15 = vld [vmem:[#allocation7 + $0xf0] sm:$0xff]  ;;  %s4952_s12 = sld [smem:[#allocation4 + $0x6]]  ;;  %v196_v16 = vld [vmem:[#allocation7 + $0xe0] sm:$0xff]  ;;  %s97_s16 = scalar_lea.vmem [#allocation5], %s4940_s3 }
  0x49   :  { %288 = vmatprep.subr.mxu0 %v205_v7  ;;  %3868 = vmatprep.subr.mxu1 %v212_v12  ;;  %v206_v17 = vld [vmem:[#allocation7 + $0x130] sm:$0xff]  ;;  %s4954_s13 = sld [smem:[#allocation4 + $0x7]]  ;;  %v195_v18 = vld [vmem:[#allocation7 + $0xd8] sm:$0xff]  ;;  %v193_v19 = vld [vmem:[#allocation7 + $0xc8] sm:$0xff]  ;;  %s101_s17 = scalar_lea.vmem [#allocation5], %s4942_s6 }
  0x4a   :  { %289 = vmatpush1.msra.mxu0 %v204_v8  ;;  %3869 = vmatpush3.msra.mxu1 %v212_v12  ;;  %s4956_s14 = sld [smem:[#allocation4 + $0x8]]  ;;  %v203_v20 = vld [vmem:[#allocation7 + $0x118] sm:$0xff]  ;;  %v192_v21 = vld [vmem:[#allocation7 + $0xc0] sm:$0xff]  ;;  %v98_v22 = vld [vmem:[%s97_s16] sm:$0x1]  ;;  %s105_s18 = scalar_lea.vmem [#allocation5], %s4944_s9 }
  0x4b   :  { %290 = vmatprep.subr.mxu0 %v202_v9  ;;  %3870 = vmatprep.subr.mxu1 %v209_v14  ;;  %s4958_s15 = sld [smem:[#allocation4 + $0x9]]  ;;  %v102_v23 = vld [vmem:[%s101_s17] sm:$0x1]  ;;  %v190_v24 = vld [vmem:[#allocation7 + $0xb0] sm:$0xff]  ;;  %v200_v25 = vld [vmem:[#allocation7 + $0x100] sm:$0xff]  ;;  %s109_s20 = scalar_lea.vmem [#allocation5], %s4946_s10 }
  0x4c   :  { %291 = vmatpush1.msra.mxu0 %v201_v11  ;;  %3871 = vmatpush3.msra.mxu1 %v209_v14  ;;  %99 = vst [vmem:[#allocation2] sm:$0x1] %v98_v22  ;;  %103 = vst [vmem:[#allocation2 + $0x1] sm:$0x1] %v102_v23  ;;  %v189_v26 = vld [vmem:[#allocation7 + $0xa8] sm:$0xff]  ;;  %s4963_s19 = sld [smem:[#allocation4 + $0xa]] }
  0x4d   :  { %292 = vmatprep.subr.mxu0 %v199_v13  ;;  %3872 = vmatprep.subr.mxu1 %v206_v17  ;;  %v106_v27 = vld [vmem:[%s105_s18] sm:$0x1]  ;;  %v187_v28 = vld [vmem:[#allocation7 + $0x98] sm:$0xff]  ;;  %s4966_s21 = sld [smem:[#allocation4 + $0xb]]  ;;  %v186_v31 = vld [vmem:[#allocation7 + $0x90] sm:$0xff]  ;;  %s113_s23 = scalar_lea.vmem [#allocation5], %s4948_s11 }
  0x4e   :  { %293 = vmatpush1.msra.mxu0 %v198_v15  ;;  %3873 = vmatpush3.msra.mxu1 %v206_v17  ;;  %v197_v29 = vld [vmem:[#allocation7 + $0xe8] sm:$0xff]  ;;  %107 = vst [vmem:[#allocation2 + $0x8] sm:$0x1] %v106_v27  ;;  %v184_v32 = vld [vmem:[#allocation7 + $0x80] sm:$0xff]  ;;  %s4968_s22 = sld [smem:[#allocation4 + $0xc]]  ;;  %v194_v33 = vld [vmem:[#allocation7 + $0xd0] sm:$0xff] }
  0x4f   :  { %294 = vmatprep.subr.mxu0 %v196_v16  ;;  %3874 = vmatprep.subr.mxu1 %v203_v20  ;;  %v110_v30 = vld [vmem:[%s109_s20] sm:$0x1]  ;;  %s117_s24 = scalar_lea.vmem [#allocation5], %s4950_s0  ;;  %v183_v36 = vld [vmem:[#allocation7 + $0x78] sm:$0xff]  ;;  %s4972_s25 = sld [smem:[#allocation4 + $0xd]]  ;;  %v180_v38 = vld [vmem:[#allocation7 + $0x60] sm:$0xff] }
  0x50   :  { %295 = vmatpush1.msra.mxu0 %v195_v18  ;;  %3875 = vmatpush3.msra.mxu1 %v203_v20  ;;  %111 = vst [vmem:[#allocation2 + $0x9] sm:$0x1] %v110_v30  ;;  %v114_v34 = vld [vmem:[%s113_s23] sm:$0x1]  ;;  %v191_v39 = vld [vmem:[#allocation7 + $0xb8] sm:$0xff]  ;;  %s4974_s2 = sld [smem:[#allocation4 + $0xe]] }
  0x51   :  { %296 = vmatprep.subr.mxu0 %v193_v19  ;;  %3876 = vmatprep.subr.mxu1 %v200_v25  ;;  %v118_v35 = vld [vmem:[%s117_s24] sm:$0x1]  ;;  %115 = vst [vmem:[#allocation2 + $0x10] sm:$0x1] %v114_v34  ;;  %s121_s26 = scalar_lea.vmem [#allocation5], %s4952_s12  ;;  %s125_s27 = scalar_lea.vmem [#allocation5], %s4954_s13 }
  0x52   :  { %297 = vmatpush1.msra.mxu0 %v192_v21  ;;  %3877 = vmatpush3.msra.mxu1 %v200_v25  ;;  %119 = vst [vmem:[#allocation2 + $0x11] sm:$0x1] %v118_v35  ;;  %v181_v37 = vld [vmem:[#allocation7 + $0x68] sm:$0xff]  ;;  %v178_v42 = vld [vmem:[#allocation7 + $0x50] sm:$0xff]  ;;  %v188_v43 = vld [vmem:[#allocation7 + $0xa0] sm:$0xff]  ;;  %s4978_s28 = sld [smem:[#allocation4 + $0xf]] }
  0x53   :  { %298 = vmatprep.subr.mxu0 %v190_v24  ;;  %3878 = vmatprep.subr.mxu1 %v197_v29  ;;  %v122_v40 = vld [vmem:[%s121_s26] sm:$0x1]  ;;  %v175_v45 = vld [vmem:[#allocation7 + $0x38] sm:$0xff]  ;;  %s129_s1 = scalar_lea.vmem [#allocation5], %s4956_s14  ;;  %s133_s29 = scalar_lea.vmem [#allocation5], %s4958_s15  ;;  %v174_v49 = vld [vmem:[#allocation7 + $0x30] sm:$0xff] }
  0x54   :  { %299 = vmatpush1.msra.mxu0 %v189_v26  ;;  %3879 = vmatpush3.msra.mxu1 %v197_v29  ;;  %v126_v41 = vld [vmem:[%s125_s27] sm:$0x1]  ;;  %123 = vst [vmem:[#allocation2 + $0x18] sm:$0x1] %v122_v40  ;;  %v172_v50 = vld [vmem:[#allocation7 + $0x20] sm:$0xff]  ;;  %v171_v51 = vld [vmem:[#allocation7 + $0x18] sm:$0xff] }
  0x55   :  { %300 = vmatprep.subr.mxu0 %v187_v28  ;;  %3880 = vmatprep.subr.mxu1 %v194_v33  ;;  %127 = vst [vmem:[#allocation2 + $0x19] sm:$0x1] %v126_v41  ;;  %v177_v44 = vld [vmem:[#allocation7 + $0x48] sm:$0xff]  ;;  %v182_v52 = vld [vmem:[#allocation7 + $0x70] sm:$0xff]  ;;  %s137_s30 = scalar_lea.vmem [#allocation5], %s4963_s19  ;;  %s141_s3 = scalar_lea.vmem [#allocation5], %s4966_s21 }
  0x56   :  { %301 = vmatpush1.msra.mxu0 %v186_v31  ;;  %3881 = vmatpush3.msra.mxu1 %v194_v33  ;;  %v185_v46 = vld [vmem:[#allocation7 + $0x88] sm:$0xff]  ;;  %v179_v56 = vld [vmem:[#allocation7 + $0x58] sm:$0xff]  ;;  %v168_v57 = vld [vmem:[#allocation7] sm:$0xff]  ;;  %s145_s6 = scalar_lea.vmem [#allocation5], %s4968_s22  ;;  %s149_s9 = scalar_lea.vmem [#allocation5], %s4972_s25 }
  0x57   :  { %302 = vmatprep.subr.mxu0 %v184_v32  ;;  %3882 = vmatprep.subr.mxu1 %v191_v39  ;;  %v130_v47 = vld [vmem:[%s129_s1] sm:$0x1]  ;;  %v4984_v58 = vld [vmem:[#allocation9 + $0x170] sm:$0xff]  ;;  %v4992_v63 = vld [vmem:[#allocation9 + $0x158] sm:$0xff]  ;;  %s153_s10 = scalar_lea.vmem [#allocation5], %s4974_s2 }
  0x58   :  { %303 = vmatpush1.msra.mxu0 %v183_v36  ;;  %3883 = vmatpush3.msra.mxu1 %v191_v39  ;;  %v134_v48 = vld [vmem:[%s133_s29] sm:$0x1]  ;;  %131 = vst [vmem:[#allocation2 + $0x20] sm:$0x1] %v130_v47  ;;  %6875 = vst [vmem:[#allocation16_spill] sm:$0xff] %v4984_v58  ;;  %v176_v1 = vld [vmem:[#allocation7 + $0x40] sm:$0xff] }
  0x59   :  { %304 = vmatprep.subr.mxu0 %v181_v37  ;;  %3884 = vmatprep.subr.mxu1 %v188_v43  ;;  %135 = vst [vmem:[#allocation2 + $0x21] sm:$0x1] %v134_v48  ;;  %v138_v53 = vld [vmem:[%s137_s30] sm:$0x1]  ;;  %v4996_v2 = vld [vmem:[#allocation9 + $0x150] sm:$0xff]  ;;  %s157_s11 = scalar_lea.vmem [#allocation5], %s4978_s28 }
  0x5a   :  { %305 = vmatpush1.msra.mxu0 %v180_v38  ;;  %3885 = vmatpush3.msra.mxu1 %v188_v43  ;;  %v142_v54 = vld [vmem:[%s141_s3] sm:$0x1]  ;;  %139 = vst [vmem:[#allocation2 + $0x28] sm:$0x1] %v138_v53  ;;  %v161_v5 = vld [vmem:[#allocation2 + $0x8] sm:$0xff]  ;;  %v5002_v6 = vld [vmem:[#allocation9 + $0x140] sm:$0xff] }
  0x5b   :  { %306 = vmatprep.subr.mxu0 %v178_v42  ;;  %3886 = vmatprep.subr.mxu1 %v185_v46  ;;  %v169_v55 = vld [vmem:[#allocation7 + $0x8] sm:$0xff]  ;;  %143 = vst [vmem:[#allocation2 + $0x29] sm:$0x1] %v142_v54  ;;  %v5005_v7 = vld [vmem:[#allocation9 + $0x138] sm:$0xff]  ;;  %v5011_v10 = vld [vmem:[#allocation9 + $0x120] sm:$0xff] }
  0x5c   :  { %307 = vmatpush1.msra.mxu0 %v177_v44  ;;  %3887 = vmatpush3.msra.mxu1 %v185_v46  ;;  %v4986_v59 = vld [vmem:[#allocation2] sm:$0xff]  ;;  %v5015_v11 = vld [vmem:[#allocation2 + $0x10] sm:$0xff]  ;;  %v5017_v12 = vld [vmem:[#allocation9 + $0x110] sm:$0xff] }
  0x5d   :  { %308 = vmatprep.subr.mxu0 %v175_v45  ;;  %3888 = vmatprep.subr.mxu1 %v182_v52  ;;  %v146_v60 = vld [vmem:[%s145_s6] sm:$0x1]  ;;  %v5023_v14 = vld [vmem:[#allocation9 + $0xf8] sm:$0xff]  ;;  %v170_v15 = vld [vmem:[#allocation7 + $0x10] sm:$0xff] }
  0x5e   :  { %309 = vmatpush1.msra.mxu0 %v174_v49  ;;  %3889 = vmatpush3.msra.mxu1 %v182_v52  ;;  %v150_v61 = vld [vmem:[%s149_s9] sm:$0x1]  ;;  %147 = vst [vmem:[#allocation2 + $0x30] sm:$0x1] %v146_v60  ;;  %v5027_v16 = vld [vmem:[#allocation9 + $0xf0] sm:$0xff]  ;;  %v5031_v17 = vld [vmem:[#allocation2 + $0x18] sm:$0xff] }
  0x5f   :  { %310 = vmatprep.subr.mxu0 %v172_v50  ;;  %v4990_v62 = vld [vmem:[#allocation9 + $0x168] sm:$0xff]  ;;  %3890 = vmatprep.subr.mxu1 %v179_v56  ;;  %151 = vst [vmem:[#allocation2 + $0x31] sm:$0x1] %v150_v61  ;;  %v5033_v18 = vld [vmem:[#allocation9 + $0xe0] sm:$0xff]  ;;  %v5036_v19 = vld [vmem:[#allocation9 + $0xd8] sm:$0xff] }
  0x60   :  { %311 = vmatpush1.msra.mxu0 %v171_v51  ;;  %3891 = vmatpush3.msra.mxu1 %v179_v56  ;;  %v154_v3 = vld [vmem:[%s153_s10] sm:$0x1]  ;;  %v5043_v21 = vld [vmem:[#allocation9 + $0xc0] sm:$0xff]  ;;  %v5049_v23 = vld [vmem:[#allocation9 + $0xb0] sm:$0xff] }
  0x61   :  { %312 = vmatprep.subr.mxu0 %v169_v55  ;;  %v158_v4 = vld [vmem:[%s157_s11] sm:$0x1]  ;;  %155 = vst [vmem:[#allocation2 + $0x38] sm:$0x1] %v154_v3  ;;  %3892 = vmatprep.subr.mxu1 %v176_v1  ;;  %v5056_v25 = vld [vmem:[#allocation9 + $0x98] sm:$0xff]  ;;  %v5061_v26 = vld [vmem:[#allocation9 + $0x90] sm:$0xff] }
  0x62   :  { %313 = vmatpush1.msra.mxu0 %v168_v57  ;;  %159 = vst [vmem:[#allocation2 + $0x39] sm:$0x1] %v158_v4  ;;  %v5008_v8 = vld [vmem:[#allocation9 + $0x128] sm:$0xff]  ;;  %3893 = vmatpush3.msra.mxu1 %v176_v1  ;;  %v5063_v27 = vld [vmem:[#allocation9 + $0x178] sm:$0xff]  ;;  %v5067_v28 = vld [vmem:[#allocation2 + $0x28] sm:$0xff] }
  0x63   :  { %347 = vmatmul.mubr.f32.vlgmr.msra.gmra.mxu0 %v4986_v59  ;;  %500 = vmatprep.subr.mxu0 %v4984_v58  ;;  %v173_v9 = vld [vmem:[#allocation7 + $0x28] sm:$0xff]  ;;  %v5069_v29 = vld [vmem:[#allocation9 + $0x80] sm:$0xff]  ;;  %v5072_v30 = vld [vmem:[#allocation9 + $0x78] sm:$0xff] }
  0x64   :  { %501 = vmatpush1.msra.mxu0 %v4990_v62  ;;  %352 = vmatprep.mubr.f32.mxu0 %v6815_v0  ;;  %v5020_v13 = vld [vmem:[#allocation9 + $0x108] sm:$0xff]  ;;  %v5078_v32 = vld [vmem:[#allocation9 + $0x160] sm:$0xff]  ;;  %v5088_v35 = vld [vmem:[#allocation9 + $0x50] sm:$0xff] }
  0x65   :  { %502 = vmatprep.subr.mxu0 %v4992_v63  ;;  %3894 = vmatprep.subr.mxu1 %v173_v9  ;;  %v5039_v20 = vld [vmem:[#allocation9 + $0xc8] sm:$0xff]  ;;  %v5082_v33 = vld [vmem:[#allocation9 + $0x60] sm:$0xff]  ;;  %v5097_v38 = vld [vmem:[#allocation9 + $0x38] sm:$0xff] }
  0x66   :  { %503 = vmatpush1.msra.mxu0 %v4996_v2  ;;  %3895 = vmatpush3.msra.mxu1 %v173_v9  ;;  %v5047_v22 = vld [vmem:[#allocation2 + $0x20] sm:$0xff]  ;;  %v166_v34 = vld [vmem:[#allocation2 + $0x30] sm:$0xff]  ;;  %v5099_v39 = vld [vmem:[#allocation9 + $0x130] sm:$0xff] }
  0x67   :  { %353 = vmatmul.mubr.f32.gmra.mxu0 %v161_v5  ;;  %504 = vmatprep.subr.mxu0 %v5002_v6  ;;  %v5052_v24 = vld [vmem:[#allocation9 + $0xa8] sm:$0xff]  ;;  %v5103_v40 = vld [vmem:[#allocation9 + $0x30] sm:$0xff]  ;;  %v5109_v42 = vld [vmem:[#allocation9 + $0x20] sm:$0xff] }
  0x68   :  { %505 = vmatpush1.msra.mxu0 %v5005_v7  ;;  %358 = vmatprep.mubr.f32.mxu0 %v6815_v0  ;;  %v5076_v31 = vld [vmem:[#allocation9 + $0x68] sm:$0xff]  ;;  %v5111_v43 = vld [vmem:[#allocation9 + $0x118] sm:$0xff]  ;;  %v5120_v46 = vld [vmem:[#allocation9 + $0x100] sm:$0xff] }
  0x69   :  { %506 = vmatprep.subr.mxu0 %v5008_v8  ;;  %3896 = vmatprep.subr.mxu1 %v170_v15  ;;  %v5090_v36 = vld [vmem:[#allocation9 + $0x148] sm:$0xff]  ;;  %v167_v41 = vld [vmem:[#allocation2 + $0x38] sm:$0xff]  ;;  %v5115_v44 = vld [vmem:[#allocation9 + $0x18] sm:$0xff] }
  0x6a   :  { %507 = vmatpush1.msra.mxu0 %v5011_v10  ;;  %3897 = vmatpush3.msra.mxu1 %v170_v15  ;;  %v5094_v37 = vld [vmem:[#allocation9 + $0x48] sm:$0xff]  ;;  %6876 = vst [vmem:[#allocation17_spill] sm:$0xff] %v5115_v44  ;;  %v5124_v47 = vld [vmem:[#allocation9] sm:$0xff]  ;;  %v5136_v49 = vld [vmem:[#allocation9 + $0xd0] sm:$0xff] }
  0x6b   :  { %359 = vmatmul.mubr.f32.gmra.mxu0 %v5015_v11  ;;  %508 = vmatprep.subr.mxu0 %v5017_v12  ;;  %v5118_v45 = vld [vmem:[#allocation9 + $0x8] sm:$0xff]  ;;  %6878 = vst [vmem:[#allocation19_spill] sm:$0xff] %v5124_v47  ;;  %v5141_v50 = vld [vmem:[#allocation9 + $0xb8] sm:$0xff]  ;;  %v5147_v51 = vld [vmem:[#allocation9 + $0xa0] sm:$0xff] }
  0x6c   :  { %509 = vmatpush1.msra.mxu0 %v5020_v13  ;;  %364 = vmatprep.mubr.f32.mxu0 %v6815_v0  ;;  %6877 = vst [vmem:[#allocation18_spill] sm:$0xff] %v5118_v45  ;;  %v5130_v48 = vld [vmem:[#allocation9 + $0xe8] sm:$0xff]  ;;  %v5158_v53 = vld [vmem:[#allocation9 + $0x70] sm:$0xff]  ;;  %v5164_v54 = vld [vmem:[#allocation9 + $0x58] sm:$0xff] }
  0x6d   :  { %510 = vmatprep.subr.mxu0 %v5023_v14  ;;  %3898 = vmatprep.mubr.f32.mxu1 %v4986_v59  ;;  %v5153_v52 = vld [vmem:[#allocation9 + $0x88] sm:$0xff]  ;;  %v5170_v55 = vld [vmem:[#allocation9 + $0x40] sm:$0xff]  ;;  %v5182_v57 = vld [vmem:[#allocation9 + $0x10] sm:$0xff]  ;;  %v267_v59 = vlaneseq }
  0x6e   :  { %511 = vmatpush1.msra.mxu0 %v5027_v16  ;;  %3910 = vmatprep.subr.mxu1 %v6815_v0  ;;  %v5176_v56 = vld [vmem:[#allocation9 + $0x28] sm:$0xff]  ;;  %6880 = vst [vmem:[#allocation21_spill] sm:$0xff] %v5182_v57 }
  0x6f   :  { %365 = vmatmul.mubr.f32.gmra.mxu0 %v5031_v17  ;;  %512 = vmatprep.subr.mxu0 %v5033_v18  ;;  %6879 = vst [vmem:[#allocation20_spill] sm:$0xff] %v5176_v56  ;;  %v5249_v60 = vshrl.u32 %v267_v59, 7  ;;  %v264_v1 = vld [vmem:[%s6810_s4] sm:$0x7] }
  0x70   :  { %513 = vmatpush1.msra.mxu0 %v5036_v19  ;;  %370 = vmatprep.mubr.f32.mxu0 %v6815_v0 }
  0x71   :  { %514 = vmatprep.subr.mxu0 %v5039_v20  ;;  %3899 = vmatmul.mubr.f32.vlgmr.msra.gmra.mxu1 %v161_v5  ;;  %6881 = vst [vmem:[#allocation22_spill] sm:$0xff] %v5249_v60  ;;  %v6823_v61 = vsub.s32 0, %v5249_v60  ;;  %v6826_v4 = vsub.s32 1, %v5249_v60 }
  0x72   :  { %515 = vmatpush1.msra.mxu0 %v5043_v21  ;;  %3911 = vmatpush3.msra.mxu1 %v5063_v27 }
  0x73   :  { %371 = vmatmul.mubr.f32.gmra.mxu0 %v5047_v22  ;;  %516 = vmatprep.subr.mxu0 %v5049_v23  ;;  %v270_v9 = vrot.slane %v264_v1, %v6823_v61  ;;  %v274_v15 = vrot.slane %v264_v1, %v6826_v4 }
  0x74   :  { %517 = vmatpush1.msra.mxu0 %v5052_v24  ;;  %376 = vmatprep.mubr.f32.mxu0 %v6815_v0 }
  0x75   :  { %518 = vmatprep.subr.mxu0 %v5056_v25  ;;  %3912 = vmatprep.subr.mxu1 %v6815_v0 }
  0x76   :  { %519 = vmatpush1.msra.mxu0 %v5061_v26  ;;  %3913 = vmatpush3.msra.mxu1 %v5078_v32 }
  0x77   :  { %377 = vmatmul.mubr.f32.gmra.mxu0 %v5067_v28  ;;  %520 = vmatprep.subr.mxu0 %v5069_v29 }
  0x78   :  { %521 = vmatpush1.msra.mxu0 %v5072_v30  ;;  %382 = vmatprep.mubr.f32.mxu0 %v6815_v0 }
  0x79   :  { %522 = vmatprep.subr.mxu0 %v5076_v31  ;;  %3914 = vmatprep.subr.mxu1 %v6815_v0 }
  0x7a   :  { %523 = vmatpush1.msra.mxu0 %v5082_v33  ;;  %3915 = vmatpush3.msra.mxu1 %v5090_v36 }
  0x7b   :  { %383 = vmatmul.mubr.f32.gmra.mxu0 %v166_v34  ;;  %524 = vmatprep.subr.mxu0 %v5088_v35 }
  0x7c   :  { %525 = vmatpush1.msra.mxu0 %v5094_v37  ;;  %3916 = vmatprep.subr.mxu1 %v6815_v0 }
  0x7d   :  { %526 = vmatprep.subr.mxu0 %v5097_v38  ;;  %3917 = vmatpush3.msra.mxu1 %v5099_v39 }
  0x7e   :  { %388 = vmatprep.mubr.f32.mxu0 %v6815_v0  ;;  %527 = vmatpush1.msra.mxu0 %v5103_v40 }
  0x7f   :  { %3918 = vmatprep.subr.mxu1 %v6815_v0  ;;  %389 = vmatmul.mubr.f32.gmra.mxu0 %v167_v41 }
  0x80   :  { %528 = vmatprep.subr.mxu0 %v5109_v42  ;;  %3919 = vmatpush3.msra.mxu1 %v5111_v43 }
  0x81   :  { %529 = vmatpush1.msra.mxu0 %v5115_v44  ;;  %3920 = vmatprep.subr.mxu1 %v6815_v0 }
  0x82   :  { %530 = vmatprep.subr.mxu0 %v5118_v45  ;;  %3921 = vmatpush3.msra.mxu1 %v5120_v46 }
  0x83   :  { %531 = vmatpush1.msra.mxu0 %v5124_v47  ;;  %564 = vmatprep.mubr.f32.mxu0 %v6815_v0 }
  0x84   :  { %3922 = vmatprep.subr.mxu1 %v6815_v0  ;;  %565 = vmatmul.mubr.f32.vlgmr.msra.gmra.mxu0 %v6815_v0 }
  0x85   :  { %3923 = vmatpush3.msra.mxu1 %v5130_v48  ;;  %3901 = vmatprep.mubr.f32.mxu1 %v5015_v11 }
  0x86   :  { %3924 = vmatprep.subr.mxu1 %v6815_v0  ;;  %3902 = vmatmul.mubr.f32.gmra.mxu1 %v5031_v17 }
  0x87   :  { %3925 = vmatpush3.msra.mxu1 %v5136_v49  ;;  %3904 = vmatprep.mubr.f32.mxu1 %v5047_v22 }
  0x88   :  { %3926 = vmatprep.subr.mxu1 %v6815_v0  ;;  %665 = vmatprep.subr.mxu0 %v4984_v58 }
  0x89   :  { %3927 = vmatpush3.msra.mxu1 %v5141_v50  ;;  %666 = vmatpush1.msra.mxu0 %v4990_v62 }
  0x8a   :  { %3928 = vmatprep.subr.mxu1 %v6815_v0  ;;  %3905 = vmatmul.mubr.f32.gmra.mxu1 %v5067_v28 }
  0x8b   :  { %3929 = vmatpush3.msra.mxu1 %v5147_v51  ;;  %3907 = vmatprep.mubr.f32.mxu1 %v166_v34 }
  0x8c   :  { %3930 = vmatprep.subr.mxu1 %v6815_v0  ;;  %667 = vmatprep.subr.mxu0 %v4992_v63 }
  0x8d   :  { %3931 = vmatpush3.msra.mxu1 %v5153_v52  ;;  %668 = vmatpush1.msra.mxu0 %v4996_v2 }
  0x8e   :  { %3932 = vmatprep.subr.mxu1 %v6815_v0  ;;  %3908 = vmatmul.mubr.f32.gmra.mxu1 %v167_v41 }
  0x8f   :  { %3933 = vmatpush3.msra.mxu1 %v5158_v53  ;;  %3942 = vmatprep.mubr.msk.f32.mxu1 %vm4864_vm0, %v6815_v0 }
  0x90   :  { %3934 = vmatprep.subr.mxu1 %v6815_v0  ;;  %669 = vmatprep.subr.mxu0 %v5002_v6 }
  0x91   :  { %3935 = vmatpush3.msra.mxu1 %v5164_v54  ;;  %670 = vmatpush1.msra.mxu0 %v5005_v7 }
  0x92   :  { %3936 = vmatprep.subr.mxu1 %v6815_v0  ;;  %671 = vmatprep.subr.mxu0 %v5008_v8 }
  0x93   :  { %3937 = vmatpush3.msra.mxu1 %v5170_v55  ;;  %672 = vmatpush1.msra.mxu0 %v5011_v10 }
  0x94   :  { %3938 = vmatprep.subr.mxu1 %v6815_v0  ;;  %673 = vmatprep.subr.mxu0 %v5017_v12 }
  0x95   :  { %3939 = vmatpush3.msra.mxu1 %v5176_v56  ;;  %674 = vmatpush1.msra.mxu0 %v5020_v13 }
  0x96   :  { %3940 = vmatprep.subr.mxu1 %v6815_v0  ;;  %675 = vmatprep.subr.mxu0 %v5023_v14 }
  0x97   :  { %3941 = vmatpush3.msra.mxu1 %v5182_v57  ;;  %676 = vmatpush1.msra.mxu0 %v5027_v16 }
  0x98   :  { %3943 = vmatmul.mubr.f32.vlgmr.msra.gmra.mxu1 %v6815_v0  ;;  %3945 = vmatprep.subr.mxu1 %v6815_v0 }
  0x99   :  { %3946 = vmatpush3.msra.mxu1 %v5063_v27  ;;  %677 = vmatprep.subr.mxu0 %v5033_v18 }
  0x9a   :  { %3947 = vmatprep.subr.mxu1 %v6815_v0  ;;  %678 = vmatpush1.msra.mxu0 %v5036_v19 }
  0x9b   :  { %3948 = vmatpush3.msra.mxu1 %v5078_v32  ;;  %679 = vmatprep.subr.mxu0 %v5039_v20 }
  0x9c   :  { %3949 = vmatprep.subr.mxu1 %v6815_v0  ;;  %680 = vmatpush1.msra.mxu0 %v5043_v21 }
  0x9d   :  { %3950 = vmatpush3.msra.mxu1 %v5090_v36  ;;  %681 = vmatprep.subr.mxu0 %v5049_v23 }
  0x9e   :  { %3951 = vmatprep.subr.mxu1 %v6815_v0  ;;  %682 = vmatpush1.msra.mxu0 %v5052_v24 }
  0x9f   :  { %3952 = vmatpush3.msra.mxu1 %v5099_v39  ;;  %683 = vmatprep.subr.mxu0 %v5056_v25 }
  0xa0   :  { %3953 = vmatprep.subr.mxu1 %v6815_v0  ;;  %684 = vmatpush1.msra.mxu0 %v5061_v26 }
  0xa1   :  { %3954 = vmatpush3.msra.mxu1 %v5111_v43  ;;  %685 = vmatprep.subr.mxu0 %v5069_v29 }
  0xa2   :  { %3955 = vmatprep.subr.mxu1 %v6815_v0  ;;  %686 = vmatpush1.msra.mxu0 %v5072_v30 }
  0xa3   :  { %3956 = vmatpush3.msra.mxu1 %v5120_v46  ;;  %687 = vmatprep.subr.mxu0 %v5076_v31 }
  0xa4   :  { %3957 = vmatprep.subr.mxu1 %v6815_v0  ;;  %688 = vmatpush1.msra.mxu0 %v5082_v33 }
  0xa5   :  { %3958 = vmatpush3.msra.mxu1 %v5130_v48  ;;  %689 = vmatprep.subr.mxu0 %v5088_v35 }
  0xa6   :  { %3959 = vmatprep.subr.mxu1 %v6815_v0  ;;  %690 = vmatpush1.msra.mxu0 %v5094_v37 }
  0xa7   :  { %3960 = vmatpush3.msra.mxu1 %v5136_v49  ;;  %691 = vmatprep.subr.mxu0 %v5097_v38 }
  0xa8   :  { %3961 = vmatprep.subr.mxu1 %v6815_v0  ;;  %692 = vmatpush1.msra.mxu0 %v5103_v40 }
  0xa9   :  { %3962 = vmatpush3.msra.mxu1 %v5141_v50  ;;  %693 = vmatprep.subr.mxu0 %v5109_v42 }
  0xaa   :  { %3963 = vmatprep.subr.mxu1 %v6815_v0  ;;  %694 = vmatpush1.msra.mxu0 %v5115_v44 }
  0xab   :  { %3964 = vmatpush3.msra.mxu1 %v5147_v51  ;;  %695 = vmatprep.subr.mxu0 %v5118_v45 }
  0xac   :  { %3965 = vmatprep.subr.mxu1 %v6815_v0  ;;  %696 = vmatpush1.msra.mxu0 %v5124_v47 }
  0xad   :  { %3966 = vmatpush3.msra.mxu1 %v5153_v52  ;;  %729 = vmatprep.mubr.f32.mxu0 %v6815_v0 }
  0xae   :  { %3967 = vmatprep.subr.mxu1 %v6815_v0  ;;  %3977 = vmatprep.mubr.msk.f32.mxu1 %vm4864_vm0, %v6815_v0 }
  0xaf   :  { %3968 = vmatpush3.msra.mxu1 %v5158_v53  ;;  %824 = vmatprep.subr.mxu0 %v4984_v58  ;;  %v6829_v58 = vsub.s32 2, %v5249_v60 }
  0xb0   :  { %3969 = vmatprep.subr.mxu1 %v6815_v0 }
  0xb1   :  { %3970 = vmatpush3.msra.mxu1 %v5164_v54 }
  0xb2   :  { %3971 = vmatprep.subr.mxu1 %v6815_v0 }
  0xb3   :  { %3972 = vmatpush3.msra.mxu1 %v5170_v55 }
  0xb4   :  { %3973 = vmatprep.subr.mxu1 %v6815_v0 }
  0xb5   :  { %3974 = vmatpush3.msra.mxu1 %v5176_v56 }
  0xb6   :  { %3975 = vmatprep.subr.mxu1 %v6815_v0 }
  0xb7   :  { %3976 = vmatpush3.msra.mxu1 %v5182_v57 }
  0xb8   :  { %3980 = vmatprep.subr.mxu1 %v6815_v0 }
 0x123   :  { %v348_v3 = vpop.f32.mrf.mxu0 }
 0x125   :  { %v350_v5 = vpop.f32.mrf.mxu0 }
 0x127   :  { %v354_v11 = vpop.f32.mrf.mxu0 }
 0x128   :  { %v5260_v17 = vadd.f32 %v354_v11, %v270_v9  ;;  %v278_v11 = vrot.slane %v264_v1, %v6829_v58 }
 0x129   :  { %v356_v22 = vpop.f32.mrf.mxu0 }
 0x12a   :  { %6882 = vst [vmem:[#allocation23_spill] sm:$0xff] %v5260_v17  ;;  %v5262_v28 = vadd.f32 %v356_v22, %v274_v15 }
 0x12b   :  { %v360_v34 = vpop.f32.mrf.mxu0 }
 0x12c   :  { %6883 = vst [vmem:[#allocation24_spill] sm:$0xff] %v5262_v28  ;;  %v5264_v41 = vadd.f32 %v360_v34, %v270_v9 }
 0x12d   :  { %v362_v59 = vpop.f32.mrf.mxu0 }
 0x12e   :  { %6884 = vst [vmem:[#allocation25_spill] sm:$0xff] %v5264_v41  ;;  %v5266_v0 = vadd.f32 %v362_v59, %v274_v15 }
 0x12f   :  { %v366_v57 = vpop.f32.mrf.mxu0 }
 0x130   :  { %6885 = vst [vmem:[#allocation26_spill] sm:$0xff] %v5266_v0  ;;  %v5269_v47 = vadd.f32 %v366_v57, %v270_v9 }
 0x131   :  { %v368_v61 = vpop.f32.mrf.mxu0  ;;  %v3900_v34 = vpop.f32.mrf.mxu1 }
 0x132   :  { %6886 = vst [vmem:[#allocation27_spill] sm:$0xff] %v5269_v47  ;;  %v5271_v45 = vadd.f32 %v368_v61, %v274_v15  ;;  %v5279_v59 = vadd.f32 %v3900_v34, %v278_v11  ;;  %v349_v34 = vadd.f32 %v348_v3, %v270_v9 }
 0x133   :  { %v372_v4 = vpop.f32.mrf.mxu0 }
 0x134   :  { %6887 = vst [vmem:[#allocation28_spill] sm:$0xff] %v5271_v45  ;;  %v5275_v22 = vadd.f32 %v372_v4, %v270_v9  ;;  %6890 = vst [vmem:[#allocation31_spill] sm:$0xff] %v5279_v59 }
 0x135   :  { %v374_v28 = vpop.f32.mrf.mxu0 }
 0x136   :  { %6888 = vst [vmem:[#allocation29_spill] sm:$0xff] %v5275_v22  ;;  %v5277_v41 = vadd.f32 %v374_v28, %v274_v15 }
 0x137   :  { %v378_v0 = vpop.f32.mrf.mxu0 }
 0x138   :  { %6889 = vst [vmem:[#allocation30_spill] sm:$0xff] %v5277_v41  ;;  %v5281_v17 = vadd.f32 %v378_v0, %v270_v9  ;;  %v461_v41 = vpop.f32.mrf.mxu1 }
 0x139   :  { %v380_v57 = vpop.f32.mrf.mxu0 }
 0x13a   :  { %6891 = vst [vmem:[#allocation32_spill] sm:$0xff] %v5281_v17  ;;  %v5283_v47 = vadd.f32 %v380_v57, %v274_v15 }
 0x13b   :  { %v384_v61 = vpop.f32.mrf.mxu0 }
 0x13c   :  { %6892 = vst [vmem:[#allocation33_spill] sm:$0xff] %v5283_v47  ;;  %v5285_v45 = vadd.f32 %v384_v61, %v270_v9 }
 0x13d   :  { %v386_v60 = vpop.f32.mrf.mxu0 }
 0x13e   :  { %6893 = vst [vmem:[#allocation34_spill] sm:$0xff] %v5285_v45  ;;  %v5287_v1 = vadd.f32 %v386_v60, %v274_v15  ;;  %v351_v45 = vadd.f32 %v350_v5, %v274_v15 }
 0x13f   :  { %v390_v4 = vpop.f32.mrf.mxu0 }
 0x140   :  { %6894 = vst [vmem:[#allocation35_spill] sm:$0xff] %v5287_v1  ;;  %v5289_v58 = vadd.f32 %v390_v4, %v270_v9 }
 0x141   :  { %v392_v22 = vpop.f32.mrf.mxu0 }
 0x142   :  { %6895 = vst [vmem:[#allocation36_spill] sm:$0xff] %v5289_v58  ;;  %v5291_v28 = vadd.f32 %v392_v22, %v274_v15 }
 0x144   :  { %6896 = vst [vmem:[#allocation37_spill] sm:$0xff] %v5291_v28  ;;  %v566_v59 = vpop.f32.mrf.mxu0 }
 0x145   :  { %v641_v0 = vadd.f32 %v566_v59, %v349_v34 }
 0x146   :  { %v3903_v17 = vpop.f32.mrf.mxu1  ;;  %v568_v47 = vpop.f32.mrf.mxu0 }
 0x147   :  { %v643_v56 = vmul.f32 0.5, %v641_v0  ;;  %v5293_v57 = vadd.f32 %v3903_v17, %v278_v11  ;;  %v642_v4 = vadd.f32 %v568_v47, %v351_v45 }
 0x148   :  { %v471_v61 = vpop.f32.mrf.mxu1 }
 0x149   :  { %6897 = vst [vmem:[#allocation38_spill] sm:$0xff] %v5293_v57  ;;  %4560 = vtanh.f32 %v643_v56  ;;  %v5295_v60 = vadd.f32 %v471_v61, %v278_v11  ;;  %v644_v9 = vmul.f32 0.5, %v642_v4  ;;  %v5308_v56 = vld [vmem:[%s6811_s5] ss:$0 sm:$0xff]  ;;  %v462_v61 = vadd.f32 %v461_v41, %v278_v11 }
 0x14a   :  { %v3906_v1 = vpop.f32.mrf.mxu1  ;;  %v6904_v41 = vmov 0.0  }
 0x14b   :  { %6898 = vst [vmem:[#allocation39_spill] sm:$0xff] %v5295_v60  ;;  %v5297_v58 = vadd.f32 %v3906_v1, %v278_v11  ;;  %4562 = vtanh.f32 %v644_v9 }
 0x14c   :  { %v481_v22 = vpop.f32.mrf.mxu1 }
 0x14d   :  { %6899 = vst [vmem:[#allocation40_spill] sm:$0xff] %v5297_v58  ;;  %v5299_v28 = vadd.f32 %v481_v22, %v278_v11 }
 0x14e   :  { %v3909_v3 = vpop.f32.mrf.mxu1 }
 0x14f   :  { %6900 = vst [vmem:[#allocation41_spill] sm:$0xff] %v5299_v28  ;;  %v5301_v59 = vadd.f32 %v3909_v3, %v278_v11 }
 0x150   :  { %v491_v34 = vpop.f32.mrf.mxu1 }
 0x151   :  { %6901 = vst [vmem:[#allocation42_spill] sm:$0xff] %v5301_v59  ;;  %v5303_v17 = vadd.f32 %v491_v34, %v278_v11  ;;  %v6906_v11 = vld [vmem:[#allocation18_spill] sm:$0xff] }
 0x153   :  { %6902 = vst [vmem:[#allocation43_spill] sm:$0xff] %v5303_v17 }
 0x156   :  { %v4561_v0 = vpop.eup %4560 }
 0x157   :  { %v647_v45 = vmul.f32 0.5, %v4561_v0 }
 0x158   :  { %v637_v47 = vpop.f32.mrf.mxu1  ;;  %v4563_v3 = vpop.eup %4562 }
 0x159   :  { %v649_v5 = vadd.f32 0.5, %v647_v45  ;;  %v657_v15 = vadd.f32 %v5308_v56, %v637_v47  ;;  %v648_v34 = vmul.f32 0.5, %v4563_v3  ;;  %v6910_v47 = vld [vmem:[#allocation23_spill] sm:$0xff] }
 0x15a   :  { %v3944_v1 = vpop.f32.mrf.mxu1 }
 0x15b   :  { %v658_v4 = vmul.f32 %v657_v15, %v649_v5  ;;  %v650_v59 = vadd.f32 0.5, %v648_v34 }
 0x15d   :  { %v659_v22 = vadd.f32 %v658_v4, %v462_v61  ;;  %v661_v9 = vsub.f32 1.0, %v650_v59  ;;  %v663_v58 = vmul.f32 0.0, %v650_v59  ;;  %v6908_v59 = vld [vmem:[#allocation21_spill] sm:$0xff]  ;;  %v6911_v4 = vld [vmem:[#allocation24_spill] sm:$0xff] }
 0x15f   :  { %4564 = vtanh.f32 %v659_v22 }
 0x16c   :  { %v4565_v17 = vpop.eup %4564 }
 0x16d   :  { %v662_v28 = vmul.f32 %v4565_v17, %v661_v9  ;;  %v6909_v17 = vld [vmem:[#allocation16_spill] sm:$0xff] }
 0x16f   :  { %v5311_v57 = vadd.f32 %v663_v58, %v662_v28  ;;  %v6905_v58 = vld [vmem:[#allocation20_spill] sm:$0xff]  ;;  %v6907_v28 = vld [vmem:[#allocation19_spill] sm:$0xff] }
 0x171   :  { %6903 = vst [vmem:[#allocation44_spill] sm:$0xff] %v5311_v57  ;;  %730 = vmatmul.mubr.f32.vlgmr.msra.gmra.mxu0 %v5311_v57  ;;  %3978 = vmatmul.mubr.f32.vlgmr.msra.gmra.mxu1 %v5311_v57 }
 0x172   :  { %825 = vmatpush1.msra.mxu0 %v4990_v62  ;;  %3981 = vmatpush3.msra.mxu1 %v5063_v27 }
 0x173   :  { %826 = vmatprep.subr.mxu0 %v4992_v63  ;;  %3982 = vmatprep.subr.mxu1 %v6904_v41 }
 0x174   :  { %827 = vmatpush1.msra.mxu0 %v4996_v2  ;;  %3983 = vmatpush3.msra.mxu1 %v5078_v32 }
 0x175   :  { %828 = vmatprep.subr.mxu0 %v5002_v6  ;;  %3984 = vmatprep.subr.mxu1 %v6904_v41 }
 0x176   :  { %829 = vmatpush1.msra.mxu0 %v5005_v7  ;;  %3985 = vmatpush3.msra.mxu1 %v5090_v36 }
 0x177   :  { %830 = vmatprep.subr.mxu0 %v5008_v8  ;;  %3986 = vmatprep.subr.mxu1 %v6904_v41 }
 0x178   :  { %831 = vmatpush1.msra.mxu0 %v5011_v10  ;;  %3987 = vmatpush3.msra.mxu1 %v5099_v39 }
 0x179   :  { %832 = vmatprep.subr.mxu0 %v5017_v12  ;;  %3988 = vmatprep.subr.mxu1 %v6904_v41 }
 0x17a   :  { %833 = vmatpush1.msra.mxu0 %v5020_v13  ;;  %3989 = vmatpush3.msra.mxu1 %v5111_v43 }
 0x17b   :  { %834 = vmatprep.subr.mxu0 %v5023_v14  ;;  %3990 = vmatprep.subr.mxu1 %v6904_v41 }
 0x17c   :  { %835 = vmatpush1.msra.mxu0 %v5027_v16  ;;  %3991 = vmatpush3.msra.mxu1 %v5120_v46 }
 0x17d   :  { %836 = vmatprep.subr.mxu0 %v5033_v18  ;;  %3992 = vmatprep.subr.mxu1 %v6904_v41 }
 0x17e   :  { %837 = vmatpush1.msra.mxu0 %v5036_v19  ;;  %3993 = vmatpush3.msra.mxu1 %v5130_v48 }
 0x17f   :  { %838 = vmatprep.subr.mxu0 %v5039_v20  ;;  %3994 = vmatprep.subr.mxu1 %v6904_v41 }
 0x180   :  { %839 = vmatpush1.msra.mxu0 %v5043_v21  ;;  %3995 = vmatpush3.msra.mxu1 %v5136_v49 }
 0x181   :  { %840 = vmatprep.subr.mxu0 %v5049_v23  ;;  %3996 = vmatprep.subr.mxu1 %v6904_v41 }
 0x182   :  { %841 = vmatpush1.msra.mxu0 %v5052_v24  ;;  %3997 = vmatpush3.msra.mxu1 %v5141_v50 }
 0x183   :  { %842 = vmatprep.subr.mxu0 %v5056_v25  ;;  %3998 = vmatprep.subr.mxu1 %v6904_v41 }
 0x184   :  { %843 = vmatpush1.msra.mxu0 %v5061_v26  ;;  %3999 = vmatpush3.msra.mxu1 %v5147_v51 }
 0x185   :  { %844 = vmatprep.subr.mxu0 %v5069_v29  ;;  %4000 = vmatprep.subr.mxu1 %v6904_v41 }
 0x186   :  { %845 = vmatpush1.msra.mxu0 %v5072_v30  ;;  %4001 = vmatpush3.msra.mxu1 %v5153_v52 }
 0x187   :  { %846 = vmatprep.subr.mxu0 %v5076_v31  ;;  %4002 = vmatprep.subr.mxu1 %v6904_v41 }
 0x188   :  { %847 = vmatpush1.msra.mxu0 %v5082_v33  ;;  %4003 = vmatpush3.msra.mxu1 %v5158_v53 }
 0x189   :  { %848 = vmatprep.subr.mxu0 %v5088_v35  ;;  %4004 = vmatprep.subr.mxu1 %v6904_v41 }
 0x18a   :  { %849 = vmatpush1.msra.mxu0 %v5094_v37  ;;  %4005 = vmatpush3.msra.mxu1 %v5164_v54 }
 0x18b   :  { %850 = vmatprep.subr.mxu0 %v5097_v38  ;;  %4006 = vmatprep.subr.mxu1 %v6904_v41 }
 0x18c   :  { %851 = vmatpush1.msra.mxu0 %v5103_v40  ;;  %4007 = vmatpush3.msra.mxu1 %v5170_v55 }
 0x18d   :  { %852 = vmatprep.subr.mxu0 %v5109_v42  ;;  %4008 = vmatprep.subr.mxu1 %v6904_v41 }
 0x18e   :  { %853 = vmatpush1.msra.mxu0 %v5115_v44  ;;  %4009 = vmatpush3.msra.mxu1 %v6905_v58 }
 0x18f   :  { %854 = vmatprep.subr.mxu0 %v6906_v11  ;;  %4010 = vmatprep.subr.mxu1 %v6904_v41 }
 0x190   :  { %855 = vmatpush1.msra.mxu0 %v6907_v28  ;;  %888 = vmatprep.mubr.f32.mxu0 %v6904_v41  ;;  %v6912_v28 = vld [vmem:[#allocation31_spill] sm:$0xff] }
 0x191   :  { %4011 = vmatpush3.msra.mxu1 %v6908_v59  ;;  %4012 = vmatprep.mubr.msk.f32.mxu1 %vm4864_vm0, %v6904_v41 }
 0x192   :  { %983 = vmatprep.subr.mxu0 %v6909_v17  ;;  %4015 = vmatprep.subr.mxu1 %v6904_v41 }
 0x231   :  { %v731_v0 = vpop.f32.mrf.mxu0  ;;  %v802_v45 = vpop.f32.mrf.mxu1 }
 0x232   :  { %v806_v5 = vadd.f32 %v731_v0, %v6910_v47  ;;  %v816_v59 = vadd.f32 %v5308_v56, %v802_v45 }
 0x233   :  { %v3979_v15 = vpop.f32.mrf.mxu1  ;;  %v733_v61 = vpop.f32.mrf.mxu0 }
 0x234   :  { %v808_v1 = vmul.f32 0.5, %v806_v5  ;;  %v807_v22 = vadd.f32 %v733_v61, %v6911_v4  ;;  %v6920_v4 = vld [vmem:[#allocation25_spill] sm:$0xff] }
 0x236   :  { %4566 = vtanh.f32 %v808_v1  ;;  %v809_v3 = vmul.f32 0.5, %v807_v22 }
 0x238   :  { %4568 = vtanh.f32 %v809_v3 }
 0x243   :  { %v4567_v34 = vpop.eup %4566 }
 0x244   :  { %v812_v9 = vmul.f32 0.5, %v4567_v34 }
 0x245   :  { %v4569_v58 = vpop.eup %4568 }
 0x246   :  { %v814_v60 = vadd.f32 0.5, %v812_v9  ;;  %v813_v44 = vmul.f32 0.5, %v4569_v58  ;;  %v6916_v58 = vld [vmem:[#allocation18_spill] sm:$0xff] }
 0x248   :  { %v817_v17 = vmul.f32 %v816_v59, %v814_v60  ;;  %v815_v0 = vadd.f32 0.5, %v813_v44  ;;  %v6914_v44 = vld [vmem:[#allocation17_spill] sm:$0xff]  ;;  %v6915_v60 = vld [vmem:[#allocation20_spill] sm:$0xff] }
 0x249   :  { %v6919_v59 = vld [vmem:[#allocation16_spill] sm:$0xff] }
 0x24a   :  { %v818_v11 = vadd.f32 %v817_v17, %v6912_v28  ;;  %v820_v47 = vsub.f32 1.0, %v815_v0  ;;  %v822_v1 = vmul.f32 %v815_v0, %v5311_v57  ;;  %v6918_v28 = vld [vmem:[#allocation21_spill] sm:$0xff]  ;;  %v6921_v0 = vld [vmem:[#allocation26_spill] sm:$0xff] }
 0x24c   :  { %4570 = vtanh.f32 %v818_v11  ;;  %v6917_v11 = vld [vmem:[#allocation19_spill] sm:$0xff] }
 0x259   :  { %v4571_v5 = vpop.eup %4570 }
 0x25a   :  { %v821_v15 = vmul.f32 %v4571_v5, %v820_v47 }
 0x25c   :  { %v5387_v61 = vadd.f32 %v822_v1, %v821_v15 }
 0x25e   :  { %6913 = vst [vmem:[#allocation23_spill] sm:$0xff] %v5387_v61  ;;  %889 = vmatmul.mubr.f32.vlgmr.msra.gmra.mxu0 %v5387_v61  ;;  %4013 = vmatmul.mubr.f32.vlgmr.msra.gmra.mxu1 %v5387_v61 }
 0x25f   :  { %984 = vmatpush1.msra.mxu0 %v4990_v62  ;;  %4016 = vmatpush3.msra.mxu1 %v5063_v27 }
 0x260   :  { %985 = vmatprep.subr.mxu0 %v4992_v63  ;;  %4017 = vmatprep.subr.mxu1 %v6904_v41 }
 0x261   :  { %986 = vmatpush1.msra.mxu0 %v4996_v2  ;;  %4018 = vmatpush3.msra.mxu1 %v5078_v32 }
 0x262   :  { %987 = vmatprep.subr.mxu0 %v5002_v6  ;;  %4019 = vmatprep.subr.mxu1 %v6904_v41 }
 0x263   :  { %988 = vmatpush1.msra.mxu0 %v5005_v7  ;;  %4020 = vmatpush3.msra.mxu1 %v5090_v36 }
 0x264   :  { %989 = vmatprep.subr.mxu0 %v5008_v8  ;;  %4021 = vmatprep.subr.mxu1 %v6904_v41 }
 0x265   :  { %990 = vmatpush1.msra.mxu0 %v5011_v10  ;;  %4022 = vmatpush3.msra.mxu1 %v5099_v39 }
 0x266   :  { %991 = vmatprep.subr.mxu0 %v5017_v12  ;;  %4023 = vmatprep.subr.mxu1 %v6904_v41 }
 0x267   :  { %992 = vmatpush1.msra.mxu0 %v5020_v13  ;;  %4024 = vmatpush3.msra.mxu1 %v5111_v43 }
 0x268   :  { %993 = vmatprep.subr.mxu0 %v5023_v14  ;;  %4025 = vmatprep.subr.mxu1 %v6904_v41 }
 0x269   :  { %994 = vmatpush1.msra.mxu0 %v5027_v16  ;;  %4026 = vmatpush3.msra.mxu1 %v5120_v46 }
 0x26a   :  { %995 = vmatprep.subr.mxu0 %v5033_v18  ;;  %4027 = vmatprep.subr.mxu1 %v6904_v41 }
 0x26b   :  { %996 = vmatpush1.msra.mxu0 %v5036_v19  ;;  %4028 = vmatpush3.msra.mxu1 %v5130_v48 }
 0x26c   :  { %997 = vmatprep.subr.mxu0 %v5039_v20  ;;  %4029 = vmatprep.subr.mxu1 %v6904_v41 }
 0x26d   :  { %998 = vmatpush1.msra.mxu0 %v5043_v21  ;;  %4030 = vmatpush3.msra.mxu1 %v5136_v49 }
 0x26e   :  { %999 = vmatprep.subr.mxu0 %v5049_v23  ;;  %4031 = vmatprep.subr.mxu1 %v6904_v41 }
 0x26f   :  { %1000 = vmatpush1.msra.mxu0 %v5052_v24  ;;  %4032 = vmatpush3.msra.mxu1 %v5141_v50 }
 0x270   :  { %1001 = vmatprep.subr.mxu0 %v5056_v25  ;;  %4033 = vmatprep.subr.mxu1 %v6904_v41 }
 0x271   :  { %1002 = vmatpush1.msra.mxu0 %v5061_v26  ;;  %4034 = vmatpush3.msra.mxu1 %v5147_v51 }
 0x272   :  { %1003 = vmatprep.subr.mxu0 %v5069_v29  ;;  %4035 = vmatprep.subr.mxu1 %v6904_v41 }
 0x273   :  { %1004 = vmatpush1.msra.mxu0 %v5072_v30  ;;  %4036 = vmatpush3.msra.mxu1 %v5153_v52 }
 0x274   :  { %1005 = vmatprep.subr.mxu0 %v5076_v31  ;;  %4037 = vmatprep.subr.mxu1 %v6904_v41 }
 0x275   :  { %1006 = vmatpush1.msra.mxu0 %v5082_v33  ;;  %4038 = vmatpush3.msra.mxu1 %v5158_v53 }
 0x276   :  { %1007 = vmatprep.subr.mxu0 %v5088_v35  ;;  %4039 = vmatprep.subr.mxu1 %v6904_v41 }
 0x277   :  { %1008 = vmatpush1.msra.mxu0 %v5094_v37  ;;  %4040 = vmatpush3.msra.mxu1 %v5164_v54 }
 0x278   :  { %1009 = vmatprep.subr.mxu0 %v5097_v38  ;;  %4041 = vmatprep.subr.mxu1 %v6904_v41 }
 0x279   :  { %1010 = vmatpush1.msra.mxu0 %v5103_v40  ;;  %4042 = vmatpush3.msra.mxu1 %v5170_v55 }
 0x27a   :  { %1011 = vmatprep.subr.mxu0 %v5109_v42  ;;  %4043 = vmatprep.subr.mxu1 %v6904_v41 }
 0x27b   :  { %1012 = vmatpush1.msra.mxu0 %v6914_v44  ;;  %4044 = vmatpush3.msra.mxu1 %v6915_v60 }
 0x27c   :  { %1013 = vmatprep.subr.mxu0 %v6916_v58  ;;  %4045 = vmatprep.subr.mxu1 %v6904_v41 }
 0x27d   :  { %1014 = vmatpush1.msra.mxu0 %v6917_v11  ;;  %1047 = vmatprep.mubr.f32.mxu0 %v6904_v41  ;;  %v6922_v11 = vld [vmem:[#allocation39_spill] sm:$0xff] }
 0x27e   :  { %4046 = vmatpush3.msra.mxu1 %v6918_v28  ;;  %4047 = vmatprep.mubr.msk.f32.mxu1 %vm4864_vm0, %v6904_v41 }
 0x27f   :  { %1142 = vmatprep.subr.mxu0 %v6919_v59  ;;  %4050 = vmatprep.subr.mxu1 %v6904_v41 }
 0x31e   :  { %v890_v17 = vpop.f32.mrf.mxu0  ;;  %v961_v45 = vpop.f32.mrf.mxu1 }
 0x31f   :  { %v965_v22 = vadd.f32 %v890_v17, %v6920_v4  ;;  %v975_v28 = vadd.f32 %v5308_v56, %v961_v45  ;;  %v5568_v45 = vld [vmem:[#allocation9 + $0x148] sm:$0xff] }
 0x320   :  { %v4014_v3 = vpop.f32.mrf.mxu1  ;;  %v892_v9 = vpop.f32.mrf.mxu0 }
 0x321   :  { %v967_v34 = vmul.f32 0.5, %v965_v22  ;;  %v966_v47 = vadd.f32 %v892_v9, %v6921_v0  ;;  %v5571_v0 = vld [vmem:[#allocation9 + $0x128] sm:$0xff] }
 0x323   :  { %4572 = vtanh.f32 %v967_v34  ;;  %v968_v5 = vmul.f32 0.5, %v966_v47  ;;  %v5575_v47 = vld [vmem:[#allocation9 + $0x120] sm:$0xff] }
 0x325   :  { %4574 = vtanh.f32 %v968_v5  ;;  %v5578_v5 = vld [vmem:[#allocation9 + $0x130] sm:$0xff] }
 0x330   :  { %v4573_v15 = vpop.eup %4572 }
 0x331   :  { %v971_v1 = vmul.f32 0.5, %v4573_v15  ;;  %v5581_v15 = vld [vmem:[#allocation9 + $0x110] sm:$0xff] }
 0x332   :  { %v4575_v60 = vpop.eup %4574 }
 0x333   :  { %v973_v57 = vadd.f32 0.5, %v971_v1  ;;  %v972_v44 = vmul.f32 0.5, %v4575_v60  ;;  %v5555_v60 = vld [vmem:[#allocation9 + $0x150] sm:$0xff]  ;;  %v5585_v1 = vld [vmem:[#allocation9 + $0x108] sm:$0xff] }
 0x335   :  { %v976_v59 = vmul.f32 %v975_v28, %v973_v57  ;;  %v974_v17 = vadd.f32 0.5, %v972_v44  ;;  %v5548_v57 = vld [vmem:[#allocation9 + $0x178] sm:$0xff] }
 0x336   :  { %v5551_v44 = vld [vmem:[#allocation9 + $0x158] sm:$0xff] }
 0x337   :  { %v977_v58 = vadd.f32 %v976_v59, %v6922_v11  ;;  %v979_v4 = vsub.f32 1.0, %v974_v17  ;;  %v981_v34 = vmul.f32 %v974_v17, %v5387_v61  ;;  %v5561_v11 = vld [vmem:[#allocation9 + $0x140] sm:$0xff]  ;;  %v5565_v28 = vld [vmem:[#allocation9 + $0x138] sm:$0xff]  ;;  %v5593_v17 = vld [vmem:[#allocation9 + $0xf0] sm:$0xff] }
 0x338   :  { %v5589_v59 = vld [vmem:[#allocation9 + $0xf8] sm:$0xff] }
 0x339   :  { %4576 = vtanh.f32 %v977_v58  ;;  %v5558_v58 = vld [vmem:[#allocation9 + $0x160] sm:$0xff] }
 0x346   :  { %v4577_v22 = vpop.eup %4576 }
 0x347   :  { %v980_v3 = vmul.f32 %v4577_v22, %v979_v4  ;;  %v5597_v4 = vld [vmem:[#allocation9 + $0xe0] sm:$0xff]  ;;  %v5601_v22 = vld [vmem:[#allocation9 + $0xd8] sm:$0xff] }
 0x349   :  { %v5463_v9 = vadd.f32 %v981_v34, %v980_v3  ;;  %v5609_v3 = vld [vmem:[#allocation9 + $0xc0] sm:$0xff]  ;;  %v5617_v34 = vld [vmem:[#allocation9 + $0xa8] sm:$0xff] }
 0x34b   :  { %6923 = vst [vmem:[#allocation24_spill] sm:$0xff] %v5463_v9  ;;  %1048 = vmatmul.mubr.f32.vlgmr.msra.gmra.mxu0 %v5463_v9  ;;  %4048 = vmatmul.mubr.f32.vlgmr.msra.gmra.mxu1 %v5463_v9 }
 0x34c   :  { %1143 = vmatpush1.msra.mxu0 %v4990_v62  ;;  %4051 = vmatpush3.msra.mxu1 %v5063_v27  ;;  %v6924_v62 = vld [vmem:[#allocation17_spill] sm:$0xff] }
 0x34d   :  { %1144 = vmatprep.subr.mxu0 %v4992_v63  ;;  %4052 = vmatprep.subr.mxu1 %v6904_v41  ;;  %v6925_v63 = vld [vmem:[#allocation20_spill] sm:$0xff] }
 0x34e   :  { %1145 = vmatpush1.msra.mxu0 %v4996_v2  ;;  %4053 = vmatpush3.msra.mxu1 %v5078_v32  ;;  %v6926_v2 = vld [vmem:[#allocation18_spill] sm:$0xff] }
 0x34f   :  { %1146 = vmatprep.subr.mxu0 %v5002_v6  ;;  %4054 = vmatprep.subr.mxu1 %v6904_v41  ;;  %v6927_v6 = vld [vmem:[#allocation19_spill] sm:$0xff] }
 0x350   :  { %1147 = vmatpush1.msra.mxu0 %v5005_v7  ;;  %4055 = vmatpush3.msra.mxu1 %v5090_v36  ;;  %v6928_v7 = vld [vmem:[#allocation21_spill] sm:$0xff] }
 0x351   :  { %1148 = vmatprep.subr.mxu0 %v5008_v8  ;;  %4056 = vmatprep.subr.mxu1 %v6904_v41  ;;  %v5532_v8 = vld [vmem:[#allocation9 + $0x170] sm:$0xff] }
 0x352   :  { %1149 = vmatpush1.msra.mxu0 %v5011_v10  ;;  %4057 = vmatpush3.msra.mxu1 %v5099_v39 }
 0x353   :  { %1150 = vmatprep.subr.mxu0 %v5017_v12  ;;  %4058 = vmatprep.subr.mxu1 %v6904_v41 }
 0x354   :  { %1151 = vmatpush1.msra.mxu0 %v5020_v13  ;;  %4059 = vmatpush3.msra.mxu1 %v5111_v43  ;;  %v6929_v13 = vld [vmem:[#allocation27_spill] sm:$0xff] }
 0x355   :  { %1152 = vmatprep.subr.mxu0 %v5023_v14  ;;  %4060 = vmatprep.subr.mxu1 %v6904_v41 }
 0x356   :  { %1153 = vmatpush1.msra.mxu0 %v5027_v16  ;;  %4061 = vmatpush3.msra.mxu1 %v5120_v46 }
 0x357   :  { %1154 = vmatprep.subr.mxu0 %v5033_v18  ;;  %4062 = vmatprep.subr.mxu1 %v6904_v41 }
 0x358   :  { %1155 = vmatpush1.msra.mxu0 %v5036_v19  ;;  %4063 = vmatpush3.msra.mxu1 %v5130_v48 }
 0x359   :  { %1156 = vmatprep.subr.mxu0 %v5039_v20  ;;  %4064 = vmatprep.subr.mxu1 %v6904_v41  ;;  %v6930_v20 = vld [vmem:[#allocation28_spill] sm:$0xff] }
 0x35a   :  { %1157 = vmatpush1.msra.mxu0 %v5043_v21  ;;  %4065 = vmatpush3.msra.mxu1 %v5136_v49 }
 0x35b   :  { %1158 = vmatprep.subr.mxu0 %v5049_v23  ;;  %4066 = vmatprep.subr.mxu1 %v6904_v41 }
 0x35c   :  { %1159 = vmatpush1.msra.mxu0 %v5052_v24  ;;  %4067 = vmatpush3.msra.mxu1 %v5141_v50 }
 0x35d   :  { %1160 = vmatprep.subr.mxu0 %v5056_v25  ;;  %4068 = vmatprep.subr.mxu1 %v6904_v41 }
 0x35e   :  { %1161 = vmatpush1.msra.mxu0 %v5061_v26  ;;  %4069 = vmatpush3.msra.mxu1 %v5147_v51 }
 0x35f   :  { %1162 = vmatprep.subr.mxu0 %v5069_v29  ;;  %4070 = vmatprep.subr.mxu1 %v6904_v41 }
 0x360   :  { %1163 = vmatpush1.msra.mxu0 %v5072_v30  ;;  %4071 = vmatpush3.msra.mxu1 %v5153_v52  ;;  %v6931_v30 = vld [vmem:[#allocation38_spill] sm:$0xff] }
 0x361   :  { %1164 = vmatprep.subr.mxu0 %v5076_v31  ;;  %4072 = vmatprep.subr.mxu1 %v6904_v41 }
 0x362   :  { %1165 = vmatpush1.msra.mxu0 %v5082_v33  ;;  %4073 = vmatpush3.msra.mxu1 %v5158_v53 }
 0x363   :  { %1166 = vmatprep.subr.mxu0 %v5088_v35  ;;  %4074 = vmatprep.subr.mxu1 %v6904_v41 }
 0x364   :  { %1167 = vmatpush1.msra.mxu0 %v5094_v37  ;;  %4075 = vmatpush3.msra.mxu1 %v5164_v54 }
 0x365   :  { %1168 = vmatprep.subr.mxu0 %v5097_v38  ;;  %4076 = vmatprep.subr.mxu1 %v6904_v41 }
 0x366   :  { %1169 = vmatpush1.msra.mxu0 %v5103_v40  ;;  %4077 = vmatpush3.msra.mxu1 %v5170_v55 }
 0x367   :  { %1170 = vmatprep.subr.mxu0 %v5109_v42  ;;  %4078 = vmatprep.subr.mxu1 %v6904_v41  ;;  %v5545_v42 = vld [vmem:[#allocation9 + $0x168] sm:$0xff] }
 0x368   :  { %1171 = vmatpush1.msra.mxu0 %v6924_v62  ;;  %4079 = vmatpush3.msra.mxu1 %v6925_v63  ;;  %v5625_v62 = vld [vmem:[#allocation9 + $0x90] sm:$0xff] }
 0x369   :  { %1172 = vmatprep.subr.mxu0 %v6926_v2  ;;  %4080 = vmatprep.subr.mxu1 %v6904_v41  ;;  %v5633_v2 = vld [vmem:[#allocation9 + $0x78] sm:$0xff] }
 0x36a   :  { %1173 = vmatpush1.msra.mxu0 %v6927_v6  ;;  %1206 = vmatprep.mubr.f32.mxu0 %v6904_v41  ;;  %v5641_v6 = vld [vmem:[#allocation9 + $0x60] sm:$0xff] }
 0x36b   :  { %4081 = vmatpush3.msra.mxu1 %v6928_v7  ;;  %4082 = vmatprep.mubr.msk.f32.mxu1 %vm4864_vm0, %v6904_v41 }
 0x36c   :  { %1301 = vmatprep.subr.mxu0 %v5532_v8  ;;  %4085 = vmatprep.subr.mxu1 %v6904_v41 }
 0x40b   :  { %v1049_v10 = vpop.f32.mrf.mxu0  ;;  %v1120_v12 = vpop.f32.mrf.mxu1 }
 0x40c   :  { %v1124_v14 = vadd.f32 %v1049_v10, %v6929_v13  ;;  %v1134_v27 = vadd.f32 %v5308_v56, %v1120_v12  ;;  %v5649_v10 = vld [vmem:[#allocation9 + $0x48] sm:$0xff]  ;;  %v5657_v12 = vld [vmem:[#allocation9 + $0x30] sm:$0xff]  ;;  %v5665_v13 = vld [vmem:[#allocation9 + $0x18] sm:$0xff] }
 0x40d   :  { %v4049_v16 = vpop.f32.mrf.mxu1  ;;  %v1051_v19 = vpop.f32.mrf.mxu0  ;;  %6933 = vst [vmem:[#allocation16_spill] sm:$0xff] %v5665_v13 }
 0x40e   :  { %v1126_v18 = vmul.f32 0.5, %v1124_v14  ;;  %v1125_v21 = vadd.f32 %v1051_v19, %v6930_v20  ;;  %v5673_v14 = vld [vmem:[#allocation9] sm:$0xff]  ;;  %v6936_v16 = vld [vmem:[#allocation29_spill] sm:$0xff] }
 0x40f   :  { %6935 = vst [vmem:[#allocation26_spill] sm:$0xff] %v5673_v14 }
 0x410   :  { %4578 = vtanh.f32 %v1126_v18  ;;  %v1127_v23 = vmul.f32 0.5, %v1125_v21 }
 0x412   :  { %4580 = vtanh.f32 %v1127_v23  ;;  %v6937_v23 = vld [vmem:[#allocation30_spill] sm:$0xff] }
 0x41d   :  { %v4579_v24 = vpop.eup %4578 }
 0x41e   :  { %v1130_v25 = vmul.f32 0.5, %v4579_v24 }
 0x41f   :  { %v4581_v32 = vpop.eup %4580 }
 0x420   :  { %v1132_v26 = vadd.f32 0.5, %v1130_v25  ;;  %v1131_v33 = vmul.f32 0.5, %v4581_v32 }
 0x422   :  { %v1135_v29 = vmul.f32 %v1134_v27, %v1132_v26  ;;  %v1133_v35 = vadd.f32 0.5, %v1131_v33 }
 0x424   :  { %v1136_v31 = vadd.f32 %v1135_v29, %v6931_v30  ;;  %v1138_v36 = vsub.f32 1.0, %v1133_v35  ;;  %v1140_v39 = vmul.f32 %v1133_v35, %v5463_v9 }
 0x426   :  { %4582 = vtanh.f32 %v1136_v31  ;;  %v6938_v31 = vld [vmem:[#allocation41_spill] sm:$0xff] }
 0x433   :  { %v4583_v37 = vpop.eup %4582 }
 0x434   :  { %v1139_v38 = vmul.f32 %v4583_v37, %v1138_v36 }
 0x436   :  { %v5541_v40 = vadd.f32 %v1140_v39, %v1139_v38 }
 0x438   :  { %6932 = vst [vmem:[#allocation31_spill] sm:$0xff] %v5541_v40  ;;  %1207 = vmatmul.mubr.f32.vlgmr.msra.gmra.mxu0 %v5541_v40  ;;  %4083 = vmatmul.mubr.f32.vlgmr.msra.gmra.mxu1 %v5541_v40 }
 0x439   :  { %1302 = vmatpush1.msra.mxu0 %v5545_v42  ;;  %4086 = vmatpush3.msra.mxu1 %v5548_v57 }
 0x43a   :  { %1303 = vmatprep.subr.mxu0 %v5551_v44  ;;  %4087 = vmatprep.subr.mxu1 %v6904_v41 }
 0x43b   :  { %1304 = vmatpush1.msra.mxu0 %v5555_v60  ;;  %4088 = vmatpush3.msra.mxu1 %v5558_v58 }
 0x43c   :  { %1305 = vmatprep.subr.mxu0 %v5561_v11  ;;  %4089 = vmatprep.subr.mxu1 %v6904_v41 }
 0x43d   :  { %1306 = vmatpush1.msra.mxu0 %v5565_v28  ;;  %4090 = vmatpush3.msra.mxu1 %v5568_v45 }
 0x43e   :  { %1307 = vmatprep.subr.mxu0 %v5571_v0  ;;  %4091 = vmatprep.subr.mxu1 %v6904_v41 }
 0x43f   :  { %1308 = vmatpush1.msra.mxu0 %v5575_v47  ;;  %4092 = vmatpush3.msra.mxu1 %v5578_v5 }
 0x440   :  { %1309 = vmatprep.subr.mxu0 %v5581_v15  ;;  %4093 = vmatprep.subr.mxu1 %v6904_v41 }
 0x441   :  { %1310 = vmatpush1.msra.mxu0 %v5585_v1  ;;  %4094 = vmatpush3.msra.mxu1 %v5111_v43  ;;  %v5605_v43 = vld [vmem:[#allocation9 + $0xc8] sm:$0xff] }
 0x442   :  { %1311 = vmatprep.subr.mxu0 %v5589_v59  ;;  %4095 = vmatprep.subr.mxu1 %v6904_v41 }
 0x443   :  { %1312 = vmatpush1.msra.mxu0 %v5593_v17  ;;  %4096 = vmatpush3.msra.mxu1 %v5120_v46  ;;  %v5613_v46 = vld [vmem:[#allocation9 + $0xb0] sm:$0xff] }
 0x444   :  { %1313 = vmatprep.subr.mxu0 %v5597_v4  ;;  %4097 = vmatprep.subr.mxu1 %v6904_v41 }
 0x445   :  { %1314 = vmatpush1.msra.mxu0 %v5601_v22  ;;  %4098 = vmatpush3.msra.mxu1 %v5130_v48  ;;  %v5621_v48 = vld [vmem:[#allocation9 + $0x98] sm:$0xff] }
 0x446   :  { %1315 = vmatprep.subr.mxu0 %v5605_v43  ;;  %4099 = vmatprep.subr.mxu1 %v6904_v41 }
 0x447   :  { %1316 = vmatpush1.msra.mxu0 %v5609_v3  ;;  %4100 = vmatpush3.msra.mxu1 %v5136_v49  ;;  %v5629_v49 = vld [vmem:[#allocation9 + $0x80] sm:$0xff] }
 0x448   :  { %1317 = vmatprep.subr.mxu0 %v5613_v46  ;;  %4101 = vmatprep.subr.mxu1 %v6904_v41 }
 0x449   :  { %1318 = vmatpush1.msra.mxu0 %v5617_v34  ;;  %4102 = vmatpush3.msra.mxu1 %v5141_v50  ;;  %v5637_v50 = vld [vmem:[#allocation9 + $0x68] sm:$0xff] }
 0x44a   :  { %1319 = vmatprep.subr.mxu0 %v5621_v48  ;;  %4103 = vmatprep.subr.mxu1 %v6904_v41 }
 0x44b   :  { %1320 = vmatpush1.msra.mxu0 %v5625_v62  ;;  %4104 = vmatpush3.msra.mxu1 %v5147_v51  ;;  %v5645_v51 = vld [vmem:[#allocation9 + $0x50] sm:$0xff] }
 0x44c   :  { %1321 = vmatprep.subr.mxu0 %v5629_v49  ;;  %4105 = vmatprep.subr.mxu1 %v6904_v41 }
 0x44d   :  { %1322 = vmatpush1.msra.mxu0 %v5633_v2  ;;  %4106 = vmatpush3.msra.mxu1 %v5153_v52  ;;  %v5653_v52 = vld [vmem:[#allocation9 + $0x38] sm:$0xff] }
 0x44e   :  { %1323 = vmatprep.subr.mxu0 %v5637_v50  ;;  %4107 = vmatprep.subr.mxu1 %v6904_v41 }
 0x44f   :  { %1324 = vmatpush1.msra.mxu0 %v5641_v6  ;;  %4108 = vmatpush3.msra.mxu1 %v5158_v53  ;;  %v5661_v53 = vld [vmem:[#allocation9 + $0x20] sm:$0xff] }
 0x450   :  { %1325 = vmatprep.subr.mxu0 %v5645_v51  ;;  %4109 = vmatprep.subr.mxu1 %v6904_v41 }
 0x451   :  { %1326 = vmatpush1.msra.mxu0 %v5649_v10  ;;  %4110 = vmatpush3.msra.mxu1 %v5164_v54  ;;  %v5669_v54 = vld [vmem:[#allocation9 + $0x8] sm:$0xff] }
 0x452   :  { %1327 = vmatprep.subr.mxu0 %v5653_v52  ;;  %4111 = vmatprep.subr.mxu1 %v6904_v41  ;;  %6934 = vst [vmem:[#allocation25_spill] sm:$0xff] %v5669_v54 }
 0x453   :  { %1328 = vmatpush1.msra.mxu0 %v5657_v12  ;;  %4112 = vmatpush3.msra.mxu1 %v5170_v55 }
 0x454   :  { %1329 = vmatprep.subr.mxu0 %v5661_v53  ;;  %4113 = vmatprep.subr.mxu1 %v6904_v41 }
 0x455   :  { %1330 = vmatpush1.msra.mxu0 %v5665_v13  ;;  %4114 = vmatpush3.msra.mxu1 %v6925_v63 }
 0x456   :  { %1331 = vmatprep.subr.mxu0 %v5669_v54  ;;  %4115 = vmatprep.subr.mxu1 %v6904_v41 }
 0x457   :  { %1332 = vmatpush1.msra.mxu0 %v5673_v14  ;;  %1365 = vmatprep.mubr.f32.mxu0 %v6904_v41 }
 0x458   :  { %4116 = vmatpush3.msra.mxu1 %v6928_v7  ;;  %4117 = vmatprep.mubr.msk.f32.mxu1 %vm4864_vm0, %v6904_v41 }
 0x459   :  { %1460 = vmatprep.subr.mxu0 %v5532_v8  ;;  %4120 = vmatprep.subr.mxu1 %v6904_v41 }
 0x4f8   :  { %v1208_v55 = vpop.f32.mrf.mxu0  ;;  %v1279_v63 = vpop.f32.mrf.mxu1 }
 0x4f9   :  { %v1283_v18 = vadd.f32 %v1208_v55, %v6936_v16  ;;  %v1293_v29 = vadd.f32 %v5308_v56, %v1279_v63  ;;  %v5708_v63 = vld [vmem:[#allocation9 + $0x118] sm:$0xff] }
 0x4fa   :  { %v4084_v19 = vpop.f32.mrf.mxu1  ;;  %v1210_v21 = vpop.f32.mrf.mxu0 }
 0x4fb   :  { %v1285_v20 = vmul.f32 0.5, %v1283_v18  ;;  %v1284_v24 = vadd.f32 %v1210_v21, %v6937_v23  ;;  %v5714_v18 = vld [vmem:[#allocation9 + $0x100] sm:$0xff]  ;;  %v5720_v19 = vld [vmem:[#allocation9 + $0xe8] sm:$0xff]  ;;  %v5732_v21 = vld [vmem:[#allocation9 + $0xb8] sm:$0xff] }
 0x4fc   :  { %v5738_v23 = vld [vmem:[#allocation9 + $0xa0] sm:$0xff] }
 0x4fd   :  { %4584 = vtanh.f32 %v1285_v20  ;;  %v1286_v25 = vmul.f32 0.5, %v1284_v24  ;;  %v5726_v20 = vld [vmem:[#allocation9 + $0xd0] sm:$0xff]  ;;  %v5744_v24 = vld [vmem:[#allocation9 + $0x88] sm:$0xff] }
 0x4ff   :  { %4586 = vtanh.f32 %v1286_v25  ;;  %v5750_v25 = vld [vmem:[#allocation9 + $0x70] sm:$0xff] }
 0x50a   :  { %v4585_v7 = vpop.eup %4584 }
 0x50b   :  { %v1289_v26 = vmul.f32 0.5, %v4585_v7  ;;  %v5756_v7 = vld [vmem:[#allocation9 + $0x58] sm:$0xff] }
 0x50c   :  { %v4587_v33 = vpop.eup %4586 }
 0x50d   :  { %v1291_v27 = vadd.f32 0.5, %v1289_v26  ;;  %v1290_v35 = vmul.f32 0.5, %v4587_v33  ;;  %v5762_v26 = vld [vmem:[#allocation9 + $0x40] sm:$0xff] }
 0x50f   :  { %v1294_v30 = vmul.f32 %v1293_v29, %v1291_v27  ;;  %v1292_v36 = vadd.f32 0.5, %v1290_v35  ;;  %v5768_v27 = vld [vmem:[#allocation9 + $0x28] sm:$0xff]  ;;  %v5775_v29 = vld [vmem:[#allocation9 + $0x10] sm:$0xff] }
 0x510   :  { %6939 = vst [vmem:[#allocation39_spill] sm:$0xff] %v5768_v27  ;;  %6940 = vst [vmem:[#allocation17_spill] sm:$0xff] %v5775_v29 }
 0x511   :  { %v1295_v32 = vadd.f32 %v1294_v30, %v6938_v31  ;;  %v1297_v37 = vsub.f32 1.0, %v1292_v36  ;;  %v1299_v55 = vmul.f32 %v1292_v36, %v5541_v40 }
 0x513   :  { %4588 = vtanh.f32 %v1295_v32  ;;  %v6941_v32 = vld [vmem:[#allocation32_spill] sm:$0xff] }
 0x520   :  { %v4589_v38 = vpop.eup %4588 }
 0x521   :  { %v1298_v39 = vmul.f32 %v4589_v38, %v1297_v37  ;;  %v6942_v38 = vld [vmem:[#allocation33_spill] sm:$0xff] }
 0x523   :  { %v5687_v16 = vadd.f32 %v1299_v55, %v1298_v39 }
 0x525   :  { %1366 = vmatmul.mubr.f32.vlgmr.msra.gmra.mxu0 %v5687_v16  ;;  %4118 = vmatmul.mubr.f32.vlgmr.msra.gmra.mxu1 %v5687_v16 }
 0x526   :  { %1461 = vmatpush1.msra.mxu0 %v5545_v42  ;;  %4121 = vmatpush3.msra.mxu1 %v5548_v57 }
 0x527   :  { %1462 = vmatprep.subr.mxu0 %v5551_v44  ;;  %4122 = vmatprep.subr.mxu1 %v6904_v41 }
 0x528   :  { %1463 = vmatpush1.msra.mxu0 %v5555_v60  ;;  %4123 = vmatpush3.msra.mxu1 %v5558_v58 }
 0x529   :  { %1464 = vmatprep.subr.mxu0 %v5561_v11  ;;  %4124 = vmatprep.subr.mxu1 %v6904_v41 }
 0x52a   :  { %1465 = vmatpush1.msra.mxu0 %v5565_v28  ;;  %4125 = vmatpush3.msra.mxu1 %v5568_v45 }
 0x52b   :  { %1466 = vmatprep.subr.mxu0 %v5571_v0  ;;  %4126 = vmatprep.subr.mxu1 %v6904_v41 }
 0x52c   :  { %1467 = vmatpush1.msra.mxu0 %v5575_v47  ;;  %4127 = vmatpush3.msra.mxu1 %v5578_v5 }
 0x52d   :  { %1468 = vmatprep.subr.mxu0 %v5581_v15  ;;  %4128 = vmatprep.subr.mxu1 %v6904_v41 }
 0x52e   :  { %1469 = vmatpush1.msra.mxu0 %v5585_v1  ;;  %4129 = vmatpush3.msra.mxu1 %v5708_v63 }
 0x52f   :  { %1470 = vmatprep.subr.mxu0 %v5589_v59  ;;  %4130 = vmatprep.subr.mxu1 %v6904_v41 }
 0x530   :  { %1471 = vmatpush1.msra.mxu0 %v5593_v17  ;;  %4131 = vmatpush3.msra.mxu1 %v5714_v18 }
 0x531   :  { %1472 = vmatprep.subr.mxu0 %v5597_v4  ;;  %4132 = vmatprep.subr.mxu1 %v6904_v41 }
 0x532   :  { %1473 = vmatpush1.msra.mxu0 %v5601_v22  ;;  %4133 = vmatpush3.msra.mxu1 %v5720_v19 }
 0x533   :  { %1474 = vmatprep.subr.mxu0 %v5605_v43  ;;  %4134 = vmatprep.subr.mxu1 %v6904_v41 }
 0x534   :  { %1475 = vmatpush1.msra.mxu0 %v5609_v3  ;;  %4135 = vmatpush3.msra.mxu1 %v5726_v20 }
 0x535   :  { %1476 = vmatprep.subr.mxu0 %v5613_v46  ;;  %4136 = vmatprep.subr.mxu1 %v6904_v41 }
 0x536   :  { %1477 = vmatpush1.msra.mxu0 %v5617_v34  ;;  %4137 = vmatpush3.msra.mxu1 %v5732_v21 }
 0x537   :  { %1478 = vmatprep.subr.mxu0 %v5621_v48  ;;  %4138 = vmatprep.subr.mxu1 %v6904_v41 }
 0x538   :  { %1479 = vmatpush1.msra.mxu0 %v5625_v62  ;;  %4139 = vmatpush3.msra.mxu1 %v5738_v23 }
 0x539   :  { %1480 = vmatprep.subr.mxu0 %v5629_v49  ;;  %4140 = vmatprep.subr.mxu1 %v6904_v41 }
 0x53a   :  { %1481 = vmatpush1.msra.mxu0 %v5633_v2  ;;  %4141 = vmatpush3.msra.mxu1 %v5744_v24 }
 0x53b   :  { %1482 = vmatprep.subr.mxu0 %v5637_v50  ;;  %4142 = vmatprep.subr.mxu1 %v6904_v41 }
 0x53c   :  { %1483 = vmatpush1.msra.mxu0 %v5641_v6  ;;  %4143 = vmatpush3.msra.mxu1 %v5750_v25 }
 0x53d   :  { %1484 = vmatprep.subr.mxu0 %v5645_v51  ;;  %4144 = vmatprep.subr.mxu1 %v6904_v41 }
 0x53e   :  { %1485 = vmatpush1.msra.mxu0 %v5649_v10  ;;  %4145 = vmatpush3.msra.mxu1 %v5756_v7 }
 0x53f   :  { %1486 = vmatprep.subr.mxu0 %v5653_v52  ;;  %4146 = vmatprep.subr.mxu1 %v6904_v41 }
 0x540   :  { %1487 = vmatpush1.msra.mxu0 %v5657_v12  ;;  %4147 = vmatpush3.msra.mxu1 %v5762_v26 }
 0x541   :  { %1488 = vmatprep.subr.mxu0 %v5661_v53  ;;  %4148 = vmatprep.subr.mxu1 %v6904_v41 }
 0x542   :  { %1489 = vmatpush1.msra.mxu0 %v5665_v13  ;;  %4149 = vmatpush3.msra.mxu1 %v5768_v27 }
 0x543   :  { %1490 = vmatprep.subr.mxu0 %v5669_v54  ;;  %4150 = vmatprep.subr.mxu1 %v6904_v41 }
 0x544   :  { %1491 = vmatpush1.msra.mxu0 %v5673_v14  ;;  %1524 = vmatprep.mubr.f32.mxu0 %v6904_v41  ;;  %v6943_v14 = vld [vmem:[#allocation40_spill] sm:$0xff] }
 0x545   :  { %4151 = vmatpush3.msra.mxu1 %v5775_v29  ;;  %4152 = vmatprep.mubr.msk.f32.mxu1 %vm4864_vm0, %v6904_v41 }
 0x546   :  { %1619 = vmatprep.subr.mxu0 %v5532_v8  ;;  %4155 = vmatprep.subr.mxu1 %v6904_v41 }
 0x5e5   :  { %v1367_v30 = vpop.f32.mrf.mxu0  ;;  %v1438_v31 = vpop.f32.mrf.mxu1 }
 0x5e6   :  { %v1442_v33 = vadd.f32 %v1367_v30, %v6941_v32  ;;  %v1452_v29 = vadd.f32 %v5308_v56, %v1438_v31  ;;  %v6944_v56 = vld [vmem:[#allocation16_spill] sm:$0xff]  ;;  %v1808_v31 = vld [vmem:[#allocation7 + $0x268] sm:$0xff] }
 0x5e7   :  { %v4119_v35 = vpop.f32.mrf.mxu1  ;;  %v1369_v37 = vpop.f32.mrf.mxu0 }
 0x5e8   :  { %v1444_v36 = vmul.f32 0.5, %v1442_v33  ;;  %v1443_v39 = vadd.f32 %v1369_v37, %v6942_v38  ;;  %v1806_v38 = vld [vmem:[#allocation7 + $0x258] sm:$0xff] }
 0x5ea   :  { %4590 = vtanh.f32 %v1444_v36  ;;  %v1445_v55 = vmul.f32 0.5, %v1443_v39  ;;  %v1804_v39 = vld [vmem:[#allocation7 + $0x248] sm:$0xff] }
 0x5ec   :  { %4592 = vtanh.f32 %v1445_v55  ;;  %v1805_v55 = vld [vmem:[#allocation7 + $0x250] sm:$0xff] }
 0x5f7   :  { %v4591_v40 = vpop.eup %4590 }
 0x5f8   :  { %v1448_v9 = vmul.f32 0.5, %v4591_v40  ;;  %v6947_v40 = vld [vmem:[#allocation26_spill] sm:$0xff] }
 0x5f9   :  { %v4593_v27 = vpop.eup %4592 }
 0x5fa   :  { %v1450_v61 = vadd.f32 0.5, %v1448_v9  ;;  %v1449_v13 = vmul.f32 0.5, %v4593_v27  ;;  %v6946_v9 = vld [vmem:[#allocation25_spill] sm:$0xff]  ;;  %v1809_v27 = vld [vmem:[#allocation7 + $0x270] sm:$0xff] }
 0x5fc   :  { %v1453_v8 = vmul.f32 %v1452_v29, %v1450_v61  ;;  %v1451_v30 = vadd.f32 0.5, %v1449_v13  ;;  %v6945_v61 = vld [vmem:[#allocation39_spill] sm:$0xff]  ;;  %v1821_v13 = vld [vmem:[#allocation7 + $0x2d0] sm:$0xff]  ;;  %v1807_v29 = vld [vmem:[#allocation7 + $0x260] sm:$0xff] }
 0x5fe   :  { %v1454_v54 = vadd.f32 %v1453_v8, %v6943_v14  ;;  %v1456_v32 = vsub.f32 1.0, %v1451_v30  ;;  %v1458_v36 = vmul.f32 %v1451_v30, %v5687_v16  ;;  %v1820_v14 = vld [vmem:[#allocation7 + $0x2c8] sm:$0xff]  ;;  %v1803_v8 = vld [vmem:[#allocation7 + $0x240] sm:$0xff]  ;;  %v1801_v30 = vld [vmem:[#allocation7 + $0x230] sm:$0xff] }
 0x600   :  { %4594 = vtanh.f32 %v1454_v54  ;;  %v1819_v54 = vld [vmem:[#allocation7 + $0x2c0] sm:$0xff] }
 0x60d   :  { %v4595_v33 = vpop.eup %4594 }
 0x60e   :  { %v1457_v35 = vmul.f32 %v4595_v33, %v1456_v32  ;;  %v1802_v32 = vld [vmem:[#allocation7 + $0x238] sm:$0xff]  ;;  %v1800_v33 = vld [vmem:[#allocation7 + $0x228] sm:$0xff] }
 0x610   :  { %v5787_v37 = vadd.f32 %v1458_v36, %v1457_v35  ;;  %v1798_v35 = vld [vmem:[#allocation7 + $0x218] sm:$0xff]  ;;  %v1799_v36 = vld [vmem:[#allocation7 + $0x220] sm:$0xff] }
 0x612   :  { %1525 = vmatmul.mubr.f32.vlgmr.msra.gmra.mxu0 %v5787_v37  ;;  %4153 = vmatmul.mubr.f32.vlgmr.msra.gmra.mxu1 %v5787_v37 }
 0x613   :  { %1620 = vmatpush1.msra.mxu0 %v5545_v42  ;;  %4156 = vmatpush3.msra.mxu1 %v5548_v57  ;;  %v6948_v42 = vld [vmem:[#allocation17_spill] sm:$0xff]  ;;  %v1825_v57 = vld [vmem:[#allocation7 + $0x2f0] sm:$0xff] }
 0x614   :  { %1621 = vmatprep.subr.mxu0 %v5551_v44  ;;  %4157 = vmatprep.subr.mxu1 %v6904_v41  ;;  %v1826_v44 = vld [vmem:[#allocation7 + $0x2f8] sm:$0xff] }
 0x615   :  { %1622 = vmatpush1.msra.mxu0 %v5555_v60  ;;  %4158 = vmatpush3.msra.mxu1 %v5558_v58 }
 0x616   :  { %1623 = vmatprep.subr.mxu0 %v5561_v11  ;;  %4159 = vmatprep.subr.mxu1 %v6904_v41  ;;  %v6949_v11 = vld [vmem:[#allocation34_spill] sm:$0xff] }
 0x617   :  { %1624 = vmatpush1.msra.mxu0 %v5565_v28  ;;  %4160 = vmatpush3.msra.mxu1 %v5568_v45 }
 0x618   :  { %1625 = vmatprep.subr.mxu0 %v5571_v0  ;;  %4161 = vmatprep.subr.mxu1 %v6904_v41 }
 0x619   :  { %1626 = vmatpush1.msra.mxu0 %v5575_v47  ;;  %4162 = vmatpush3.msra.mxu1 %v5578_v5  ;;  %v6950_v5 = vld [vmem:[#allocation35_spill] sm:$0xff] }
 0x61a   :  { %1627 = vmatprep.subr.mxu0 %v5581_v15  ;;  %4163 = vmatprep.subr.mxu1 %v6904_v41 }
 0x61b   :  { %1628 = vmatpush1.msra.mxu0 %v5585_v1  ;;  %4164 = vmatpush3.msra.mxu1 %v5708_v63  ;;  %v1818_v63 = vld [vmem:[#allocation7 + $0x2b8] sm:$0xff] }
 0x61c   :  { %1629 = vmatprep.subr.mxu0 %v5589_v59  ;;  %4165 = vmatprep.subr.mxu1 %v6904_v41 }
 0x61d   :  { %1630 = vmatpush1.msra.mxu0 %v5593_v17  ;;  %4166 = vmatpush3.msra.mxu1 %v5714_v18  ;;  %v6952_v18 = vld [vmem:[#allocation44_spill] sm:$0xff] }
 0x61e   :  { %1631 = vmatprep.subr.mxu0 %v5597_v4  ;;  %4167 = vmatprep.subr.mxu1 %v6904_v41 }
 0x61f   :  { %1632 = vmatpush1.msra.mxu0 %v5601_v22  ;;  %4168 = vmatpush3.msra.mxu1 %v5720_v19  ;;  %v5861_v22 = vld [vmem:[%s6811_s5] ss:$0 sm:$0xff] }
 0x620   :  { %1633 = vmatprep.subr.mxu0 %v5605_v43  ;;  %4169 = vmatprep.subr.mxu1 %v6904_v41  ;;  %v1816_v19 = vld [vmem:[#allocation7 + $0x2a8] sm:$0xff] }
 0x621   :  { %1634 = vmatpush1.msra.mxu0 %v5609_v3  ;;  %4170 = vmatpush3.msra.mxu1 %v5726_v20  ;;  %v1817_v20 = vld [vmem:[#allocation7 + $0x2b0] sm:$0xff] }
 0x622   :  { %1635 = vmatprep.subr.mxu0 %v5613_v46  ;;  %4171 = vmatprep.subr.mxu1 %v6904_v41  ;;  %v6951_v46 = vld [vmem:[#allocation43_spill] sm:$0xff] }
 0x623   :  { %1636 = vmatpush1.msra.mxu0 %v5617_v34  ;;  %4172 = vmatpush3.msra.mxu1 %v5732_v21  ;;  %v1815_v21 = vld [vmem:[#allocation7 + $0x2a0] sm:$0xff] }
 0x624   :  { %1637 = vmatprep.subr.mxu0 %v5621_v48  ;;  %4173 = vmatprep.subr.mxu1 %v6904_v41 }
 0x625   :  { %1638 = vmatpush1.msra.mxu0 %v5625_v62  ;;  %4174 = vmatpush3.msra.mxu1 %v5738_v23  ;;  %v1813_v23 = vld [vmem:[#allocation7 + $0x290] sm:$0xff] }
 0x626   :  { %1639 = vmatprep.subr.mxu0 %v5629_v49  ;;  %4175 = vmatprep.subr.mxu1 %v6904_v41 }
 0x627   :  { %1640 = vmatpush1.msra.mxu0 %v5633_v2  ;;  %4176 = vmatpush3.msra.mxu1 %v5744_v24  ;;  %v1814_v24 = vld [vmem:[#allocation7 + $0x298] sm:$0xff] }
 0x628   :  { %1641 = vmatprep.subr.mxu0 %v5637_v50  ;;  %4177 = vmatprep.subr.mxu1 %v6904_v41 }
 0x629   :  { %1642 = vmatpush1.msra.mxu0 %v5641_v6  ;;  %4178 = vmatpush3.msra.mxu1 %v5750_v25  ;;  %v1812_v25 = vld [vmem:[#allocation7 + $0x288] sm:$0xff] }
 0x62a   :  { %1643 = vmatprep.subr.mxu0 %v5645_v51  ;;  %4179 = vmatprep.subr.mxu1 %v6904_v41 }
 0x62b   :  { %1644 = vmatpush1.msra.mxu0 %v5649_v10  ;;  %4180 = vmatpush3.msra.mxu1 %v5756_v7  ;;  %v1810_v7 = vld [vmem:[#allocation7 + $0x278] sm:$0xff] }
 0x62c   :  { %1645 = vmatprep.subr.mxu0 %v5653_v52  ;;  %4181 = vmatprep.subr.mxu1 %v6904_v41  ;;  %v1824_v52 = vld [vmem:[#allocation7 + $0x2e8] sm:$0xff] }
 0x62d   :  { %1646 = vmatpush1.msra.mxu0 %v5657_v12  ;;  %4182 = vmatpush3.msra.mxu1 %v5762_v26  ;;  %v1822_v12 = vld [vmem:[#allocation7 + $0x2d8] sm:$0xff]  ;;  %v1811_v26 = vld [vmem:[#allocation7 + $0x280] sm:$0xff] }
 0x62e   :  { %1647 = vmatprep.subr.mxu0 %v5661_v53  ;;  %4183 = vmatprep.subr.mxu1 %v6904_v41  ;;  %v1823_v53 = vld [vmem:[#allocation7 + $0x2e0] sm:$0xff] }
 0x62f   :  { %1648 = vmatpush1.msra.mxu0 %v6944_v56  ;;  %4184 = vmatpush3.msra.mxu1 %v6945_v61  ;;  %v1797_v56 = vld [vmem:[#allocation7 + $0x210] sm:$0xff]  ;;  %v1795_v61 = vld [vmem:[#allocation7 + $0x200] sm:$0xff] }
 0x630   :  { %1649 = vmatprep.subr.mxu0 %v6946_v9  ;;  %4185 = vmatprep.subr.mxu1 %v6904_v41  ;;  %v1796_v9 = vld [vmem:[#allocation7 + $0x208] sm:$0xff] }
 0x631   :  { %1650 = vmatpush1.msra.mxu0 %v6947_v40  ;;  %4186 = vmatpush3.msra.mxu1 %v6948_v42  ;;  %v1794_v40 = vld [vmem:[#allocation7 + $0x1f8] sm:$0xff]  ;;  %v1792_v42 = vld [vmem:[#allocation7 + $0x1e8] sm:$0xff] }
 0x632   :  { %1683 = vmatprep.mubr.f32.mxu0 %v6904_v41  ;;  %4187 = vmatprep.mubr.msk.f32.mxu1 %vm4864_vm0, %v6904_v41 }
 0x633   :  { %1896 = vmatprep.subr.mxu0 %v1825_v57  ;;  %4190 = vmatprep.subr.mxu1 %v1826_v44  ;;  %v1793_v57 = vld [vmem:[#allocation7 + $0x1f0] sm:$0xff] }
 0x6d2   :  { %v1526_v60 = vpop.f32.mrf.mxu0  ;;  %v1597_v58 = vpop.f32.mrf.mxu1 }
 0x6d3   :  { %v1601_v28 = vadd.f32 %v1526_v60, %v6949_v11  ;;  %v1611_v43 = vadd.f32 %v5861_v22, %v1597_v58  ;;  %v1789_v60 = vld [vmem:[#allocation7 + $0x1d0] sm:$0xff]  ;;  %v1790_v58 = vld [vmem:[#allocation7 + $0x1d8] sm:$0xff]  ;;  %v1788_v11 = vld [vmem:[#allocation7 + $0x1c8] sm:$0xff] }
 0x6d4   :  { %v4154_v45 = vpop.f32.mrf.mxu1  ;;  %v1528_v47 = vpop.f32.mrf.mxu0 }
 0x6d5   :  { %v1603_v0 = vmul.f32 0.5, %v1601_v28  ;;  %v1602_v15 = vadd.f32 %v1528_v47, %v6950_v5  ;;  %v1786_v28 = vld [vmem:[#allocation7 + $0x1b8] sm:$0xff]  ;;  %v1787_v45 = vld [vmem:[#allocation7 + $0x1c0] sm:$0xff]  ;;  %v1784_v5 = vld [vmem:[#allocation7 + $0x1a8] sm:$0xff] }
 0x6d6   :  { %v1783_v47 = vld [vmem:[#allocation7 + $0x1a0] sm:$0xff] }
 0x6d7   :  { %4596 = vtanh.f32 %v1603_v0  ;;  %v1604_v1 = vmul.f32 0.5, %v1602_v15  ;;  %v1785_v0 = vld [vmem:[#allocation7 + $0x1b0] sm:$0xff]  ;;  %v1782_v15 = vld [vmem:[#allocation7 + $0x198] sm:$0xff] }
 0x6d9   :  { %4598 = vtanh.f32 %v1604_v1  ;;  %v1780_v1 = vld [vmem:[#allocation7 + $0x188] sm:$0xff] }
 0x6e4   :  { %v4597_v59 = vpop.eup %4596 }
 0x6e5   :  { %v1607_v17 = vmul.f32 0.5, %v4597_v59  ;;  %v1781_v59 = vld [vmem:[#allocation7 + $0x190] sm:$0xff] }
 0x6e6   :  { %v4599_v48 = vpop.eup %4598 }
 0x6e7   :  { %v1609_v4 = vadd.f32 0.5, %v1607_v17  ;;  %v1608_v62 = vmul.f32 0.5, %v4599_v48  ;;  %v1779_v17 = vld [vmem:[#allocation7 + $0x180] sm:$0xff]  ;;  %v5899_v48 = vld [vmem:[#allocation9 + $0x2d8] sm:$0xff] }
 0x6e9   :  { %v1612_v3 = vmul.f32 %v1611_v43, %v1609_v4  ;;  %v1610_v49 = vadd.f32 0.5, %v1608_v62  ;;  %v6953_v4 = vld [vmem:[#allocation23_spill] sm:$0xff]  ;;  %v6954_v43 = vld [vmem:[#allocation24_spill] sm:$0xff] }
 0x6ea   :  { %v5908_v62 = vld [vmem:[#allocation9 + $0x2b8] sm:$0xff] }
 0x6eb   :  { %v1613_v34 = vadd.f32 %v1612_v3, %v6951_v46  ;;  %v1615_v2 = vsub.f32 1.0, %v1610_v49  ;;  %v1617_v51 = vmul.f32 %v1610_v49, %v5787_v37  ;;  %v6955_v3 = vld [vmem:[#allocation31_spill] sm:$0xff]  ;;  %v5893_v46 = vld [vmem:[#allocation9 + $0x2f0] sm:$0xff]  ;;  %v5911_v49 = vld [vmem:[#allocation9 + $0x2a8] sm:$0xff] }
 0x6ec   :  { %6956 = vst [vmem:[#allocation20_spill] sm:$0xff] %v5893_v46 }
 0x6ed   :  { %4600 = vtanh.f32 %v1613_v34  ;;  %v5896_v34 = vld [vmem:[#allocation9 + $0x2e8] sm:$0xff] }
 0x6fa   :  { %v4601_v50 = vpop.eup %4600 }
 0x6fb   :  { %v1616_v6 = vmul.f32 %v4601_v50, %v1615_v2  ;;  %v5914_v2 = vld [vmem:[#allocation9 + $0x2a0] sm:$0xff]  ;;  %v5917_v50 = vld [vmem:[#allocation9 + $0x290] sm:$0xff] }
 0x6fd   :  { %v5866_v10 = vadd.f32 %v1617_v51, %v1616_v6  ;;  %v5920_v6 = vld [vmem:[#allocation9 + $0x288] sm:$0xff]  ;;  %v5922_v51 = vld [vmem:[#allocation9 + $0x278] sm:$0xff] }
 0x6ff   :  { %1684 = vmatmul.mubr.f32.vlgmr.msra.gmra.mxu0 %v5866_v10  ;;  %4188 = vmatmul.mubr.f32.vlgmr.msra.gmra.mxu1 %v5866_v10 }
 0x700   :  { %1897 = vmatpush1.msra.mxu0 %v1824_v52  ;;  %4191 = vmatpush3.msra.mxu1 %v1826_v44  ;;  %v1791_v44 = vld [vmem:[#allocation7 + $0x1e0] sm:$0xff]  ;;  %v5924_v52 = vld [vmem:[#allocation9 + $0x270] sm:$0xff] }
 0x701   :  { %1898 = vmatprep.subr.mxu0 %v1822_v12  ;;  %4192 = vmatprep.subr.mxu1 %v1823_v53  ;;  %v5927_v12 = vld [vmem:[#allocation9 + $0x260] sm:$0xff] }
 0x702   :  { %4222 = vmatprep.mubr.f32.mxu1 %v6952_v18  ;;  %1899 = vmatpush1.msra.mxu0 %v1821_v13  ;;  %v5935_v13 = vld [vmem:[#allocation9 + $0x248] sm:$0xff] }
 0x703   :  { %4193 = vmatpush3.msra.mxu1 %v1823_v53  ;;  %1900 = vmatprep.subr.mxu0 %v1819_v54  ;;  %v5930_v53 = vld [vmem:[#allocation9 + $0x258] sm:$0xff]  ;;  %v5938_v54 = vld [vmem:[#allocation9 + $0x240] sm:$0xff] }
 0x704   :  { %4194 = vmatprep.subr.mxu1 %v1820_v14  ;;  %1901 = vmatpush1.msra.mxu0 %v1818_v63  ;;  %v5944_v63 = vld [vmem:[#allocation9 + $0x228] sm:$0xff] }
 0x705   :  { %4195 = vmatpush3.msra.mxu1 %v1820_v14  ;;  %1902 = vmatprep.subr.mxu0 %v1816_v19  ;;  %v5941_v14 = vld [vmem:[#allocation9 + $0x230] sm:$0xff] }
 0x706   :  { %4196 = vmatprep.subr.mxu1 %v1817_v20  ;;  %1903 = vmatpush1.msra.mxu0 %v1815_v21  ;;  %v5950_v19 = vld [vmem:[#allocation9 + $0x210] sm:$0xff]  ;;  %v5955_v21 = vld [vmem:[#allocation9 + $0x200] sm:$0xff] }
 0x707   :  { %4197 = vmatpush3.msra.mxu1 %v1817_v20  ;;  %1904 = vmatprep.subr.mxu0 %v1813_v23  ;;  %v5952_v20 = vld [vmem:[#allocation9 + $0x2f8] sm:$0xff] }
 0x708   :  { %4198 = vmatprep.subr.mxu1 %v1814_v24  ;;  %1905 = vmatpush1.msra.mxu0 %v1812_v25  ;;  %v5959_v23 = vld [vmem:[#allocation9 + $0x1f8] sm:$0xff]  ;;  %v5965_v25 = vld [vmem:[#allocation9 + $0x1e8] sm:$0xff] }
 0x709   :  { %4199 = vmatpush3.msra.mxu1 %v1814_v24  ;;  %1906 = vmatprep.subr.mxu0 %v1810_v7  ;;  %v5962_v24 = vld [vmem:[#allocation9 + $0x2e0] sm:$0xff] }
 0x70a   :  { %4200 = vmatprep.subr.mxu1 %v1811_v26  ;;  %1907 = vmatpush1.msra.mxu0 %v1809_v27  ;;  %v5969_v7 = vld [vmem:[#allocation9 + $0x1e0] sm:$0xff]  ;;  %v5975_v27 = vld [vmem:[#allocation9 + $0x1d0] sm:$0xff] }
 0x70b   :  { %4201 = vmatpush3.msra.mxu1 %v1811_v26  ;;  %1908 = vmatprep.subr.mxu0 %v1807_v29  ;;  %v5972_v26 = vld [vmem:[#allocation9 + $0x2c8] sm:$0xff] }
 0x70c   :  { %4202 = vmatprep.subr.mxu1 %v1808_v31  ;;  %1909 = vmatpush1.msra.mxu0 %v1806_v38  ;;  %v5979_v29 = vld [vmem:[#allocation9 + $0x1c8] sm:$0xff]  ;;  %v5985_v38 = vld [vmem:[#allocation9 + $0x1b8] sm:$0xff] }
 0x70d   :  { %4203 = vmatpush3.msra.mxu1 %v1808_v31  ;;  %1910 = vmatprep.subr.mxu0 %v1804_v39  ;;  %v5982_v31 = vld [vmem:[#allocation9 + $0x2b0] sm:$0xff] }
 0x70e   :  { %4204 = vmatprep.subr.mxu1 %v1805_v55  ;;  %1911 = vmatpush1.msra.mxu0 %v1803_v8  ;;  %v5989_v39 = vld [vmem:[#allocation9 + $0x1b0] sm:$0xff]  ;;  %v5995_v8 = vld [vmem:[#allocation9 + $0x1a0] sm:$0xff] }
 0x70f   :  { %4205 = vmatpush3.msra.mxu1 %v1805_v55  ;;  %1912 = vmatprep.subr.mxu0 %v1801_v30  ;;  %v5992_v55 = vld [vmem:[#allocation9 + $0x298] sm:$0xff]  ;;  %6957 = vst [vmem:[#allocation18_spill] sm:$0xff] %v5995_v8 }
 0x710   :  { %4206 = vmatprep.subr.mxu1 %v1802_v32  ;;  %1913 = vmatpush1.msra.mxu0 %v1800_v33  ;;  %v5999_v30 = vld [vmem:[#allocation9 + $0x198] sm:$0xff]  ;;  %v6005_v33 = vld [vmem:[#allocation9 + $0x188] sm:$0xff] }
 0x711   :  { %4207 = vmatpush3.msra.mxu1 %v1802_v32  ;;  %1914 = vmatprep.subr.mxu0 %v1798_v35  ;;  %6958 = vst [vmem:[#allocation19_spill] sm:$0xff] %v5999_v30  ;;  %v6002_v32 = vld [vmem:[#allocation9 + $0x280] sm:$0xff]  ;;  %6959 = vst [vmem:[#allocation21_spill] sm:$0xff] %v6005_v33 }
 0x712   :  { %4208 = vmatprep.subr.mxu1 %v1799_v36  ;;  %1915 = vmatpush1.msra.mxu0 %v1797_v56  ;;  %v6009_v35 = vld [vmem:[#allocation9 + $0x180] sm:$0xff]  ;;  %v6017_v56 = vld [vmem:[#allocation9 + $0x250] sm:$0xff] }
 0x713   :  { %4209 = vmatpush3.msra.mxu1 %v1799_v36  ;;  %1916 = vmatprep.subr.mxu0 %v1795_v61  ;;  %6960 = vst [vmem:[#allocation27_spill] sm:$0xff] %v6009_v35  ;;  %v6012_v36 = vld [vmem:[#allocation9 + $0x268] sm:$0xff]  ;;  %v6022_v61 = vld [vmem:[#allocation9 + $0x238] sm:$0xff] }
 0x714   :  { %4210 = vmatprep.subr.mxu1 %v1796_v9  ;;  %1917 = vmatpush1.msra.mxu0 %v1794_v40  ;;  %v6030_v40 = vld [vmem:[#allocation9 + $0x208] sm:$0xff] }
 0x715   :  { %4211 = vmatpush3.msra.mxu1 %v1796_v9  ;;  %1918 = vmatprep.subr.mxu0 %v1792_v42  ;;  %v6026_v9 = vld [vmem:[#allocation9 + $0x220] sm:$0xff]  ;;  %v6034_v42 = vld [vmem:[#allocation9 + $0x1f0] sm:$0xff] }
 0x716   :  { %4212 = vmatprep.subr.mxu1 %v1793_v57  ;;  %1919 = vmatpush1.msra.mxu0 %v1791_v44  ;;  %v6040_v44 = vld [vmem:[#allocation9 + $0x1c0] sm:$0xff] }
 0x717   :  { %4213 = vmatpush3.msra.mxu1 %v1793_v57  ;;  %1920 = vmatprep.subr.mxu0 %v1789_v60  ;;  %v6037_v57 = vld [vmem:[#allocation9 + $0x1d8] sm:$0xff]  ;;  %6961 = vst [vmem:[#allocation28_spill] sm:$0xff] %v6040_v44  ;;  %v6044_v60 = vld [vmem:[#allocation9 + $0x1a8] sm:$0xff] }
 0x718   :  { %4214 = vmatprep.subr.mxu1 %v1790_v58  ;;  %1921 = vmatpush1.msra.mxu0 %v1788_v11  ;;  %6962 = vst [vmem:[#allocation38_spill] sm:$0xff] %v6044_v60 }
 0x719   :  { %4215 = vmatpush3.msra.mxu1 %v1790_v58  ;;  %1922 = vmatprep.subr.mxu0 %v1786_v28  ;;  %v6048_v58 = vld [vmem:[#allocation9 + $0x190] sm:$0xff] }
 0x71a   :  { %4216 = vmatprep.subr.mxu1 %v1787_v45  ;;  %1923 = vmatpush1.msra.mxu0 %v1785_v0  ;;  %6963 = vst [vmem:[#allocation29_spill] sm:$0xff] %v6048_v58 }
 0x71b   :  { %4217 = vmatpush3.msra.mxu1 %v1787_v45  ;;  %1924 = vmatprep.subr.mxu0 %v1783_v47  ;;  %v6964_v45 = vld [vmem:[#allocation36_spill] sm:$0xff] }
 0x71c   :  { %4218 = vmatprep.subr.mxu1 %v1784_v5  ;;  %1925 = vmatpush1.msra.mxu0 %v1782_v15 }
 0x71d   :  { %4219 = vmatpush3.msra.mxu1 %v1784_v5  ;;  %1926 = vmatprep.subr.mxu0 %v1780_v1  ;;  %v6965_v1 = vld [vmem:[#allocation37_spill] sm:$0xff] }
 0x71e   :  { %4220 = vmatprep.subr.mxu1 %v1781_v59  ;;  %1927 = vmatpush1.msra.mxu0 %v1779_v17 }
 0x71f   :  { %1960 = vmatprep.mubr.f32.mxu0 %v6904_v41  ;;  %4221 = vmatpush3.msra.mxu1 %v1781_v59 }
 0x720   :  { %1961 = vmatmul.mubr.f32.vlgmr.msra.gmra.mxu0 %v6952_v18  ;;  %4223 = vmatmul.mubr.f32.vlgmr.msra.gmra.mxu1 %v6953_v4  ;;  %v5947_v18 = vld [vmem:[#allocation9 + $0x218] sm:$0xff] }
 0x721   :  { %4225 = vmatprep.mubr.f32.mxu1 %v6954_v43  ;;  %1966 = vmatprep.mubr.f32.mxu0 %v6904_v41 }
 0x722   :  { %4234 = vmatprep.subr.mxu1 %v6904_v41  ;;  %2114 = vmatprep.subr.mxu0 %v5893_v46 }
 0x723   :  { %2115 = vmatpush1.msra.mxu0 %v5896_v34  ;;  %4235 = vmatpush3.msra.mxu1 %v5952_v20 }
 0x724   :  { %1967 = vmatmul.mubr.f32.gmra.mxu0 %v6953_v4  ;;  %4226 = vmatmul.mubr.f32.gmra.mxu1 %v6955_v3 }
 0x725   :  { %4228 = vmatprep.mubr.f32.mxu1 %v5687_v16  ;;  %1972 = vmatprep.mubr.f32.mxu0 %v6904_v41 }
 0x726   :  { %2116 = vmatprep.subr.mxu0 %v5899_v48  ;;  %4236 = vmatprep.subr.mxu1 %v6904_v41 }
 0x727   :  { %4237 = vmatpush3.msra.mxu1 %v5962_v24 }
 0x728   :  { %1973 = vmatmul.mubr.f32.gmra.mxu0 %v6954_v43  ;;  %4229 = vmatmul.mubr.f32.gmra.mxu1 %v5787_v37 }
 0x729   :  { %4231 = vmatprep.mubr.f32.mxu1 %v5866_v10  ;;  %1978 = vmatprep.mubr.f32.mxu0 %v6904_v41 }
 0x72a   :  { %4238 = vmatprep.subr.mxu1 %v6904_v41 }
 0x72b   :  { %4239 = vmatpush3.msra.mxu1 %v5972_v26 }
 0x72c   :  { %1979 = vmatmul.mubr.f32.gmra.mxu0 %v6955_v3  ;;  %4240 = vmatprep.subr.mxu1 %v6904_v41 }
 0x72d   :  { %1984 = vmatprep.mubr.f32.mxu0 %v6904_v41  ;;  %4241 = vmatpush3.msra.mxu1 %v5982_v31 }
 0x72e   :  { %4242 = vmatprep.subr.mxu1 %v6904_v41 }
 0x72f   :  { %4243 = vmatpush3.msra.mxu1 %v5992_v55 }
 0x730   :  { %1985 = vmatmul.mubr.f32.gmra.mxu0 %v5687_v16  ;;  %v5902_v16 = vld [vmem:[#allocation9 + $0x2d0] sm:$0xff]  ;;  %4244 = vmatprep.subr.mxu1 %v6904_v41 }
 0x731   :  { %1990 = vmatprep.mubr.f32.mxu0 %v6904_v41  ;;  %2117 = vmatpush1.msra.mxu0 %v5902_v16 }
 0x732   :  { %4245 = vmatpush3.msra.mxu1 %v6002_v32 }
 0x733   :  { %4246 = vmatprep.subr.mxu1 %v6904_v41 }
 0x734   :  { %1991 = vmatmul.mubr.f32.gmra.mxu0 %v5787_v37  ;;  %v5905_v37 = vld [vmem:[#allocation9 + $0x2c0] sm:$0xff]  ;;  %4247 = vmatpush3.msra.mxu1 %v6012_v36 }
 0x735   :  { %1996 = vmatprep.mubr.f32.mxu0 %v6904_v41  ;;  %2118 = vmatprep.subr.mxu0 %v5905_v37 }
 0x736   :  { %2119 = vmatpush1.msra.mxu0 %v5908_v62  ;;  %4248 = vmatprep.subr.mxu1 %v6904_v41 }
 0x737   :  { %2120 = vmatprep.subr.mxu0 %v5911_v49  ;;  %4249 = vmatpush3.msra.mxu1 %v6017_v56 }
 0x738   :  { %1997 = vmatmul.mubr.f32.gmra.mxu0 %v5866_v10  ;;  %4250 = vmatprep.subr.mxu1 %v6904_v41 }
 0x739   :  { %2002 = vmatprep.mubr.f32.mxu0 %v6904_v41  ;;  %2121 = vmatpush1.msra.mxu0 %v5914_v2 }
 0x73a   :  { %2122 = vmatprep.subr.mxu0 %v5917_v50  ;;  %4251 = vmatpush3.msra.mxu1 %v6022_v61 }
 0x73b   :  { %2123 = vmatpush1.msra.mxu0 %v5920_v6  ;;  %4252 = vmatprep.subr.mxu1 %v6904_v41 }
 0x73c   :  { %2124 = vmatprep.subr.mxu0 %v5922_v51  ;;  %4253 = vmatpush3.msra.mxu1 %v6026_v9 }
 0x73d   :  { %2125 = vmatpush1.msra.mxu0 %v5924_v52  ;;  %4254 = vmatprep.subr.mxu1 %v6904_v41 }
 0x73e   :  { %2126 = vmatprep.subr.mxu0 %v5927_v12  ;;  %4255 = vmatpush3.msra.mxu1 %v6030_v40 }
 0x73f   :  { %2127 = vmatpush1.msra.mxu0 %v5930_v53  ;;  %4256 = vmatprep.subr.mxu1 %v6904_v41 }
 0x740   :  { %2128 = vmatprep.subr.mxu0 %v5935_v13  ;;  %4257 = vmatpush3.msra.mxu1 %v6034_v42 }
 0x741   :  { %2129 = vmatpush1.msra.mxu0 %v5938_v54  ;;  %4258 = vmatprep.subr.mxu1 %v6904_v41 }
 0x742   :  { %2130 = vmatprep.subr.mxu0 %v5941_v14  ;;  %4259 = vmatpush3.msra.mxu1 %v6037_v57 }
 0x743   :  { %2131 = vmatpush1.msra.mxu0 %v5944_v63  ;;  %4260 = vmatprep.subr.mxu1 %v6904_v41 }
 0x744   :  { %2132 = vmatprep.subr.mxu0 %v5947_v18  ;;  %4261 = vmatpush3.msra.mxu1 %v6040_v44 }
 0x745   :  { %2133 = vmatpush1.msra.mxu0 %v5950_v19  ;;  %4262 = vmatprep.subr.mxu1 %v6904_v41 }
 0x746   :  { %2134 = vmatprep.subr.mxu0 %v5955_v21  ;;  %4263 = vmatpush3.msra.mxu1 %v6044_v60 }
 0x747   :  { %2135 = vmatpush1.msra.mxu0 %v5959_v23  ;;  %4264 = vmatprep.subr.mxu1 %v6904_v41 }
 0x748   :  { %2136 = vmatprep.subr.mxu0 %v5965_v25  ;;  %4265 = vmatpush3.msra.mxu1 %v6048_v58 }
 0x749   :  { %2137 = vmatpush1.msra.mxu0 %v5969_v7  ;;  %4269 = vmatprep.subr.mxu1 %v6904_v41 }
 0x74a   :  { %2138 = vmatprep.subr.mxu0 %v5975_v27 }
 0x74b   :  { %2139 = vmatpush1.msra.mxu0 %v5979_v29 }
 0x74c   :  { %2140 = vmatprep.subr.mxu0 %v5985_v38 }
 0x74d   :  { %2141 = vmatpush1.msra.mxu0 %v5989_v39 }
 0x74e   :  { %2142 = vmatprep.subr.mxu0 %v5995_v8 }
 0x74f   :  { %2143 = vmatpush1.msra.mxu0 %v5999_v30 }
 0x750   :  { %2144 = vmatprep.subr.mxu0 %v6005_v33 }
 0x751   :  { %2145 = vmatpush1.msra.mxu0 %v6009_v35  ;;  %v6966_v35 = vld [vmem:[#allocation42_spill] sm:$0xff] }
 0x752   :  { %2279 = vmatprep.subr.mxu0 %v5893_v46 }
 0x7bf   :  { %v1685_v11 = vpop.f32.mrf.mxu0  ;;  %v1756_v28 = vpop.f32.mrf.mxu1 }
 0x7c0   :  { %v1760_v0 = vadd.f32 %v1685_v11, %v6964_v45  ;;  %v1770_v46 = vadd.f32 %v5861_v22, %v1756_v28  ;;  %v6967_v22 = vld [vmem:[#allocation19_spill] sm:$0xff] }
 0x7c1   :  { %v4189_v47 = vpop.f32.mrf.mxu1  ;;  %v1687_v15 = vpop.f32.mrf.mxu0 }
 0x7c2   :  { %v1762_v5 = vmul.f32 0.5, %v1760_v0  ;;  %v1761_v59 = vadd.f32 %v1687_v15, %v6965_v1 }
 0x7c4   :  { %4602 = vtanh.f32 %v1762_v5  ;;  %v1763_v17 = vmul.f32 0.5, %v1761_v59 }
 0x7c6   :  { %4604 = vtanh.f32 %v1763_v17 }
 0x7d1   :  { %v4603_v4 = vpop.eup %4602 }
 0x7d2   :  { %v1766_v43 = vmul.f32 0.5, %v4603_v4 }
 0x7d3   :  { %v4605_v60 = vpop.eup %4604 }
 0x7d4   :  { %v1768_v3 = vadd.f32 0.5, %v1766_v43  ;;  %v1767_v30 = vmul.f32 0.5, %v4605_v60 }
 0x7d6   :  { %v1771_v58 = vmul.f32 %v1770_v46, %v1768_v3  ;;  %v1769_v11 = vadd.f32 0.5, %v1767_v30  ;;  %v6969_v46 = vld [vmem:[#allocation21_spill] sm:$0xff]  ;;  %v6970_v30 = vld [vmem:[#allocation27_spill] sm:$0xff] }
 0x7d8   :  { %v1772_v33 = vadd.f32 %v1771_v58, %v6966_v35  ;;  %v1774_v45 = vsub.f32 1.0, %v1769_v11  ;;  %v1776_v5 = vmul.f32 %v1769_v11, %v5866_v10  ;;  %v6968_v10 = vld [vmem:[#allocation38_spill] sm:$0xff]  ;;  %v6972_v35 = vld [vmem:[#allocation20_spill] sm:$0xff] }
 0x7da   :  { %4606 = vtanh.f32 %v1772_v33  ;;  %v6971_v33 = vld [vmem:[#allocation29_spill] sm:$0xff] }
 0x7e0   :  { %v1962_v60 = vpop.f32.mrf.mxu0  ;;  %v6143_v3 = vpop.f32.mrf.mxu1 }
 0x7e1   :  { %6979 = vst [vmem:[#allocation39_spill] sm:$0xff] %v6143_v3 }
 0x7e2   :  { %v1964_v58 = vpop.f32.mrf.mxu0 }
 0x7e4   :  { %v6131_v28 = vpop.f32.mrf.mxu0 }
 0x7e5   :  { %6973 = vst [vmem:[#allocation30_spill] sm:$0xff] %v6131_v28 }
 0x7e6   :  { %v6133_v1 = vpop.f32.mrf.mxu0 }
 0x7e7   :  { %v4607_v0 = vpop.eup %4606  ;;  %6974 = vst [vmem:[#allocation41_spill] sm:$0xff] %v6133_v1 }
 0x7e8   :  { %v1775_v47 = vmul.f32 %v4607_v0, %v1774_v45  ;;  %v6135_v59 = vpop.f32.mrf.mxu0  ;;  %v2075_v45 = vpop.f32.mrf.mxu1 }
 0x7e9   :  { %6975 = vst [vmem:[#allocation32_spill] sm:$0xff] %v6135_v59 }
 0x7ea   :  { %v1777_v15 = vadd.f32 %v1776_v5, %v1775_v47  ;;  %v6137_v17 = vpop.f32.mrf.mxu0  ;;  %v6149_v47 = vpop.f32.mrf.mxu1 }
 0x7eb   :  { %6976 = vst [vmem:[#allocation33_spill] sm:$0xff] %v6137_v17  ;;  %6982 = vst [vmem:[#allocation17_spill] sm:$0xff] %v6149_v47 }
 0x7ec   :  { %2003 = vmatmul.mubr.f32.gmra.mxu0 %v1777_v15  ;;  %4232 = vmatmul.mubr.f32.gmra.mxu1 %v1777_v15  ;;  %v6139_v4 = vpop.f32.mrf.mxu0  ;;  %v6153_v15 = vpop.f32.mrf.mxu1 }
 0x7ed   :  { %2178 = vmatprep.mubr.f32.mxu0 %v6904_v41  ;;  %4266 = vmatprep.mubr.msk.f32.mxu1 %vm4864_vm0, %v6904_v41  ;;  %6977 = vst [vmem:[#allocation40_spill] sm:$0xff] %v6139_v4  ;;  %6984 = vst [vmem:[#allocation35_spill] sm:$0xff] %v6153_v15 }
 0x7ee   :  { %v6141_v43 = vpop.f32.mrf.mxu0  ;;  %v6157_v17 = vpop.f32.mrf.mxu1 }
 0x7ef   :  { %6978 = vst [vmem:[#allocation16_spill] sm:$0xff] %v6141_v43  ;;  %6986 = vst [vmem:[#allocation44_spill] sm:$0xff] %v6157_v17  ;;  %v3525_v43 = vld [vmem:[%s6810_s4 + $0x3] sm:$0x7] }
 0x7f0   :  { %2179 = vmatmul.mubr.f32.vlgmr.msra.gmra.mxu0 %v6904_v41  ;;  %4267 = vmatmul.mubr.f32.vlgmr.msra.gmra.mxu1 %v6904_v41  ;;  %v6145_v11 = vpop.f32.mrf.mxu0 }
 0x7f1   :  { %2280 = vmatpush1.msra.mxu0 %v5896_v34  ;;  %4270 = vmatpush3.msra.mxu1 %v5952_v20  ;;  %6980 = vst [vmem:[#allocation25_spill] sm:$0xff] %v6145_v11  ;;  %v6164_v11 = vpop.f32.mrf.mxu1 }
 0x7f2   :  { %2281 = vmatprep.subr.mxu0 %v5899_v48  ;;  %4271 = vmatprep.subr.mxu1 %v6904_v41  ;;  %v6147_v0 = vpop.f32.mrf.mxu0  ;;  %6988 = vst [vmem:[#allocation24_spill] sm:$0xff] %v6164_v11 }
 0x7f3   :  { %2282 = vmatpush1.msra.mxu0 %v5902_v16  ;;  %4272 = vmatpush3.msra.mxu1 %v5962_v24  ;;  %6981 = vst [vmem:[#allocation26_spill] sm:$0xff] %v6147_v0  ;;  %v6990_v0 = vld [vmem:[#allocation22_spill] sm:$0xff] }
 0x7f4   :  { %2283 = vmatprep.subr.mxu0 %v5905_v37  ;;  %4273 = vmatprep.subr.mxu1 %v6904_v41  ;;  %v6151_v5 = vpop.f32.mrf.mxu0  ;;  %v6991_v47 = vsub.s32 0, %v6990_v0  ;;  %v6997_v11 = vsub.s32 1, %v6990_v0 }
 0x7f5   :  { %2284 = vmatpush1.msra.mxu0 %v5908_v62  ;;  %4274 = vmatpush3.msra.mxu1 %v5972_v26  ;;  %6983 = vst [vmem:[#allocation34_spill] sm:$0xff] %v6151_v5 }
 0x7f6   :  { %2285 = vmatprep.subr.mxu0 %v5911_v49  ;;  %4275 = vmatprep.subr.mxu1 %v6904_v41  ;;  %v6155_v59 = vpop.f32.mrf.mxu0  ;;  %v6170_v1 = vrot.slane %v3525_v43, %v6991_v47 }
 0x7f7   :  { %2286 = vmatpush1.msra.mxu0 %v5914_v2  ;;  %4276 = vmatpush3.msra.mxu1 %v5982_v31  ;;  %6985 = vst [vmem:[#allocation43_spill] sm:$0xff] %v6155_v59 }
 0x7f8   :  { %2287 = vmatprep.subr.mxu0 %v5917_v50  ;;  %4277 = vmatprep.subr.mxu1 %v6904_v41  ;;  %v6159_v4 = vpop.f32.mrf.mxu0  ;;  %6992 = vst [vmem:[#allocation36_spill] sm:$0xff] %v6170_v1 }
 0x7f9   :  { %2288 = vmatpush1.msra.mxu0 %v5920_v6  ;;  %4278 = vmatpush3.msra.mxu1 %v5992_v55  ;;  %6987 = vst [vmem:[#allocation23_spill] sm:$0xff] %v6159_v4  ;;  %v1963_v4 = vadd.f32 %v1962_v60, %v6170_v1  ;;  %v6189_v60 = vld [vmem:[%s6811_s5 + $0x1] ss:$0 sm:$0xff] }
 0x7fa   :  { %2289 = vmatprep.subr.mxu0 %v5922_v51  ;;  %4279 = vmatprep.subr.mxu1 %v6904_v41  ;;  %v6166_v3 = vpop.f32.mrf.mxu0 }
 0x7fb   :  { %2290 = vmatpush1.msra.mxu0 %v5924_v52  ;;  %4280 = vmatpush3.msra.mxu1 %v6002_v32  ;;  %6989 = vst [vmem:[#allocation31_spill] sm:$0xff] %v6166_v3 }
 0x7fc   :  { %2291 = vmatprep.subr.mxu0 %v5927_v12  ;;  %4281 = vmatprep.subr.mxu1 %v6904_v41 }
 0x7fd   :  { %2292 = vmatpush1.msra.mxu0 %v5930_v53  ;;  %4282 = vmatpush3.msra.mxu1 %v6012_v36 }
 0x7fe   :  { %2293 = vmatprep.subr.mxu0 %v5935_v13  ;;  %4283 = vmatprep.subr.mxu1 %v6904_v41 }
 0x7ff   :  { %2294 = vmatpush1.msra.mxu0 %v5938_v54  ;;  %4284 = vmatpush3.msra.mxu1 %v6017_v56 }
 0x800   :  { %2295 = vmatprep.subr.mxu0 %v5941_v14  ;;  %4285 = vmatprep.subr.mxu1 %v6904_v41 }
 0x801   :  { %2296 = vmatpush1.msra.mxu0 %v5944_v63  ;;  %4286 = vmatpush3.msra.mxu1 %v6022_v61 }
 0x802   :  { %2297 = vmatprep.subr.mxu0 %v5947_v18  ;;  %4287 = vmatprep.subr.mxu1 %v6904_v41 }
 0x803   :  { %2298 = vmatpush1.msra.mxu0 %v5950_v19  ;;  %4288 = vmatpush3.msra.mxu1 %v6026_v9 }
 0x804   :  { %2299 = vmatprep.subr.mxu0 %v5955_v21  ;;  %4289 = vmatprep.subr.mxu1 %v6904_v41 }
 0x805   :  { %2300 = vmatpush1.msra.mxu0 %v5959_v23  ;;  %4290 = vmatpush3.msra.mxu1 %v6030_v40 }
 0x806   :  { %2301 = vmatprep.subr.mxu0 %v5965_v25  ;;  %4291 = vmatprep.subr.mxu1 %v6904_v41 }
 0x807   :  { %2302 = vmatpush1.msra.mxu0 %v5969_v7  ;;  %4292 = vmatpush3.msra.mxu1 %v6034_v42 }
 0x808   :  { %2303 = vmatprep.subr.mxu0 %v5975_v27  ;;  %4293 = vmatprep.subr.mxu1 %v6904_v41 }
 0x809   :  { %2304 = vmatpush1.msra.mxu0 %v5979_v29  ;;  %4294 = vmatpush3.msra.mxu1 %v6037_v57 }
 0x80a   :  { %2305 = vmatprep.subr.mxu0 %v5985_v38  ;;  %4295 = vmatprep.subr.mxu1 %v6904_v41 }
 0x80b   :  { %2306 = vmatpush1.msra.mxu0 %v5989_v39  ;;  %4296 = vmatpush3.msra.mxu1 %v6040_v44 }
 0x80c   :  { %2307 = vmatprep.subr.mxu0 %v5995_v8  ;;  %4297 = vmatprep.subr.mxu1 %v6904_v41 }
 0x80d   :  { %2308 = vmatpush1.msra.mxu0 %v6967_v22  ;;  %4298 = vmatpush3.msra.mxu1 %v6968_v10 }
 0x80e   :  { %2309 = vmatprep.subr.mxu0 %v6969_v46  ;;  %4299 = vmatprep.subr.mxu1 %v6904_v41 }
 0x80f   :  { %2310 = vmatpush1.msra.mxu0 %v6970_v30  ;;  %2343 = vmatprep.mubr.f32.mxu0 %v6904_v41 }
 0x810   :  { %4300 = vmatpush3.msra.mxu1 %v6971_v33  ;;  %4301 = vmatprep.mubr.msk.f32.mxu1 %vm4864_vm0, %v6904_v41  ;;  %v6183_v33 = vrot.slane %v3525_v43, %v6997_v11 }
 0x811   :  { %2438 = vmatprep.subr.mxu0 %v6972_v35  ;;  %4304 = vmatprep.subr.mxu1 %v6904_v41 }
 0x812   :  { %6998 = vst [vmem:[#allocation46_spill] sm:$0xff] %v6183_v33 }
 0x8ac   :  { %v6172_v5 = vpop.f32.mrf.mxu0  ;;  %v6174_v15 = vpop.f32.mrf.mxu1 }
 0x8ad   :  { %6993 = vst [vmem:[#allocation37_spill] sm:$0xff] %v6172_v5  ;;  %6994 = vst [vmem:[#allocation42_spill] sm:$0xff] %v6174_v15  ;;  %v1965_v5 = vadd.f32 %v1964_v58, %v6183_v33 }
 0x8ae   :  { %v6176_v59 = vpop.f32.mrf.mxu0  ;;  %v6178_v17 = vpop.f32.mrf.mxu1 }
 0x8af   :  { %6995 = vst [vmem:[#allocation22_spill] sm:$0xff] %v6176_v59  ;;  %6996 = vst [vmem:[#allocation45_spill] sm:$0xff] %v6178_v17 }
 0x8b0   :  { %v2180_v28 = vpop.f32.mrf.mxu0  ;;  %v2251_v35 = vpop.f32.mrf.mxu1 }
 0x8b1   :  { %v2255_v3 = vadd.f32 %v2180_v28, %v1963_v4  ;;  %v2271_v11 = vadd.f32 %v6189_v60, %v2251_v35  ;;  %v6999_v28 = vsub.s32 2, %v6990_v0  ;;  %v7002_v35 = vld [vmem:[#allocation21_spill] sm:$0xff]  ;;  %v7007_v0 = vld [vmem:[#allocation30_spill] sm:$0xff] }
 0x8b2   :  { %v4268_v30 = vpop.f32.mrf.mxu1  ;;  %v2182_v46 = vpop.f32.mrf.mxu0 }
 0x8b3   :  { %v2257_v47 = vmul.f32 0.5, %v2255_v3  ;;  %v2256_v15 = vadd.f32 %v2182_v46, %v1965_v5  ;;  %v6194_v30 = vrot.slane %v3525_v43, %v6999_v28  ;;  %v7005_v43 = vld [vmem:[#allocation20_spill] sm:$0xff] }
 0x8b5   :  { %4608 = vtanh.f32 %v2257_v47  ;;  %v2258_v10 = vmul.f32 0.5, %v2256_v15  ;;  %v2076_v58 = vadd.f32 %v2075_v45, %v6194_v30  ;;  %v7006_v45 = vld [vmem:[#allocation36_spill] sm:$0xff] }
 0x8b7   :  { %4610 = vtanh.f32 %v2258_v10 }
 0x8c2   :  { %v4609_v59 = vpop.eup %4608 }
 0x8c3   :  { %v2261_v17 = vmul.f32 0.5, %v4609_v59 }
 0x8c4   :  { %v4611_v10 = vpop.eup %4610 }
 0x8c5   :  { %v2263_v4 = vadd.f32 0.5, %v2261_v17  ;;  %v2262_v5 = vmul.f32 0.5, %v4611_v10  ;;  %v7004_v17 = vld [vmem:[#allocation29_spill] sm:$0xff] }
 0x8c7   :  { %v2272_v3 = vmul.f32 %v2271_v11, %v2263_v4  ;;  %v2264_v15 = vadd.f32 0.5, %v2262_v5  ;;  %v1969_v11 = vadd.f32 %v7007_v0, %v7006_v45  ;;  %v7008_v5 = vld [vmem:[#allocation46_spill] sm:$0xff]  ;;  %v7010_v0 = vld [vmem:[#allocation39_spill] sm:$0xff] }
 0x8c8   :  { %v2081_v45 = vadd.f32 %v7010_v0, %v6194_v30 }
 0x8c9   :  { %v2273_v46 = vadd.f32 %v2272_v3, %v2076_v58  ;;  %v2275_v47 = vsub.f32 1.0, %v2264_v15  ;;  %v2277_v1 = vmul.f32 0.0, %v2264_v15  ;;  %v7009_v15 = vld [vmem:[#allocation41_spill] sm:$0xff] }
 0x8cb   :  { %4612 = vtanh.f32 %v2273_v46 }
 0x8d8   :  { %v4613_v33 = vpop.eup %4612 }
 0x8d9   :  { %v2276_v22 = vmul.f32 %v4613_v33, %v2275_v47  ;;  %v7001_v33 = vld [vmem:[#allocation38_spill] sm:$0xff]  ;;  %v1971_v47 = vadd.f32 %v7009_v15, %v7008_v5 }
 0x8db   :  { %v6197_v59 = vadd.f32 %v2277_v1, %v2276_v22  ;;  %v7000_v22 = vld [vmem:[#allocation19_spill] sm:$0xff] }
 0x8dc   :  { %v7003_v1 = vld [vmem:[#allocation27_spill] sm:$0xff] }
 0x8dd   :  { %2344 = vmatmul.mubr.f32.vlgmr.msra.gmra.mxu0 %v6197_v59  ;;  %4302 = vmatmul.mubr.f32.vlgmr.msra.gmra.mxu1 %v6197_v59 }
 0x8de   :  { %2439 = vmatpush1.msra.mxu0 %v5896_v34  ;;  %4305 = vmatpush3.msra.mxu1 %v5952_v20 }
 0x8df   :  { %2440 = vmatprep.subr.mxu0 %v5899_v48  ;;  %4306 = vmatprep.subr.mxu1 %v6904_v41 }
 0x8e0   :  { %2441 = vmatpush1.msra.mxu0 %v5902_v16  ;;  %4307 = vmatpush3.msra.mxu1 %v5962_v24 }
 0x8e1   :  { %2442 = vmatprep.subr.mxu0 %v5905_v37  ;;  %4308 = vmatprep.subr.mxu1 %v6904_v41 }
 0x8e2   :  { %2443 = vmatpush1.msra.mxu0 %v5908_v62  ;;  %4309 = vmatpush3.msra.mxu1 %v5972_v26 }
 0x8e3   :  { %2444 = vmatprep.subr.mxu0 %v5911_v49  ;;  %4310 = vmatprep.subr.mxu1 %v6904_v41 }
 0x8e4   :  { %2445 = vmatpush1.msra.mxu0 %v5914_v2  ;;  %4311 = vmatpush3.msra.mxu1 %v5982_v31 }
 0x8e5   :  { %2446 = vmatprep.subr.mxu0 %v5917_v50  ;;  %4312 = vmatprep.subr.mxu1 %v6904_v41 }
 0x8e6   :  { %2447 = vmatpush1.msra.mxu0 %v5920_v6  ;;  %4313 = vmatpush3.msra.mxu1 %v5992_v55 }
 0x8e7   :  { %2448 = vmatprep.subr.mxu0 %v5922_v51  ;;  %4314 = vmatprep.subr.mxu1 %v6904_v41 }
 0x8e8   :  { %2449 = vmatpush1.msra.mxu0 %v5924_v52  ;;  %4315 = vmatpush3.msra.mxu1 %v6002_v32 }
 0x8e9   :  { %2450 = vmatprep.subr.mxu0 %v5927_v12  ;;  %4316 = vmatprep.subr.mxu1 %v6904_v41 }
 0x8ea   :  { %2451 = vmatpush1.msra.mxu0 %v5930_v53  ;;  %4317 = vmatpush3.msra.mxu1 %v6012_v36 }
 0x8eb   :  { %2452 = vmatprep.subr.mxu0 %v5935_v13  ;;  %4318 = vmatprep.subr.mxu1 %v6904_v41 }
 0x8ec   :  { %2453 = vmatpush1.msra.mxu0 %v5938_v54  ;;  %4319 = vmatpush3.msra.mxu1 %v6017_v56 }
 0x8ed   :  { %2454 = vmatprep.subr.mxu0 %v5941_v14  ;;  %4320 = vmatprep.subr.mxu1 %v6904_v41 }
 0x8ee   :  { %2455 = vmatpush1.msra.mxu0 %v5944_v63  ;;  %4321 = vmatpush3.msra.mxu1 %v6022_v61 }
 0x8ef   :  { %2456 = vmatprep.subr.mxu0 %v5947_v18  ;;  %4322 = vmatprep.subr.mxu1 %v6904_v41 }
 0x8f0   :  { %2457 = vmatpush1.msra.mxu0 %v5950_v19  ;;  %4323 = vmatpush3.msra.mxu1 %v6026_v9 }
 0x8f1   :  { %2458 = vmatprep.subr.mxu0 %v5955_v21  ;;  %4324 = vmatprep.subr.mxu1 %v6904_v41 }
 0x8f2   :  { %2459 = vmatpush1.msra.mxu0 %v5959_v23  ;;  %4325 = vmatpush3.msra.mxu1 %v6030_v40 }
 0x8f3   :  { %2460 = vmatprep.subr.mxu0 %v5965_v25  ;;  %4326 = vmatprep.subr.mxu1 %v6904_v41 }
 0x8f4   :  { %2461 = vmatpush1.msra.mxu0 %v5969_v7  ;;  %4327 = vmatpush3.msra.mxu1 %v6034_v42 }
 0x8f5   :  { %2462 = vmatprep.subr.mxu0 %v5975_v27  ;;  %4328 = vmatprep.subr.mxu1 %v6904_v41 }
 0x8f6   :  { %2463 = vmatpush1.msra.mxu0 %v5979_v29  ;;  %4329 = vmatpush3.msra.mxu1 %v6037_v57 }
 0x8f7   :  { %2464 = vmatprep.subr.mxu0 %v5985_v38  ;;  %4330 = vmatprep.subr.mxu1 %v6904_v41 }
 0x8f8   :  { %2465 = vmatpush1.msra.mxu0 %v5989_v39  ;;  %4331 = vmatpush3.msra.mxu1 %v6040_v44 }
 0x8f9   :  { %2466 = vmatprep.subr.mxu0 %v5995_v8  ;;  %4332 = vmatprep.subr.mxu1 %v6904_v41 }
 0x8fa   :  { %2467 = vmatpush1.msra.mxu0 %v7000_v22  ;;  %4333 = vmatpush3.msra.mxu1 %v7001_v33 }
 0x8fb   :  { %2468 = vmatprep.subr.mxu0 %v7002_v35  ;;  %4334 = vmatprep.subr.mxu1 %v6904_v41 }
 0x8fc   :  { %2469 = vmatpush1.msra.mxu0 %v7003_v1  ;;  %2502 = vmatprep.mubr.f32.mxu0 %v6904_v41 }
 0x8fd   :  { %4335 = vmatpush3.msra.mxu1 %v7004_v17  ;;  %4336 = vmatprep.mubr.msk.f32.mxu1 %vm4864_vm0, %v6904_v41 }
 0x8fe   :  { %2597 = vmatprep.subr.mxu0 %v7005_v43  ;;  %4339 = vmatprep.subr.mxu1 %v6904_v41 }
 0x99d   :  { %v2345_v28 = vpop.f32.mrf.mxu0  ;;  %v2416_v4 = vpop.f32.mrf.mxu1 }
 0x99e   :  { %v2420_v58 = vadd.f32 %v2345_v28, %v1969_v11  ;;  %v2430_v22 = vadd.f32 %v6189_v60, %v2416_v4  ;;  %v7019_v4 = vld [vmem:[#allocation36_spill] sm:$0xff] }
 0x99f   :  { %v4303_v3 = vpop.f32.mrf.mxu1  ;;  %v2347_v10 = vpop.f32.mrf.mxu0 }
 0x9a0   :  { %v2422_v46 = vmul.f32 0.5, %v2420_v58  ;;  %v2421_v17 = vadd.f32 %v2347_v10, %v1971_v47  ;;  %v7020_v10 = vld [vmem:[#allocation32_spill] sm:$0xff] }
 0x9a1   :  { %v1975_v47 = vadd.f32 %v7020_v10, %v7019_v4  ;;  %v7022_v10 = vld [vmem:[#allocation35_spill] sm:$0xff] }
 0x9a2   :  { %4614 = vtanh.f32 %v2422_v46  ;;  %v2423_v1 = vmul.f32 0.5, %v2421_v17  ;;  %v2086_v4 = vadd.f32 %v7022_v10, %v6194_v30  ;;  %v6453_v10 = vld [vmem:[#allocation9 + $0x2e0] sm:$0xff] }
 0x9a4   :  { %4616 = vtanh.f32 %v2423_v1 }
 0x9af   :  { %v4615_v35 = vpop.eup %4614 }
 0x9b0   :  { %v2426_v43 = vmul.f32 0.5, %v4615_v35  ;;  %v7016_v35 = vld [vmem:[#allocation27_spill] sm:$0xff] }
 0x9b1   :  { %v4617_v28 = vpop.eup %4616 }
 0x9b2   :  { %v2428_v33 = vadd.f32 0.5, %v2426_v43  ;;  %v2427_v58 = vmul.f32 0.5, %v4617_v28  ;;  %v7017_v43 = vld [vmem:[#allocation29_spill] sm:$0xff] }
 0x9b4   :  { %v2431_v8 = vmul.f32 %v2430_v22, %v2428_v33  ;;  %v2429_v3 = vadd.f32 0.5, %v2427_v58  ;;  %v7014_v22 = vld [vmem:[#allocation38_spill] sm:$0xff]  ;;  %v7015_v33 = vld [vmem:[#allocation21_spill] sm:$0xff] }
 0x9b6   :  { %v2432_v11 = vadd.f32 %v2431_v8, %v2081_v45  ;;  %v2434_v44 = vsub.f32 1.0, %v2429_v3  ;;  %v2436_v46 = vmul.f32 %v2429_v3, %v6197_v59  ;;  %v7011_v8 = vld [vmem:[#allocation28_spill] sm:$0xff]  ;;  %v7013_v59 = vld [vmem:[#allocation19_spill] sm:$0xff] }
 0x9b7   :  { %v7018_v45 = vld [vmem:[#allocation20_spill] sm:$0xff] }
 0x9b8   :  { %4618 = vtanh.f32 %v2432_v11 }
 0x9c5   :  { %v4619_v15 = vpop.eup %4618 }
 0x9c6   :  { %v2435_v17 = vmul.f32 %v4619_v15, %v2434_v44  ;;  %v7012_v44 = vld [vmem:[#allocation18_spill] sm:$0xff] }
 0x9c8   :  { %v6276_v1 = vadd.f32 %v2436_v46, %v2435_v17  ;;  %v7021_v46 = vld [vmem:[#allocation33_spill] sm:$0xff] }
 0x9c9   :  { %v1977_v17 = vadd.f32 %v7021_v46, %v7008_v5 }
 0x9ca   :  { %2503 = vmatmul.mubr.f32.vlgmr.msra.gmra.mxu0 %v6276_v1  ;;  %4337 = vmatmul.mubr.f32.vlgmr.msra.gmra.mxu1 %v6276_v1 }
 0x9cb   :  { %2598 = vmatpush1.msra.mxu0 %v5896_v34  ;;  %4340 = vmatpush3.msra.mxu1 %v5952_v20 }
 0x9cc   :  { %2599 = vmatprep.subr.mxu0 %v5899_v48  ;;  %4341 = vmatprep.subr.mxu1 %v6904_v41 }
 0x9cd   :  { %2600 = vmatpush1.msra.mxu0 %v5902_v16  ;;  %4342 = vmatpush3.msra.mxu1 %v5962_v24 }
 0x9ce   :  { %2601 = vmatprep.subr.mxu0 %v5905_v37  ;;  %4343 = vmatprep.subr.mxu1 %v6904_v41 }
 0x9cf   :  { %2602 = vmatpush1.msra.mxu0 %v5908_v62  ;;  %4344 = vmatpush3.msra.mxu1 %v5972_v26 }
 0x9d0   :  { %2603 = vmatprep.subr.mxu0 %v5911_v49  ;;  %4345 = vmatprep.subr.mxu1 %v6904_v41 }
 0x9d1   :  { %2604 = vmatpush1.msra.mxu0 %v5914_v2  ;;  %4346 = vmatpush3.msra.mxu1 %v5982_v31 }
 0x9d2   :  { %2605 = vmatprep.subr.mxu0 %v5917_v50  ;;  %4347 = vmatprep.subr.mxu1 %v6904_v41 }
 0x9d3   :  { %2606 = vmatpush1.msra.mxu0 %v5920_v6  ;;  %4348 = vmatpush3.msra.mxu1 %v5992_v55 }
 0x9d4   :  { %2607 = vmatprep.subr.mxu0 %v5922_v51  ;;  %4349 = vmatprep.subr.mxu1 %v6904_v41 }
 0x9d5   :  { %2608 = vmatpush1.msra.mxu0 %v5924_v52  ;;  %4350 = vmatpush3.msra.mxu1 %v6002_v32 }
 0x9d6   :  { %2609 = vmatprep.subr.mxu0 %v5927_v12  ;;  %4351 = vmatprep.subr.mxu1 %v6904_v41 }
 0x9d7   :  { %2610 = vmatpush1.msra.mxu0 %v5930_v53  ;;  %4352 = vmatpush3.msra.mxu1 %v6012_v36 }
 0x9d8   :  { %2611 = vmatprep.subr.mxu0 %v5935_v13  ;;  %4353 = vmatprep.subr.mxu1 %v6904_v41 }
 0x9d9   :  { %2612 = vmatpush1.msra.mxu0 %v5938_v54  ;;  %4354 = vmatpush3.msra.mxu1 %v6017_v56 }
 0x9da   :  { %2613 = vmatprep.subr.mxu0 %v5941_v14  ;;  %4355 = vmatprep.subr.mxu1 %v6904_v41 }
 0x9db   :  { %2614 = vmatpush1.msra.mxu0 %v5944_v63  ;;  %4356 = vmatpush3.msra.mxu1 %v6022_v61 }
 0x9dc   :  { %2615 = vmatprep.subr.mxu0 %v5947_v18  ;;  %4357 = vmatprep.subr.mxu1 %v6904_v41 }
 0x9dd   :  { %2616 = vmatpush1.msra.mxu0 %v5950_v19  ;;  %4358 = vmatpush3.msra.mxu1 %v6026_v9 }
 0x9de   :  { %2617 = vmatprep.subr.mxu0 %v5955_v21  ;;  %4359 = vmatprep.subr.mxu1 %v6904_v41 }
 0x9df   :  { %2618 = vmatpush1.msra.mxu0 %v5959_v23  ;;  %4360 = vmatpush3.msra.mxu1 %v6030_v40 }
 0x9e0   :  { %2619 = vmatprep.subr.mxu0 %v5965_v25  ;;  %4361 = vmatprep.subr.mxu1 %v6904_v41 }
 0x9e1   :  { %2620 = vmatpush1.msra.mxu0 %v5969_v7  ;;  %4362 = vmatpush3.msra.mxu1 %v6034_v42 }
 0x9e2   :  { %2621 = vmatprep.subr.mxu0 %v5975_v27  ;;  %4363 = vmatprep.subr.mxu1 %v6904_v41 }
 0x9e3   :  { %2622 = vmatpush1.msra.mxu0 %v5979_v29  ;;  %4364 = vmatpush3.msra.mxu1 %v6037_v57 }
 0x9e4   :  { %2623 = vmatprep.subr.mxu0 %v5985_v38  ;;  %4365 = vmatprep.subr.mxu1 %v6904_v41 }
 0x9e5   :  { %2624 = vmatpush1.msra.mxu0 %v5989_v39  ;;  %4366 = vmatpush3.msra.mxu1 %v7011_v8 }
 0x9e6   :  { %2625 = vmatprep.subr.mxu0 %v7012_v44  ;;  %4367 = vmatprep.subr.mxu1 %v6904_v41 }
 0x9e7   :  { %2626 = vmatpush1.msra.mxu0 %v7013_v59  ;;  %4368 = vmatpush3.msra.mxu1 %v7014_v22 }
 0x9e8   :  { %2627 = vmatprep.subr.mxu0 %v7015_v33  ;;  %4369 = vmatprep.subr.mxu1 %v6904_v41 }
 0x9e9   :  { %2628 = vmatpush1.msra.mxu0 %v7016_v35  ;;  %2661 = vmatprep.mubr.f32.mxu0 %v6904_v41 }
 0x9ea   :  { %4370 = vmatpush3.msra.mxu1 %v7017_v43  ;;  %4371 = vmatprep.mubr.msk.f32.mxu1 %vm4864_vm0, %v6904_v41 }
 0x9eb   :  { %2756 = vmatprep.subr.mxu0 %v7018_v45  ;;  %4374 = vmatprep.subr.mxu1 %v6904_v41 }
 0xa8a   :  { %v2504_v0 = vpop.f32.mrf.mxu0  ;;  %v2575_v11 = vpop.f32.mrf.mxu1 }
 0xa8b   :  { %v2579_v28 = vadd.f32 %v2504_v0, %v1975_v47  ;;  %v2589_v59 = vadd.f32 %v6189_v60, %v2575_v11  ;;  %v6440_v11 = vld [vmem:[#allocation9 + $0x2e8] sm:$0xff] }
 0xa8c   :  { %v4338_v58 = vpop.f32.mrf.mxu1  ;;  %v2506_v15 = vpop.f32.mrf.mxu0 }
 0xa8d   :  { %v2581_v3 = vmul.f32 0.5, %v2579_v28  ;;  %v2580_v43 = vadd.f32 %v2506_v15, %v1977_v17  ;;  %v6443_v15 = vld [vmem:[#allocation9 + $0x2f8] sm:$0xff] }
 0xa8e   :  { %v6446_v17 = vld [vmem:[#allocation9 + $0x2d8] sm:$0xff] }
 0xa8f   :  { %4620 = vtanh.f32 %v2581_v3  ;;  %v2582_v35 = vmul.f32 0.5, %v2580_v43 }
 0xa91   :  { %4622 = vtanh.f32 %v2582_v35 }
 0xa9c   :  { %v4621_v33 = vpop.eup %4620 }
 0xa9d   :  { %v2585_v45 = vmul.f32 0.5, %v4621_v33 }
 0xa9e   :  { %v4623_v0 = vpop.eup %4622 }
 0xa9f   :  { %v2587_v22 = vadd.f32 0.5, %v2585_v45  ;;  %v2586_v28 = vmul.f32 0.5, %v4623_v0  ;;  %v6450_v45 = vld [vmem:[#allocation9 + $0x2d0] sm:$0xff]  ;;  %v6460_v0 = vld [vmem:[#allocation9 + $0x2b8] sm:$0xff] }
 0xaa1   :  { %v2590_v44 = vmul.f32 %v2589_v59, %v2587_v22  ;;  %v2588_v58 = vadd.f32 0.5, %v2586_v28  ;;  %v6463_v28 = vld [vmem:[#allocation9 + $0x2c8] sm:$0xff] }
 0xaa3   :  { %v2591_v47 = vadd.f32 %v2590_v44, %v2086_v4  ;;  %v2593_v8 = vsub.f32 1.0, %v2588_v58  ;;  %v2595_v3 = vmul.f32 %v2588_v58, %v6276_v1  ;;  %v6466_v58 = vld [vmem:[#allocation9 + $0x2a8] sm:$0xff] }
 0xaa5   :  { %4624 = vtanh.f32 %v2591_v47  ;;  %v6456_v47 = vld [vmem:[#allocation9 + $0x2c0] sm:$0xff] }
 0xab2   :  { %v4625_v46 = vpop.eup %4624 }
 0xab3   :  { %v2594_v43 = vmul.f32 %v4625_v46, %v2593_v8  ;;  %v6470_v46 = vld [vmem:[#allocation9 + $0x2a0] sm:$0xff] }
 0xab5   :  { %v6355_v35 = vadd.f32 %v2595_v3, %v2594_v43  ;;  %v6474_v3 = vld [vmem:[#allocation9 + $0x290] sm:$0xff]  ;;  %v6478_v43 = vld [vmem:[#allocation9 + $0x288] sm:$0xff] }
 0xab7   :  { %2662 = vmatmul.mubr.f32.vlgmr.msra.gmra.mxu0 %v6355_v35  ;;  %4372 = vmatmul.mubr.f32.vlgmr.msra.gmra.mxu1 %v6355_v35 }
 0xab8   :  { %2757 = vmatpush1.msra.mxu0 %v5896_v34  ;;  %4375 = vmatpush3.msra.mxu1 %v5952_v20  ;;  %v7023_v34 = vld [vmem:[#allocation28_spill] sm:$0xff] }
 0xab9   :  { %2758 = vmatprep.subr.mxu0 %v5899_v48  ;;  %4376 = vmatprep.subr.mxu1 %v6904_v41  ;;  %v7024_v48 = vld [vmem:[#allocation18_spill] sm:$0xff] }
 0xaba   :  { %2759 = vmatpush1.msra.mxu0 %v5902_v16  ;;  %4377 = vmatpush3.msra.mxu1 %v5962_v24  ;;  %v7025_v16 = vld [vmem:[#allocation19_spill] sm:$0xff] }
 0xabb   :  { %2760 = vmatprep.subr.mxu0 %v5905_v37  ;;  %4378 = vmatprep.subr.mxu1 %v6904_v41  ;;  %v7026_v37 = vld [vmem:[#allocation38_spill] sm:$0xff] }
 0xabc   :  { %2761 = vmatpush1.msra.mxu0 %v5908_v62  ;;  %4379 = vmatpush3.msra.mxu1 %v5972_v26  ;;  %v7027_v62 = vld [vmem:[#allocation21_spill] sm:$0xff] }
 0xabd   :  { %2762 = vmatprep.subr.mxu0 %v5911_v49  ;;  %4380 = vmatprep.subr.mxu1 %v6904_v41  ;;  %v7028_v49 = vld [vmem:[#allocation27_spill] sm:$0xff]  ;;  %v7033_v26 = vld [vmem:[#allocation17_spill] sm:$0xff] }
 0xabe   :  { %2763 = vmatpush1.msra.mxu0 %v5914_v2  ;;  %4381 = vmatpush3.msra.mxu1 %v5982_v31  ;;  %v7029_v2 = vld [vmem:[#allocation29_spill] sm:$0xff] }
 0xabf   :  { %2764 = vmatprep.subr.mxu0 %v5917_v50  ;;  %4382 = vmatprep.subr.mxu1 %v6904_v41  ;;  %v6424_v50 = vld [vmem:[#allocation9 + $0x2f0] sm:$0xff] }
 0xac0   :  { %2765 = vmatpush1.msra.mxu0 %v5920_v6  ;;  %4383 = vmatpush3.msra.mxu1 %v5992_v55  ;;  %v7030_v6 = vld [vmem:[#allocation36_spill] sm:$0xff] }
 0xac1   :  { %2766 = vmatprep.subr.mxu0 %v5922_v51  ;;  %4384 = vmatprep.subr.mxu1 %v6904_v41  ;;  %v7031_v51 = vld [vmem:[#allocation40_spill] sm:$0xff] }
 0xac2   :  { %2767 = vmatpush1.msra.mxu0 %v5924_v52  ;;  %4385 = vmatpush3.msra.mxu1 %v6002_v32  ;;  %v1981_v52 = vadd.f32 %v7031_v51, %v7030_v6  ;;  %v6518_v51 = vld [vmem:[#allocation9 + $0x210] sm:$0xff] }
 0xac3   :  { %2768 = vmatprep.subr.mxu0 %v5927_v12  ;;  %4386 = vmatprep.subr.mxu1 %v6904_v41 }
 0xac4   :  { %2769 = vmatpush1.msra.mxu0 %v5930_v53  ;;  %4387 = vmatpush3.msra.mxu1 %v6012_v36 }
 0xac5   :  { %2770 = vmatprep.subr.mxu0 %v5935_v13  ;;  %4388 = vmatprep.subr.mxu1 %v6904_v41 }
 0xac6   :  { %2771 = vmatpush1.msra.mxu0 %v5938_v54  ;;  %4389 = vmatpush3.msra.mxu1 %v6017_v56 }
 0xac7   :  { %2772 = vmatprep.subr.mxu0 %v5941_v14  ;;  %4390 = vmatprep.subr.mxu1 %v6904_v41 }
 0xac8   :  { %2773 = vmatpush1.msra.mxu0 %v5944_v63  ;;  %4391 = vmatpush3.msra.mxu1 %v6022_v61 }
 0xac9   :  { %2774 = vmatprep.subr.mxu0 %v5947_v18  ;;  %4392 = vmatprep.subr.mxu1 %v6904_v41  ;;  %v7032_v18 = vld [vmem:[#allocation16_spill] sm:$0xff] }
 0xaca   :  { %2775 = vmatpush1.msra.mxu0 %v5950_v19  ;;  %4393 = vmatpush3.msra.mxu1 %v6026_v9  ;;  %v1983_v19 = vadd.f32 %v7032_v18, %v7008_v5 }
 0xacb   :  { %2776 = vmatprep.subr.mxu0 %v5955_v21  ;;  %4394 = vmatprep.subr.mxu1 %v6904_v41 }
 0xacc   :  { %2777 = vmatpush1.msra.mxu0 %v5959_v23  ;;  %4395 = vmatpush3.msra.mxu1 %v6030_v40 }
 0xacd   :  { %2778 = vmatprep.subr.mxu0 %v5965_v25  ;;  %4396 = vmatprep.subr.mxu1 %v6904_v41 }
 0xace   :  { %2779 = vmatpush1.msra.mxu0 %v5969_v7  ;;  %4397 = vmatpush3.msra.mxu1 %v6034_v42 }
 0xacf   :  { %2780 = vmatprep.subr.mxu0 %v5975_v27  ;;  %4398 = vmatprep.subr.mxu1 %v6904_v41  ;;  %v2091_v27 = vadd.f32 %v7033_v26, %v6194_v30 }
 0xad0   :  { %2781 = vmatpush1.msra.mxu0 %v5979_v29  ;;  %4399 = vmatpush3.msra.mxu1 %v6037_v57 }
 0xad1   :  { %2782 = vmatprep.subr.mxu0 %v5985_v38  ;;  %4400 = vmatprep.subr.mxu1 %v6904_v41 }
 0xad2   :  { %2783 = vmatpush1.msra.mxu0 %v5989_v39  ;;  %4401 = vmatpush3.msra.mxu1 %v7023_v34 }
 0xad3   :  { %2784 = vmatprep.subr.mxu0 %v7024_v48  ;;  %4402 = vmatprep.subr.mxu1 %v6904_v41  ;;  %v6486_v48 = vld [vmem:[#allocation9 + $0x270] sm:$0xff] }
 0xad4   :  { %2785 = vmatpush1.msra.mxu0 %v7025_v16  ;;  %4403 = vmatpush3.msra.mxu1 %v7026_v37  ;;  %v6494_v16 = vld [vmem:[#allocation9 + $0x258] sm:$0xff] }
 0xad5   :  { %2786 = vmatprep.subr.mxu0 %v7027_v62  ;;  %4404 = vmatprep.subr.mxu1 %v6904_v41  ;;  %v6502_v62 = vld [vmem:[#allocation9 + $0x240] sm:$0xff] }
 0xad6   :  { %2787 = vmatpush1.msra.mxu0 %v7028_v49  ;;  %2820 = vmatprep.mubr.f32.mxu0 %v6904_v41  ;;  %v6510_v49 = vld [vmem:[#allocation9 + $0x228] sm:$0xff] }
 0xad7   :  { %4405 = vmatpush3.msra.mxu1 %v7029_v2  ;;  %4406 = vmatprep.mubr.msk.f32.mxu1 %vm4864_vm0, %v6904_v41 }
 0xad8   :  { %2915 = vmatprep.subr.mxu0 %v6424_v50  ;;  %4409 = vmatprep.subr.mxu1 %v6904_v41 }
 0xb77   :  { %v2663_v12 = vpop.f32.mrf.mxu0  ;;  %v2734_v53 = vpop.f32.mrf.mxu1 }
 0xb78   :  { %v2738_v13 = vadd.f32 %v2663_v12, %v1981_v52  ;;  %v2748_v7 = vadd.f32 %v6189_v60, %v2734_v53  ;;  %v6526_v52 = vld [vmem:[#allocation9 + $0x1f8] sm:$0xff]  ;;  %v6534_v12 = vld [vmem:[#allocation9 + $0x1e0] sm:$0xff]  ;;  %v6542_v53 = vld [vmem:[#allocation9 + $0x1c8] sm:$0xff] }
 0xb79   :  { %v4373_v54 = vpop.f32.mrf.mxu1  ;;  %v2665_v63 = vpop.f32.mrf.mxu0 }
 0xb7a   :  { %v2740_v14 = vmul.f32 0.5, %v2738_v13  ;;  %v2739_v20 = vadd.f32 %v2665_v63, %v1983_v19  ;;  %v6550_v13 = vld [vmem:[#allocation9 + $0x1b0] sm:$0xff]  ;;  %v6558_v54 = vld [vmem:[#allocation9 + $0x198] sm:$0xff] }
 0xb7b   :  { %7035 = vst [vmem:[#allocation46_spill] sm:$0xff] %v6558_v54 }
 0xb7c   :  { %4626 = vtanh.f32 %v2740_v14  ;;  %v2741_v21 = vmul.f32 0.5, %v2739_v20  ;;  %v6566_v14 = vld [vmem:[#allocation9 + $0x180] sm:$0xff] }
 0xb7d   :  { %7037 = vst [vmem:[#allocation39_spill] sm:$0xff] %v6566_v14 }
 0xb7e   :  { %4628 = vtanh.f32 %v2741_v21 }
 0xb89   :  { %v4627_v23 = vpop.eup %4626 }
 0xb8a   :  { %v2744_v24 = vmul.f32 0.5, %v4627_v23 }
 0xb8b   :  { %v4629_v39 = vpop.eup %4628 }
 0xb8c   :  { %v2746_v25 = vadd.f32 0.5, %v2744_v24  ;;  %v2745_v1 = vmul.f32 0.5, %v4629_v39  ;;  %v7039_v24 = vld [vmem:[#allocation26_spill] sm:$0xff]  ;;  %v7040_v39 = vld [vmem:[#allocation24_spill] sm:$0xff] }
 0xb8e   :  { %v2749_v29 = vmul.f32 %v2748_v7, %v2746_v25  ;;  %v2747_v8 = vadd.f32 0.5, %v2745_v1  ;;  %v1989_v25 = vadd.f32 %v7039_v24, %v7008_v5  ;;  %v2096_v1 = vadd.f32 %v7040_v39, %v6194_v30  ;;  %v6624_v24 = vld [vmem:[#allocation9 + $0x250] sm:$0xff] }
 0xb8f   :  { %v6673_v39 = vld [vmem:[#allocation9 + $0x190] sm:$0xff] }
 0xb90   :  { %v2750_v38 = vadd.f32 %v2749_v29, %v2091_v27  ;;  %v2752_v44 = vsub.f32 1.0, %v2747_v8  ;;  %v2754_v22 = vmul.f32 %v2747_v8, %v6355_v35  ;;  %v6482_v35 = vld [vmem:[#allocation9 + $0x278] sm:$0xff]  ;;  %7043 = vst [vmem:[#allocation33_spill] sm:$0xff] %v6673_v39 }
 0xb92   :  { %4630 = vtanh.f32 %v2750_v38 }
 0xb9f   :  { %v4631_v59 = vpop.eup %4630 }
 0xba0   :  { %v2753_v33 = vmul.f32 %v4631_v59, %v2752_v44 }
 0xba2   :  { %v6436_v4 = vadd.f32 %v2754_v22, %v2753_v33 }
 0xba4   :  { %2821 = vmatmul.mubr.f32.vlgmr.msra.gmra.mxu0 %v6436_v4  ;;  %4407 = vmatmul.mubr.f32.vlgmr.msra.gmra.mxu1 %v6436_v4 }
 0xba5   :  { %2916 = vmatpush1.msra.mxu0 %v6440_v11  ;;  %4410 = vmatpush3.msra.mxu1 %v6443_v15 }
 0xba6   :  { %2917 = vmatprep.subr.mxu0 %v6446_v17  ;;  %4411 = vmatprep.subr.mxu1 %v6904_v41 }
 0xba7   :  { %2918 = vmatpush1.msra.mxu0 %v6450_v45  ;;  %4412 = vmatpush3.msra.mxu1 %v6453_v10 }
 0xba8   :  { %2919 = vmatprep.subr.mxu0 %v6456_v47  ;;  %4413 = vmatprep.subr.mxu1 %v6904_v41 }
 0xba9   :  { %2920 = vmatpush1.msra.mxu0 %v6460_v0  ;;  %4414 = vmatpush3.msra.mxu1 %v6463_v28 }
 0xbaa   :  { %2921 = vmatprep.subr.mxu0 %v6466_v58  ;;  %4415 = vmatprep.subr.mxu1 %v6904_v41 }
 0xbab   :  { %2922 = vmatpush1.msra.mxu0 %v6470_v46  ;;  %4416 = vmatpush3.msra.mxu1 %v5982_v31  ;;  %v6490_v31 = vld [vmem:[#allocation9 + $0x260] sm:$0xff] }
 0xbac   :  { %2923 = vmatprep.subr.mxu0 %v6474_v3  ;;  %4417 = vmatprep.subr.mxu1 %v6904_v41 }
 0xbad   :  { %2924 = vmatpush1.msra.mxu0 %v6478_v43  ;;  %4418 = vmatpush3.msra.mxu1 %v5992_v55  ;;  %v6498_v55 = vld [vmem:[#allocation9 + $0x248] sm:$0xff] }
 0xbae   :  { %2925 = vmatprep.subr.mxu0 %v6482_v35  ;;  %4419 = vmatprep.subr.mxu1 %v6904_v41 }
 0xbaf   :  { %2926 = vmatpush1.msra.mxu0 %v6486_v48  ;;  %4420 = vmatpush3.msra.mxu1 %v6002_v32  ;;  %v6506_v32 = vld [vmem:[#allocation9 + $0x230] sm:$0xff] }
 0xbb0   :  { %2927 = vmatprep.subr.mxu0 %v6490_v31  ;;  %4421 = vmatprep.subr.mxu1 %v6904_v41 }
 0xbb1   :  { %2928 = vmatpush1.msra.mxu0 %v6494_v16  ;;  %4422 = vmatpush3.msra.mxu1 %v6012_v36  ;;  %v6514_v36 = vld [vmem:[#allocation9 + $0x218] sm:$0xff] }
 0xbb2   :  { %2929 = vmatprep.subr.mxu0 %v6498_v55  ;;  %4423 = vmatprep.subr.mxu1 %v6904_v41 }
 0xbb3   :  { %2930 = vmatpush1.msra.mxu0 %v6502_v62  ;;  %4424 = vmatpush3.msra.mxu1 %v6017_v56  ;;  %v6522_v56 = vld [vmem:[#allocation9 + $0x200] sm:$0xff] }
 0xbb4   :  { %2931 = vmatprep.subr.mxu0 %v6506_v32  ;;  %4425 = vmatprep.subr.mxu1 %v6904_v41 }
 0xbb5   :  { %2932 = vmatpush1.msra.mxu0 %v6510_v49  ;;  %4426 = vmatpush3.msra.mxu1 %v6022_v61  ;;  %v6530_v61 = vld [vmem:[#allocation9 + $0x1e8] sm:$0xff] }
 0xbb6   :  { %2933 = vmatprep.subr.mxu0 %v6514_v36  ;;  %4427 = vmatprep.subr.mxu1 %v6904_v41 }
 0xbb7   :  { %2934 = vmatpush1.msra.mxu0 %v6518_v51  ;;  %4428 = vmatpush3.msra.mxu1 %v6026_v9  ;;  %v6538_v9 = vld [vmem:[#allocation9 + $0x1d0] sm:$0xff] }
 0xbb8   :  { %2935 = vmatprep.subr.mxu0 %v6522_v56  ;;  %4429 = vmatprep.subr.mxu1 %v6904_v41 }
 0xbb9   :  { %2936 = vmatpush1.msra.mxu0 %v6526_v52  ;;  %4430 = vmatpush3.msra.mxu1 %v6030_v40  ;;  %v6546_v40 = vld [vmem:[#allocation9 + $0x1b8] sm:$0xff] }
 0xbba   :  { %2937 = vmatprep.subr.mxu0 %v6530_v61  ;;  %4431 = vmatprep.subr.mxu1 %v6904_v41 }
 0xbbb   :  { %2938 = vmatpush1.msra.mxu0 %v6534_v12  ;;  %4432 = vmatpush3.msra.mxu1 %v6034_v42  ;;  %v6554_v42 = vld [vmem:[#allocation9 + $0x1a0] sm:$0xff] }
 0xbbc   :  { %2939 = vmatprep.subr.mxu0 %v6538_v9  ;;  %4433 = vmatprep.subr.mxu1 %v6904_v41  ;;  %7034 = vst [vmem:[#allocation30_spill] sm:$0xff] %v6554_v42 }
 0xbbd   :  { %2940 = vmatpush1.msra.mxu0 %v6542_v53  ;;  %4434 = vmatpush3.msra.mxu1 %v6037_v57  ;;  %v6562_v57 = vld [vmem:[#allocation9 + $0x188] sm:$0xff] }
 0xbbe   :  { %2941 = vmatprep.subr.mxu0 %v6546_v40  ;;  %4435 = vmatprep.subr.mxu1 %v6904_v41  ;;  %7036 = vst [vmem:[#allocation41_spill] sm:$0xff] %v6562_v57 }
 0xbbf   :  { %2942 = vmatpush1.msra.mxu0 %v6550_v13  ;;  %4436 = vmatpush3.msra.mxu1 %v7023_v34  ;;  %v7038_v34 = vld [vmem:[#allocation25_spill] sm:$0xff] }
 0xbc0   :  { %2943 = vmatprep.subr.mxu0 %v6554_v42  ;;  %4437 = vmatprep.subr.mxu1 %v6904_v41 }
 0xbc1   :  { %2944 = vmatpush1.msra.mxu0 %v6558_v54  ;;  %4438 = vmatpush3.msra.mxu1 %v7026_v37  ;;  %v1987_v37 = vadd.f32 %v7038_v34, %v7030_v6 }
 0xbc2   :  { %2945 = vmatprep.subr.mxu0 %v6562_v57  ;;  %4439 = vmatprep.subr.mxu1 %v6904_v41 }
 0xbc3   :  { %2946 = vmatpush1.msra.mxu0 %v6566_v14  ;;  %2979 = vmatprep.mubr.f32.mxu0 %v6904_v41 }
 0xbc4   :  { %4440 = vmatpush3.msra.mxu1 %v7029_v2  ;;  %4441 = vmatprep.mubr.msk.f32.mxu1 %vm4864_vm0, %v6904_v41 }
 0xbc5   :  { %3074 = vmatprep.subr.mxu0 %v6424_v50  ;;  %4444 = vmatprep.subr.mxu1 %v6904_v41 }
 0xc64   :  { %v2822_v63 = vpop.f32.mrf.mxu0  ;;  %v2893_v18 = vpop.f32.mrf.mxu1 }
 0xc65   :  { %v2897_v19 = vadd.f32 %v2822_v63, %v1987_v37  ;;  %v2907_v38 = vadd.f32 %v6189_v60, %v2893_v18  ;;  %v6606_v18 = vld [vmem:[#allocation9 + $0x298] sm:$0xff] }
 0xc66   :  { %v4408_v20 = vpop.f32.mrf.mxu1  ;;  %v2824_v23 = vpop.f32.mrf.mxu0 }
 0xc67   :  { %v2899_v21 = vmul.f32 0.5, %v2897_v19  ;;  %v2898_v2 = vadd.f32 %v2824_v23, %v1989_v25  ;;  %v6618_v23 = vld [vmem:[#allocation9 + $0x268] sm:$0xff]  ;;  %v6630_v25 = vld [vmem:[#allocation9 + $0x238] sm:$0xff] }
 0xc69   :  { %4632 = vtanh.f32 %v2899_v21  ;;  %v2900_v7 = vmul.f32 0.5, %v2898_v2  ;;  %v6612_v21 = vld [vmem:[#allocation9 + $0x280] sm:$0xff] }
 0xc6a   :  { %v6636_v2 = vld [vmem:[#allocation9 + $0x220] sm:$0xff] }
 0xc6b   :  { %4634 = vtanh.f32 %v2900_v7  ;;  %v6642_v7 = vld [vmem:[#allocation9 + $0x208] sm:$0xff] }
 0xc76   :  { %v4633_v26 = vpop.eup %4632 }
 0xc77   :  { %v2903_v27 = vmul.f32 0.5, %v4633_v26  ;;  %v6648_v26 = vld [vmem:[#allocation9 + $0x1f0] sm:$0xff] }
 0xc78   :  { %v4635_v59 = vpop.eup %4634 }
 0xc79   :  { %v2905_v29 = vadd.f32 0.5, %v2903_v27  ;;  %v2904_v22 = vmul.f32 0.5, %v4635_v59  ;;  %v6654_v27 = vld [vmem:[#allocation9 + $0x1d8] sm:$0xff] }
 0xc7b   :  { %v2908_v8 = vmul.f32 %v2907_v38, %v2905_v29  ;;  %v2906_v33 = vadd.f32 0.5, %v2904_v22  ;;  %v6660_v29 = vld [vmem:[#allocation9 + $0x1c0] sm:$0xff]  ;;  %v6666_v38 = vld [vmem:[#allocation9 + $0x1a8] sm:$0xff] }
 0xc7c   :  { %7041 = vst [vmem:[#allocation20_spill] sm:$0xff] %v6660_v29  ;;  %7042 = vst [vmem:[#allocation32_spill] sm:$0xff] %v6666_v38 }
 0xc7d   :  { %v2909_v44 = vadd.f32 %v2908_v8, %v2096_v1  ;;  %v2911_v34 = vsub.f32 1.0, %v2906_v33  ;;  %v2913_v63 = vmul.f32 %v2906_v33, %v6436_v4  ;;  %v6600_v4 = vld [vmem:[#allocation9 + $0x2b0] sm:$0xff] }
 0xc7e   :  { %v7044_v1 = vld [vmem:[#allocation34_spill] sm:$0xff] }
 0xc7f   :  { %4636 = vtanh.f32 %v2909_v44  ;;  %v1993_v8 = vadd.f32 %v7044_v1, %v7030_v6  ;;  %v7046_v1 = vld [vmem:[#allocation44_spill] sm:$0xff] }
 0xc80   :  { %v2101_v6 = vadd.f32 %v7046_v1, %v6194_v30  ;;  %v3392_v1 = vld [vmem:[#allocation10] sm:$0xff] }
 0xc8c   :  { %v4637_v37 = vpop.eup %4636 }
 0xc8d   :  { %v2912_v19 = vmul.f32 %v4637_v37, %v2911_v34 }
 0xc8f   :  { %v6583_v20 = vadd.f32 %v2913_v63, %v2912_v19  ;;  %v7045_v63 = vld [vmem:[#allocation43_spill] sm:$0xff] }
 0xc90   :  { %v1995_v19 = vadd.f32 %v7045_v63, %v7008_v5 }
 0xc91   :  { %2980 = vmatmul.mubr.f32.vlgmr.msra.gmra.mxu0 %v6583_v20  ;;  %4442 = vmatmul.mubr.f32.vlgmr.msra.gmra.mxu1 %v6583_v20 }
 0xc92   :  { %3075 = vmatpush1.msra.mxu0 %v6440_v11  ;;  %4445 = vmatpush3.msra.mxu1 %v6443_v15 }
 0xc93   :  { %3076 = vmatprep.subr.mxu0 %v6446_v17  ;;  %4446 = vmatprep.subr.mxu1 %v6904_v41 }
 0xc94   :  { %3077 = vmatpush1.msra.mxu0 %v6450_v45  ;;  %4447 = vmatpush3.msra.mxu1 %v6453_v10 }
 0xc95   :  { %3078 = vmatprep.subr.mxu0 %v6456_v47  ;;  %4448 = vmatprep.subr.mxu1 %v6904_v41 }
 0xc96   :  { %3079 = vmatpush1.msra.mxu0 %v6460_v0  ;;  %4449 = vmatpush3.msra.mxu1 %v6463_v28 }
 0xc97   :  { %3080 = vmatprep.subr.mxu0 %v6466_v58  ;;  %4450 = vmatprep.subr.mxu1 %v6904_v41 }
 0xc98   :  { %3081 = vmatpush1.msra.mxu0 %v6470_v46  ;;  %4451 = vmatpush3.msra.mxu1 %v6600_v4 }
 0xc99   :  { %3082 = vmatprep.subr.mxu0 %v6474_v3  ;;  %4452 = vmatprep.subr.mxu1 %v6904_v41 }
 0xc9a   :  { %3083 = vmatpush1.msra.mxu0 %v6478_v43  ;;  %4453 = vmatpush3.msra.mxu1 %v6606_v18 }
 0xc9b   :  { %3084 = vmatprep.subr.mxu0 %v6482_v35  ;;  %4454 = vmatprep.subr.mxu1 %v6904_v41 }
 0xc9c   :  { %3085 = vmatpush1.msra.mxu0 %v6486_v48  ;;  %4455 = vmatpush3.msra.mxu1 %v6612_v21 }
 0xc9d   :  { %3086 = vmatprep.subr.mxu0 %v6490_v31  ;;  %4456 = vmatprep.subr.mxu1 %v6904_v41 }
 0xc9e   :  { %3087 = vmatpush1.msra.mxu0 %v6494_v16  ;;  %4457 = vmatpush3.msra.mxu1 %v6618_v23 }
 0xc9f   :  { %3088 = vmatprep.subr.mxu0 %v6498_v55  ;;  %4458 = vmatprep.subr.mxu1 %v6904_v41 }
 0xca0   :  { %3089 = vmatpush1.msra.mxu0 %v6502_v62  ;;  %4459 = vmatpush3.msra.mxu1 %v6624_v24 }
 0xca1   :  { %3090 = vmatprep.subr.mxu0 %v6506_v32  ;;  %4460 = vmatprep.subr.mxu1 %v6904_v41 }
 0xca2   :  { %3091 = vmatpush1.msra.mxu0 %v6510_v49  ;;  %4461 = vmatpush3.msra.mxu1 %v6630_v25 }
 0xca3   :  { %3092 = vmatprep.subr.mxu0 %v6514_v36  ;;  %4462 = vmatprep.subr.mxu1 %v6904_v41 }
 0xca4   :  { %3093 = vmatpush1.msra.mxu0 %v6518_v51  ;;  %4463 = vmatpush3.msra.mxu1 %v6636_v2 }
 0xca5   :  { %3094 = vmatprep.subr.mxu0 %v6522_v56  ;;  %4464 = vmatprep.subr.mxu1 %v6904_v41 }
 0xca6   :  { %3095 = vmatpush1.msra.mxu0 %v6526_v52  ;;  %4465 = vmatpush3.msra.mxu1 %v6642_v7 }
 0xca7   :  { %3096 = vmatprep.subr.mxu0 %v6530_v61  ;;  %4466 = vmatprep.subr.mxu1 %v6904_v41 }
 0xca8   :  { %3097 = vmatpush1.msra.mxu0 %v6534_v12  ;;  %4467 = vmatpush3.msra.mxu1 %v6648_v26 }
 0xca9   :  { %3098 = vmatprep.subr.mxu0 %v6538_v9  ;;  %4468 = vmatprep.subr.mxu1 %v6904_v41 }
 0xcaa   :  { %3099 = vmatpush1.msra.mxu0 %v6542_v53  ;;  %4469 = vmatpush3.msra.mxu1 %v6654_v27 }
 0xcab   :  { %3100 = vmatprep.subr.mxu0 %v6546_v40  ;;  %4470 = vmatprep.subr.mxu1 %v6904_v41 }
 0xcac   :  { %3101 = vmatpush1.msra.mxu0 %v6550_v13  ;;  %4471 = vmatpush3.msra.mxu1 %v6660_v29 }
 0xcad   :  { %3102 = vmatprep.subr.mxu0 %v6554_v42  ;;  %4472 = vmatprep.subr.mxu1 %v6904_v41 }
 0xcae   :  { %3103 = vmatpush1.msra.mxu0 %v6558_v54  ;;  %4473 = vmatpush3.msra.mxu1 %v6666_v38 }
 0xcaf   :  { %3104 = vmatprep.subr.mxu0 %v6562_v57  ;;  %4474 = vmatprep.subr.mxu1 %v6904_v41 }
 0xcb0   :  { %3105 = vmatpush1.msra.mxu0 %v6566_v14  ;;  %3138 = vmatprep.mubr.f32.mxu0 %v6904_v41 }
 0xcb1   :  { %4475 = vmatpush3.msra.mxu1 %v6673_v39  ;;  %4476 = vmatprep.mubr.msk.f32.mxu1 %vm4864_vm0, %v6904_v41 }
 0xcb2   :  { %3233 = vmatprep.subr.mxu0 %v6424_v50  ;;  %4479 = vmatprep.subr.mxu1 %v6904_v41 }
 0xd51   :  { %v2981_v44 = vpop.f32.mrf.mxu0  ;;  %v3052_v59 = vpop.f32.mrf.mxu1 }
 0xd52   :  { %v3056_v22 = vadd.f32 %v2981_v44, %v1993_v8  ;;  %v3066_v54 = vadd.f32 %v6189_v60, %v3052_v59  ;;  %v7047_v60 = vld [vmem:[#allocation20_spill] sm:$0xff] }
 0xd53   :  { %v4443_v33 = vpop.f32.mrf.mxu1  ;;  %v2983_v37 = vpop.f32.mrf.mxu0  ;;  %v3396_v59 = vld [vmem:[#allocation10 + $0x20] sm:$0xff] }
 0xd54   :  { %v3058_v34 = vmul.f32 0.5, %v3056_v22  ;;  %v3057_v39 = vadd.f32 %v2983_v37, %v1995_v19  ;;  %v3395_v37 = vld [vmem:[#allocation10 + $0x18] sm:$0xff]  ;;  %v3394_v19 = vld [vmem:[#allocation10 + $0x10] sm:$0xff] }
 0xd56   :  { %4638 = vtanh.f32 %v3058_v34  ;;  %v3059_v14 = vmul.f32 0.5, %v3057_v39 }
 0xd58   :  { %4640 = vtanh.f32 %v3059_v14 }
 0xd63   :  { %v4639_v57 = vpop.eup %4638 }
 0xd64   :  { %v3062_v50 = vmul.f32 0.5, %v4639_v57 }
 0xd65   :  { %v4641_v44 = vpop.eup %4640 }
 0xd66   :  { %v3064_v38 = vadd.f32 0.5, %v3062_v50  ;;  %v3063_v22 = vmul.f32 0.5, %v4641_v44  ;;  %v3393_v50 = vld [vmem:[#allocation10 + $0x8] sm:$0xff] }
 0xd68   :  { %v3067_v42 = vmul.f32 %v3066_v54, %v3064_v38  ;;  %v3065_v33 = vadd.f32 0.5, %v3063_v22  ;;  %v3397_v38 = vld [vmem:[#allocation10 + $0x28] sm:$0xff] }
 0xd6a   :  { %v3068_v8 = vadd.f32 %v3067_v42, %v2101_v6  ;;  %v3070_v29 = vsub.f32 1.0, %v3065_v33  ;;  %v3072_v34 = vmul.f32 %v3065_v33, %v6583_v20  ;;  %v7048_v6 = vld [vmem:[#allocation30_spill] sm:$0xff] }
 0xd6c   :  { %4642 = vtanh.f32 %v3068_v8  ;;  %v7058_v8 = vld [vmem:[#allocation37_spill] sm:$0xff] }
 0xd79   :  { %v4643_v63 = vpop.eup %4642 }
 0xd7a   :  { %v3071_v39 = vmul.f32 %v4643_v63, %v3070_v29  ;;  %v3398_v29 = vld [vmem:[#allocation10 + $0x30] sm:$0xff] }
 0xd7c   :  { %v6688_v14 = vadd.f32 %v3072_v34, %v3071_v39 }
 0xd7e   :  { %3139 = vmatmul.mubr.f32.vlgmr.msra.gmra.mxu0 %v6688_v14  ;;  %4477 = vmatmul.mubr.f32.vlgmr.msra.gmra.mxu1 %v6688_v14 }
 0xd7f   :  { %3234 = vmatpush1.msra.mxu0 %v6440_v11  ;;  %4480 = vmatpush3.msra.mxu1 %v6443_v15  ;;  %v7049_v11 = vld [vmem:[#allocation46_spill] sm:$0xff]  ;;  %v7050_v15 = vld [vmem:[#allocation32_spill] sm:$0xff] }
 0xd80   :  { %3235 = vmatprep.subr.mxu0 %v6446_v17  ;;  %4481 = vmatprep.subr.mxu1 %v6904_v41  ;;  %v7051_v17 = vld [vmem:[#allocation41_spill] sm:$0xff] }
 0xd81   :  { %3236 = vmatpush1.msra.mxu0 %v6450_v45  ;;  %4482 = vmatpush3.msra.mxu1 %v6453_v10  ;;  %v7052_v45 = vld [vmem:[#allocation39_spill] sm:$0xff]  ;;  %v7053_v10 = vld [vmem:[#allocation33_spill] sm:$0xff] }
 0xd82   :  { %3237 = vmatprep.subr.mxu0 %v6456_v47  ;;  %4483 = vmatprep.subr.mxu1 %v6904_v41  ;;  %v7054_v47 = vld [vmem:[#allocation36_spill] sm:$0xff] }
 0xd83   :  { %3238 = vmatpush1.msra.mxu0 %v6460_v0  ;;  %4484 = vmatpush3.msra.mxu1 %v6463_v28  ;;  %v7055_v0 = vld [vmem:[#allocation23_spill] sm:$0xff]  ;;  %v2005_v44 = vadd.f32 %v7058_v8, %v7054_v47 }
 0xd84   :  { %3239 = vmatprep.subr.mxu0 %v6466_v58  ;;  %4485 = vmatprep.subr.mxu1 %v6904_v41  ;;  %v1999_v28 = vadd.f32 %v7055_v0, %v7054_v47  ;;  %v7060_v47 = vld [vmem:[#allocation42_spill] sm:$0xff] }
 0xd85   :  { %3240 = vmatpush1.msra.mxu0 %v6470_v46  ;;  %4486 = vmatpush3.msra.mxu1 %v6600_v4  ;;  %v2111_v0 = vadd.f32 %v7060_v47, %v6194_v30 }
 0xd86   :  { %3241 = vmatprep.subr.mxu0 %v6474_v3  ;;  %4487 = vmatprep.subr.mxu1 %v6904_v41 }
 0xd87   :  { %3242 = vmatpush1.msra.mxu0 %v6478_v43  ;;  %4488 = vmatpush3.msra.mxu1 %v6606_v18  ;;  %v3407_v18 = vld [vmem:[#allocation10 + $0x78] sm:$0xff] }
 0xd88   :  { %3243 = vmatprep.subr.mxu0 %v6482_v35  ;;  %4489 = vmatprep.subr.mxu1 %v6904_v41 }
 0xd89   :  { %3244 = vmatpush1.msra.mxu0 %v6486_v48  ;;  %4490 = vmatpush3.msra.mxu1 %v6612_v21  ;;  %v3406_v21 = vld [vmem:[#allocation10 + $0x70] sm:$0xff] }
 0xd8a   :  { %3245 = vmatprep.subr.mxu0 %v6490_v31  ;;  %4491 = vmatprep.subr.mxu1 %v6904_v41  ;;  %v7056_v31 = vld [vmem:[#allocation31_spill] sm:$0xff] }
 0xd8b   :  { %3246 = vmatpush1.msra.mxu0 %v6494_v16  ;;  %4492 = vmatpush3.msra.mxu1 %v6618_v23  ;;  %v2001_v16 = vadd.f32 %v7056_v31, %v7008_v5  ;;  %v3405_v23 = vld [vmem:[#allocation10 + $0x68] sm:$0xff] }
 0xd8c   :  { %3247 = vmatprep.subr.mxu0 %v6498_v55  ;;  %4493 = vmatprep.subr.mxu1 %v6904_v41 }
 0xd8d   :  { %3248 = vmatpush1.msra.mxu0 %v6502_v62  ;;  %4494 = vmatpush3.msra.mxu1 %v6624_v24  ;;  %v3404_v24 = vld [vmem:[#allocation10 + $0x60] sm:$0xff] }
 0xd8e   :  { %3249 = vmatprep.subr.mxu0 %v6506_v32  ;;  %4495 = vmatprep.subr.mxu1 %v6904_v41 }
 0xd8f   :  { %3250 = vmatpush1.msra.mxu0 %v6510_v49  ;;  %4496 = vmatpush3.msra.mxu1 %v6630_v25  ;;  %v3403_v25 = vld [vmem:[#allocation10 + $0x58] sm:$0xff] }
 0xd90   :  { %3251 = vmatprep.subr.mxu0 %v6514_v36  ;;  %4497 = vmatprep.subr.mxu1 %v6904_v41 }
 0xd91   :  { %3252 = vmatpush1.msra.mxu0 %v6518_v51  ;;  %4498 = vmatpush3.msra.mxu1 %v6636_v2  ;;  %v6765_v51 = vld [vmem:[%s6811_s5 + $0x1] ss:$0 sm:$0xff]  ;;  %v3402_v2 = vld [vmem:[#allocation10 + $0x50] sm:$0xff] }
 0xd92   :  { %3253 = vmatprep.subr.mxu0 %v6522_v56  ;;  %4499 = vmatprep.subr.mxu1 %v6904_v41 }
 0xd93   :  { %3254 = vmatpush1.msra.mxu0 %v6526_v52  ;;  %4500 = vmatpush3.msra.mxu1 %v6642_v7  ;;  %v7057_v52 = vld [vmem:[#allocation45_spill] sm:$0xff] }
 0xd94   :  { %3255 = vmatprep.subr.mxu0 %v6530_v61  ;;  %4501 = vmatprep.subr.mxu1 %v6904_v41  ;;  %v2106_v61 = vadd.f32 %v7057_v52, %v6194_v30  ;;  %v3401_v7 = vld [vmem:[#allocation10 + $0x48] sm:$0xff] }
 0xd95   :  { %3256 = vmatpush1.msra.mxu0 %v6534_v12  ;;  %4502 = vmatpush3.msra.mxu1 %v6648_v26  ;;  %v3400_v26 = vld [vmem:[#allocation10 + $0x40] sm:$0xff] }
 0xd96   :  { %3257 = vmatprep.subr.mxu0 %v6538_v9  ;;  %4503 = vmatprep.subr.mxu1 %v6904_v41 }
 0xd97   :  { %3258 = vmatpush1.msra.mxu0 %v6542_v53  ;;  %4504 = vmatpush3.msra.mxu1 %v6654_v27  ;;  %v3399_v27 = vld [vmem:[#allocation10 + $0x38] sm:$0xff] }
 0xd98   :  { %3259 = vmatprep.subr.mxu0 %v6546_v40  ;;  %4505 = vmatprep.subr.mxu1 %v6904_v41 }
 0xd99   :  { %3260 = vmatpush1.msra.mxu0 %v6550_v13  ;;  %4506 = vmatpush3.msra.mxu1 %v7047_v60  ;;  %v7059_v60 = vld [vmem:[#allocation22_spill] sm:$0xff] }
 0xd9a   :  { %3261 = vmatprep.subr.mxu0 %v7048_v6  ;;  %4507 = vmatprep.subr.mxu1 %v6904_v41  ;;  %v2007_v6 = vadd.f32 %v7059_v60, %v7008_v5 }
 0xd9b   :  { %3262 = vmatpush1.msra.mxu0 %v7049_v11  ;;  %4508 = vmatpush3.msra.mxu1 %v7050_v15 }
 0xd9c   :  { %3263 = vmatprep.subr.mxu0 %v7051_v17  ;;  %4509 = vmatprep.subr.mxu1 %v6904_v41 }
 0xd9d   :  { %3264 = vmatpush1.msra.mxu0 %v7052_v45  ;;  %3297 = vmatprep.mubr.f32.mxu0 %v6904_v41 }
 0xd9e   :  { %4510 = vmatpush3.msra.mxu1 %v7053_v10  ;;  %4511 = vmatprep.mubr.msk.f32.mxu1 %vm4864_vm0, %v6904_v41 }
 0xd9f   :  { %4514 = vmatprep.subr.mxu0 %v6904_v41 }
 0xe3e   :  { %v3140_v58 = vpop.f32.mrf.mxu0  ;;  %v3211_v46 = vpop.f32.mrf.mxu1 }
 0xe3f   :  { %v3215_v3 = vadd.f32 %v3140_v58, %v1999_v28  ;;  %v3225_v56 = vadd.f32 %v6765_v51, %v3211_v46 }
 0xe40   :  { %v4478_v43 = vpop.f32.mrf.mxu1  ;;  %v3142_v48 = vpop.f32.mrf.mxu0 }
 0xe41   :  { %v3217_v35 = vmul.f32 0.5, %v3215_v3  ;;  %v3216_v55 = vadd.f32 %v3142_v48, %v2001_v16 }
 0xe43   :  { %4644 = vtanh.f32 %v3217_v35  ;;  %v3218_v62 = vmul.f32 0.5, %v3216_v55  ;;  %v3528_v55 = vld [vmem:[%s6813_s7] ss:$0 sm:$0xff] }
 0xe45   :  { %4646 = vtanh.f32 %v3218_v62 }
 0xe50   :  { %v4645_v32 = vpop.eup %4644 }
 0xe51   :  { %v3221_v49 = vmul.f32 0.5, %v4645_v32 }
 0xe52   :  { %v4647_v53 = vpop.eup %4646 }
 0xe53   :  { %v3223_v36 = vadd.f32 0.5, %v3221_v49  ;;  %v3222_v40 = vmul.f32 0.5, %v4647_v53 }
 0xe55   :  { %v3226_v12 = vmul.f32 %v3225_v56, %v3223_v36  ;;  %v3224_v13 = vadd.f32 0.5, %v3222_v40 }
 0xe57   :  { %v3227_v9 = vadd.f32 %v3226_v12, %v2106_v61  ;;  %v3229_v42 = vsub.f32 1.0, %v3224_v13  ;;  %v3231_v57 = vmul.f32 %v3224_v13, %v6688_v14 }
 0xe59   :  { %4648 = vtanh.f32 %v3227_v9 }
 0xe66   :  { %v4649_v54 = vpop.eup %4648 }
 0xe67   :  { %v3230_v20 = vmul.f32 %v4649_v54, %v3229_v42 }
 0xe69   :  { %v6771_v4 = vadd.f32 %v3231_v57, %v3230_v20 }
 0xe6b   :  { %3298 = vmatmul.mubr.f32.vlgmr.msra.gmra.mxu0 %v6771_v4  ;;  %4512 = vmatmul.mubr.f32.vlgmr.msra.gmra.mxu1 %v6771_v4 }
 0xe6c   :  { %4546 = vmatprep.mubr.msk.f32.mxu0 %vm4864_vm0, %v6904_v41  ;;  %4515 = vmatpush3.msra.mxu0 %v3407_v18 }
 0xe6d   :  { %4516 = vmatprep.subr.mxu0 %v6904_v41 }
 0xe6e   :  { %4517 = vmatpush3.msra.mxu0 %v3406_v21 }
 0xe6f   :  { %4518 = vmatprep.subr.mxu0 %v6904_v41 }
 0xe70   :  { %4519 = vmatpush3.msra.mxu0 %v3405_v23 }
 0xe71   :  { %4520 = vmatprep.subr.mxu0 %v6904_v41 }
 0xe72   :  { %4521 = vmatpush3.msra.mxu0 %v3404_v24 }
 0xe73   :  { %4522 = vmatprep.subr.mxu0 %v6904_v41 }
 0xe74   :  { %4523 = vmatpush3.msra.mxu0 %v3403_v25 }
 0xe75   :  { %4524 = vmatprep.subr.mxu0 %v6904_v41 }
 0xe76   :  { %4525 = vmatpush3.msra.mxu0 %v3402_v2 }
 0xe77   :  { %4526 = vmatprep.subr.mxu0 %v6904_v41 }
 0xe78   :  { %4527 = vmatpush3.msra.mxu0 %v3401_v7 }
 0xe79   :  { %4528 = vmatprep.subr.mxu0 %v6904_v41 }
 0xe7a   :  { %4529 = vmatpush3.msra.mxu0 %v3400_v26 }
 0xe7b   :  { %4530 = vmatprep.subr.mxu0 %v6904_v41 }
 0xe7c   :  { %4531 = vmatpush3.msra.mxu0 %v3399_v27 }
 0xe7d   :  { %4532 = vmatprep.subr.mxu0 %v6904_v41 }
 0xe7e   :  { %4533 = vmatpush3.msra.mxu0 %v3398_v29 }
 0xe7f   :  { %4534 = vmatprep.subr.mxu0 %v6904_v41 }
 0xe80   :  { %4535 = vmatpush3.msra.mxu0 %v3397_v38 }
 0xe81   :  { %4536 = vmatprep.subr.mxu0 %v6904_v41 }
 0xe82   :  { %4537 = vmatpush3.msra.mxu0 %v3396_v59 }
 0xe83   :  { %4538 = vmatprep.subr.mxu0 %v6904_v41 }
 0xe84   :  { %4539 = vmatpush3.msra.mxu0 %v3395_v37 }
 0xe85   :  { %4540 = vmatprep.subr.mxu0 %v6904_v41 }
 0xe86   :  { %4541 = vmatpush3.msra.mxu0 %v3394_v19 }
 0xe87   :  { %4542 = vmatprep.subr.mxu0 %v6904_v41 }
 0xe88   :  { %4543 = vmatpush3.msra.mxu0 %v3393_v50 }
 0xe89   :  { %4544 = vmatprep.subr.mxu0 %v6904_v41 }
 0xe8a   :  { %4545 = vmatpush3.msra.mxu0 %v3392_v1 }
 0xf2b   :  { %v3299_v22 = vpop.f32.mrf.mxu0  ;;  %v3370_v33 = vpop.f32.mrf.mxu1 }
 0xf2c   :  { %v3374_v63 = vadd.f32 %v3299_v22, %v2005_v44  ;;  %v3384_v10 = vadd.f32 %v6765_v51, %v3370_v33 }
 0xf2d   :  { %v4513_v34 = vpop.f32.mrf.mxu1  ;;  %v3301_v14 = vpop.f32.mrf.mxu0 }
 0xf2e   :  { %v3376_v39 = vmul.f32 0.5, %v3374_v63  ;;  %v3375_v11 = vadd.f32 %v3301_v14, %v2007_v6 }
 0xf30   :  { %4650 = vtanh.f32 %v3376_v39  ;;  %v3377_v15 = vmul.f32 0.5, %v3375_v11 }
 0xf32   :  { %4652 = vtanh.f32 %v3377_v15 }
 0xf3d   :  { %v4651_v17 = vpop.eup %4650 }
 0xf3e   :  { %v3380_v45 = vmul.f32 0.5, %v4651_v17 }
 0xf3f   :  { %v4653_v46 = vpop.eup %4652 }
 0xf40   :  { %v3382_v41 = vadd.f32 0.5, %v3380_v45  ;;  %v3381_v3 = vmul.f32 0.5, %v4653_v46 }
 0xf42   :  { %v3385_v28 = vmul.f32 %v3384_v10, %v3382_v41  ;;  %v3383_v43 = vadd.f32 0.5, %v3381_v3 }
 0xf44   :  { %v3386_v58 = vadd.f32 %v3385_v28, %v2111_v0  ;;  %v3388_v35 = vsub.f32 1.0, %v3383_v43  ;;  %v3390_v48 = vmul.f32 %v3383_v43, %v6771_v4 }
 0xf46   :  { %4654 = vtanh.f32 %v3386_v58 }
 0xf53   :  { %v4655_v5 = vpop.eup %4654 }
 0xf54   :  { %v3389_v31 = vmul.f32 %v4655_v5, %v3388_v35 }
 0xf56   :  { %v3391_v16 = vadd.f32 %v3390_v48, %v3389_v31 }
 0xf58   :  { %4547 = vmatmul.mubr.f32.vlgmr.msra.gmra.mxu0 %v3391_v16 }
0x1018   :  { %v3481_v62 = vpop.f32.mrf.mxu0 }
0x1019   :  { %v3482_v32 = vadd.f32 %v3528_v55, %v3481_v62 }
0x101a   :  { %v4548_v30 = vpop.f32.mrf.mxu0 }
0x101b   :  { %3485 = vst [vmem:[%s6814_s8] sm:$0xff] %v3482_v32 }
0x101c   :  { %3490 = vsyncpa [#allocation6], 1 }
0x101d   :  { %3491 = vsyncpa [#allocation8], 1 }
0x101e   :  { %3492 = vsyncpa [#allocation11], 1 }

</bundles_post_ra>
